<compile_context>
chip_gen: v7x
topology: tpu7x:2x2x1
jax: 0.10.0
libtpu: 0.0.40
codegen_flags: <defaults>
</compile_context>

<pallas_src>
import jax
import jax.numpy as jnp
from jax import lax
from jax.experimental import pallas as pl
from jax.experimental.pallas import tpu as pltpu  # noqa: F401  (TPU-specific tuning hooks)


# ----------------------------------------------------------------------------
# Packed-weight layout (rows in the (rows, 4H) "wrest" slab)
# ----------------------------------------------------------------------------
def _pack_layout(hidden_dim, n_layers):
    H = hidden_dim
    layout = {}
    r = 0

    def add(name, rows):
        nonlocal r
        layout[name] = (r, rows)
        r += rows

    add("enc0_whh", H)
    add("dec0_whh", H)
    for l in range(1, n_layers):
        add(f"enc{l}_wih", H)
        add(f"enc{l}_whh", H)
        add(f"dec{l}_wih", H)
        add(f"dec{l}_whh", H)
    add("cls_w", H)                       # lanes [0, V)
    for l in range(1, n_layers):
        add(f"enc{l}_b", 1)
        add(f"dec{l}_b", 1)
    add("cls_b", 1)                       # lanes [0, V)
    return layout, r


# ----------------------------------------------------------------------------
# Fused Pallas kernel
# ----------------------------------------------------------------------------
def _make_seq2seq_kernel(B, S, V, H, n_layers, layout):
    G = 4 * H

    def kernel(xt_ref, y_ref, wx0_ref, wrest_ref, pred_ref, loss_ref):
        # ---- hoisted gate lane mask (g-gate lives in lanes [2H, 3H)) --------
        lane = lax.broadcasted_iota(jnp.int32, (B, G), 1)
        is_g = jnp.logical_and(lane >= 2 * H, lane < 3 * H)

        def wblock(name):               # (H, 4H) weight block
            r, rows = layout[name]
            return wrest_ref[r:r + rows, :]

        def brow(name):                 # (1, 4H) bias row
            r, rows = layout[name]
            return wrest_ref[r:r + rows, :]

        def cell(pre_t, h, c, whh):
            # pre_t already holds x_t @ W_ih^T + (b_ih + b_hh).
            gates = pre_t + jnp.dot(h, whh, preferred_element_type=jnp.float32)
            # Full-vreg activations + lane-mask select (2 EUP pushes, not 4).
            act = jnp.where(is_g, jnp.tanh(gates), jax.nn.sigmoid(gates))
            i_g = act[:, 0:H]
            f_g = act[:, H:2 * H]
            g_g = act[:, 2 * H:3 * H]
            o_g = act[:, 3 * H:4 * H]
            c_new = f_g * c + i_g * g_g
            h_new = o_g * jnp.tanh(c_new)
            return h_new, c_new

        def run_layer(pre, whh, h0, c0):
            # Time loop fully unrolled; h/c carried as vreg values.
            h, c = h0, c0
            ys = []
            for t in range(S):
                h, c = cell(pre[t * B:(t + 1) * B, :], h, c, whh)
                ys.append(h)
            return ys, h, c

        zeros = jnp.zeros((B, H), jnp.float32)

        # ---- fused layer-0 input projection (enc0 + dec0 share x) -----------
        x = xt_ref[...]                                   # (S*B, V) time-major
        w01 = wx0_ref[0:V, :]                             # (V, 8H)
        b01 = wx0_ref[V:V + 1, :]                         # (1, 8H)
        pre01 = jnp.dot(x, w01, preferred_element_type=jnp.float32) + b01
        enc_pre0 = pre01[:, 0:G]                          # vreg-boundary split
        dec_pre0 = pre01[:, G:2 * G]

        # ---- Encoder: stacked LSTM, zero initial state -----------------------
        enc_states = []
        ys, h_f, c_f = run_layer(enc_pre0, wblock("enc0_whh"), zeros, zeros)
        enc_states.append((h_f, c_f))
        for l in range(1, n_layers):
            seq = jnp.concatenate(ys, axis=0)             # (S*B, H)
            pre = (jnp.dot(seq, wblock(f"enc{l}_wih"),
                           preferred_element_type=jnp.float32)
                   + brow(f"enc{l}_b"))
            ys, h_f, c_f = run_layer(pre, wblock(f"enc{l}_whh"), zeros, zeros)
            enc_states.append((h_f, c_f))

        # ---- Decoder: same x input, init state = encoder final state ---------
        ys, _, _ = run_layer(dec_pre0, wblock("dec0_whh"), *enc_states[0])
        for l in range(1, n_layers):
            seq = jnp.concatenate(ys, axis=0)             # (S*B, H)
            pre = (jnp.dot(seq, wblock(f"dec{l}_wih"),
                           preferred_element_type=jnp.float32)
                   + brow(f"dec{l}_b"))
            ys, _, _ = run_layer(pre, wblock(f"dec{l}_whh"), *enc_states[l])

        # ---- Classifier (H -> V): one matmul, one store -----------------------
        dseq = jnp.concatenate(ys, axis=0)                # (S*B, H)
        rcw, _ = layout["cls_w"]
        rcb, _ = layout["cls_b"]
        cls_w = wrest_ref[rcw:rcw + H, 0:V]               # (H, V)
        cls_b = wrest_ref[rcb:rcb + 1, 0:V]               # (1, V)
        pred = (jnp.dot(dseq, cls_w, preferred_element_type=jnp.float32)
                + cls_b)                                  # (S*B, V)
        pred_ref[...] = pred                              # single VMEM store

        # ---- CrossEntropyLoss with class dim = S (PyTorch dim-1 semantics) ----
        y = y_ref[...]                                    # (B, V) int32, classes < S
        steps = [pred[t * B:(t + 1) * B, :] for t in range(S)]
        m = steps[0]
        for p_t in steps[1:]:
            m = jnp.maximum(m, p_t)                       # (B, V)
        sumexp = jnp.zeros_like(m)
        picked = jnp.zeros_like(m)
        for t, p_t in enumerate(steps):
            sumexp = sumexp + jnp.exp(p_t - m)
            picked = picked + jnp.where(y == t, p_t, 0.0)
        lse = jnp.log(sumexp) + m                         # (B, V)
        loss = jnp.sum(lse - picked) / (B * V)            # mean over B*V
        loss_ref[...] = jnp.full((1, 1), loss, dtype=jnp.float32)

    return kernel


# ----------------------------------------------------------------------------
# Forward wrapper: one pallas_call, no grid (whole problem fits VMEM easily)
# ----------------------------------------------------------------------------
def make_seq2seq_forward(n_layers):
    @jax.jit
    def forward(wx0, wrest, x, y):
        """x: (B, S, V) f32; y: (B, V) int32 CE targets in [0, S).

        Returns (pred: (B, S, V), loss: scalar)."""
        B, S, V = x.shape
        H = wrest.shape[1] // 4
        layout, _ = _pack_layout(H, n_layers)

        # Time-major layout for the hoisted input projections (free plumbing).
        xt = x.transpose(1, 0, 2).reshape(S * B, V)

        pred_sb, loss = pl.pallas_call(
            _make_seq2seq_kernel(B, S, V, H, n_layers, layout),
            out_shape=(
                jax.ShapeDtypeStruct((S * B, V), jnp.float32),
                jax.ShapeDtypeStruct((1, 1), jnp.float32),
            ),
        )(xt, y, wx0, wrest)

        pred = pred_sb.reshape(S, B, V).transpose(1, 0, 2)   # back to (B, S, V)
        return pred, loss[0, 0]

    return forward


# ----------------------------------------------------------------------------
# Deterministic parameter init (mimics PyTorch U(-1/sqrt(H), 1/sqrt(H))),
# stored directly in kernel layout: W^T and fused bias (b_ih + b_hh).
# ----------------------------------------------------------------------------
def init_params(key, vocab_size, hidden_dim, n_layers):
    k = 1.0 / jnp.sqrt(jnp.float32(hidden_dim))

    def uni(key, shape):
        return jax.random.uniform(key, shape, jnp.float32, -k, k)

    def lstm_stack(key):
        layers = []
        for layer in range(n_layers):
            din = vocab_size if layer == 0 else hidden_dim
            key, k1, k2, k3, k4 = jax.random.split(key, 5)
            w_ih = uni(k1, (4 * hidden_dim, din))            # PyTorch layout (4H, Din)
            w_hh = uni(k2, (4 * hidden_dim, hidden_dim))     # (4H, H)
            b_ih = uni(k3, (4 * hidden_dim,))
            b_hh = uni(k4, (4 * hidden_dim,))
            layers.append({
                "w_ih_t": jnp.transpose(w_ih),               # (Din, 4H)
                "w_hh_t": jnp.transpose(w_hh),               # (H, 4H)
                "bias": (b_ih + b_hh).reshape(1, 4 * hidden_dim),
            })
        return key, layers

    key, enc = lstm_stack(key)
    key, dec = lstm_stack(key)
    key, kw, kb = jax.random.split(key, 3)
    cls_w = uni(kw, (vocab_size, hidden_dim))                # PyTorch Linear weight (V, H)
    cls_b = uni(kb, (vocab_size,))
    return {"enc": enc, "dec": dec,
            "cls_w_t": jnp.transpose(cls_w),                 # (H, V)
            "cls_b": cls_b.reshape(1, vocab_size)}           # (1, V)


# ----------------------------------------------------------------------------
# One-time packing of all weights into two DMA slabs:
#   wx0   : (V+1, 8H)  = [enc0.W_ih^T | dec0.W_ih^T] with fused biases as row V
#   wrest : (rows, 4H) = every other weight/bias, offsets from _pack_layout
# ----------------------------------------------------------------------------
def pack_params(params, vocab_size, hidden_dim, n_layers):
    H, V, G = hidden_dim, vocab_size, 4 * hidden_dim
    enc, dec = params["enc"], params["dec"]
    layout, total_rows = _pack_layout(H, n_layers)

    wx0 = jnp.zeros((V + 1, 2 * G), jnp.float32)
    wx0 = wx0.at[0:V, 0:G].set(enc[0]["w_ih_t"])
    wx0 = wx0.at[0:V, G:2 * G].set(dec[0]["w_ih_t"])
    wx0 = wx0.at[V:V + 1, 0:G].set(enc[0]["bias"])
    wx0 = wx0.at[V:V + 1, G:2 * G].set(dec[0]["bias"])

    entries = [("enc0_whh", enc[0]["w_hh_t"]), ("dec0_whh", dec[0]["w_hh_t"])]
    for l in range(1, n_layers):
        entries += [(f"enc{l}_wih", enc[l]["w_ih_t"]), (f"enc{l}_whh", enc[l]["w_hh_t"]),
                    (f"dec{l}_wih", dec[l]["w_ih_t"]), (f"dec{l}_whh", dec[l]["w_hh_t"])]
    entries.append(("cls_w", params["cls_w_t"]))             # (H, V) in lanes [0, V)
    for l in range(1, n_layers):
        entries += [(f"enc{l}_b", enc[l]["bias"]), (f"dec{l}_b", dec[l]["bias"])]
    entries.append(("cls_b", params["cls_b"]))               # (1, V) in lanes [0, V)

    wrest = jnp.zeros((total_rows, G), jnp.float32)
    for name, val in entries:
        r, rows = layout[name]
        assert val.shape[0] == rows
        wrest = wrest.at[r:r + rows, 0:val.shape[1]].set(val)
    return wx0, wrest


# ----------------------------------------------------------------------------
if __name__ == "__main__":
    B, S, V, H, N_LAYERS = 2, 8, 16, 32, 2

    root = jax.random.PRNGKey(0)
    k_par, k_tok, k_tgt = jax.random.split(root, 3)

    params = init_params(k_par, V, H, N_LAYERS)
    wx0, wrest = pack_params(params, V, H, N_LAYERS)

    tokens = jax.random.randint(k_tok, (B, S), 0, V)
    x = jax.nn.one_hot(tokens, V, dtype=jnp.float32)          # (B, S, V)
    # CE target: class dim of pred (B, S, V) is S, so y is (B, V) with classes < S
    y = jax.random.randint(k_tgt, (B, V), 0, S).astype(jnp.int32)

    forward = make_seq2seq_forward(N_LAYERS)
    pred, loss = forward(wx0, wrest, x, y)
    pred, loss = jax.block_until_ready((pred, loss))

    assert pred.shape == (B, S, V) and pred.dtype == jnp.float32
    assert loss.shape == () and bool(jnp.isfinite(loss))
    assert bool(jnp.all(jnp.isfinite(pred)))
    print("KERNEL_OK")
</pallas_src>

<mosaic_0001>
module attributes {stable_mosaic.version = 11 : i64} {
  func.func @kernel(%arg0: memref<16x16xf32, #tpu.memory_space<vmem>>, %arg1: memref<2x16xi32, #tpu.memory_space<vmem>>, %arg2: memref<17x256xf32, #tpu.memory_space<vmem>>, %arg3: memref<227x128xf32, #tpu.memory_space<vmem>>, %arg4: memref<16x16xf32, #tpu.memory_space<vmem>>, %arg5: memref<1x1xf32, #tpu.memory_space<vmem>>) attributes {dimension_semantics = [], scalar_prefetch = 0 : i64, scratch_operands = 0 : i64, tpu.core_type = #tpu.core_type<tc>} {
    %0 = tpu.iota {dimensions = array<i32: 1>} : vector<2x128xi32>
    %c64_i32 = arith.constant 64 : i32
    %1 = vector.broadcast %c64_i32 : i32 to vector<2x128xi32>
    %2 = arith.cmpi sge, %0, %1 : vector<2x128xi32>
    %c96_i32 = arith.constant 96 : i32
    %3 = vector.broadcast %c96_i32 : i32 to vector<2x128xi32>
    %4 = arith.cmpi slt, %0, %3 : vector<2x128xi32>
    %5 = arith.andi %2, %4 : vector<2x128xi1>
    %cst = arith.constant 0.000000e+00 : f32
    %6 = vector.broadcast %cst : f32 to vector<2x32xf32>
    %c0 = arith.constant 0 : index
    %c0_0 = arith.constant 0 : index
    %7 = vector.load %arg0[%c0, %c0_0] : memref<16x16xf32, #tpu.memory_space<vmem>>, vector<16x16xf32>
    %c0_1 = arith.constant 0 : index
    %c0_2 = arith.constant 0 : index
    %8 = vector.load %arg2[%c0_1, %c0_2] : memref<17x256xf32, #tpu.memory_space<vmem>>, vector<16x256xf32>
    %c16 = arith.constant 16 : index
    %c0_3 = arith.constant 0 : index
    %9 = vector.load %arg2[%c16, %c0_3] : memref<17x256xf32, #tpu.memory_space<vmem>>, vector<1x256xf32>
    %cst_4 = arith.constant dense<0.000000e+00> : vector<16x256xf32>
    %10 = tpu.matmul %7, %8, %cst_4 {dimension_numbers = #tpu.dot_dimension_numbers<[1], [0], [0], [1], [0, 0, 1, 1], [], []>} : vector<16x16xf32>, vector<16x256xf32>, vector<16x256xf32> -> vector<16x256xf32>
    %11 = vector.broadcast %9 : vector<1x256xf32> to vector<16x256xf32>
    %12 = arith.addf %10, %11 : vector<16x256xf32>
    %13 = vector.extract_strided_slice %12 {offsets = [0, 0], sizes = [16, 128], strides = [1, 1]} : vector<16x256xf32> to vector<16x128xf32>
    %14 = vector.extract_strided_slice %12 {offsets = [0, 128], sizes = [16, 128], strides = [1, 1]} : vector<16x256xf32> to vector<16x128xf32>
    %c0_5 = arith.constant 0 : index
    %c0_6 = arith.constant 0 : index
    %15 = vector.load %arg3[%c0_5, %c0_6] : memref<227x128xf32, #tpu.memory_space<vmem>>, vector<32x128xf32>
    %16 = vector.extract_strided_slice %13 {offsets = [0, 0], sizes = [2, 128], strides = [1, 1]} : vector<16x128xf32> to vector<2x128xf32>
    %cst_7 = arith.constant dense<0.000000e+00> : vector<2x128xf32>
    %17 = tpu.matmul %6, %15, %cst_7 {dimension_numbers = #tpu.dot_dimension_numbers<[1], [0], [0], [1], [0, 0, 1, 1], [], []>} : vector<2x32xf32>, vector<32x128xf32>, vector<2x128xf32> -> vector<2x128xf32>
    %18 = arith.addf %16, %17 : vector<2x128xf32>
    %19 = math.tanh %18 : vector<2x128xf32>
    %20 = arith.negf %18 : vector<2x128xf32>
    %21 = math.exp %20 : vector<2x128xf32>
    %cst_8 = arith.constant 1.000000e+00 : f32
    %22 = vector.broadcast %cst_8 : f32 to vector<2x128xf32>
    %23 = arith.addf %22, %21 : vector<2x128xf32>
    %24 = arith.divf %22, %23 : vector<2x128xf32>
    %25 = arith.select %5, %19, %24 : vector<2x128xi1>, vector<2x128xf32>
    %26 = vector.extract_strided_slice %25 {offsets = [0, 0], sizes = [2, 32], strides = [1, 1]} : vector<2x128xf32> to vector<2x32xf32>
    %27 = vector.extract_strided_slice %25 {offsets = [0, 32], sizes = [2, 32], strides = [1, 1]} : vector<2x128xf32> to vector<2x32xf32>
    %28 = vector.extract_strided_slice %25 {offsets = [0, 64], sizes = [2, 32], strides = [1, 1]} : vector<2x128xf32> to vector<2x32xf32>
    %29 = vector.extract_strided_slice %25 {offsets = [0, 96], sizes = [2, 32], strides = [1, 1]} : vector<2x128xf32> to vector<2x32xf32>
    %30 = arith.mulf %27, %6 : vector<2x32xf32>
    %31 = arith.mulf %26, %28 : vector<2x32xf32>
    %32 = arith.addf %30, %31 : vector<2x32xf32>
    %33 = math.tanh %32 : vector<2x32xf32>
    %34 = arith.mulf %29, %33 : vector<2x32xf32>
    %35 = vector.extract_strided_slice %13 {offsets = [2, 0], sizes = [2, 128], strides = [1, 1]} : vector<16x128xf32> to vector<2x128xf32>
    %cst_9 = arith.constant dense<0.000000e+00> : vector<2x128xf32>
    %36 = tpu.matmul %34, %15, %cst_9 {dimension_numbers = #tpu.dot_dimension_numbers<[1], [0], [0], [1], [0, 0, 1, 1], [], []>} : vector<2x32xf32>, vector<32x128xf32>, vector<2x128xf32> -> vector<2x128xf32>
    %37 = arith.addf %35, %36 : vector<2x128xf32>
    %38 = math.tanh %37 : vector<2x128xf32>
    %39 = arith.negf %37 : vector<2x128xf32>
    %40 = math.exp %39 : vector<2x128xf32>
    %cst_10 = arith.constant 1.000000e+00 : f32
    %41 = vector.broadcast %cst_10 : f32 to vector<2x128xf32>
    %42 = arith.addf %41, %40 : vector<2x128xf32>
    %43 = arith.divf %41, %42 : vector<2x128xf32>
    %44 = arith.select %5, %38, %43 : vector<2x128xi1>, vector<2x128xf32>
    %45 = vector.extract_strided_slice %44 {offsets = [0, 0], sizes = [2, 32], strides = [1, 1]} : vector<2x128xf32> to vector<2x32xf32>
    %46 = vector.extract_strided_slice %44 {offsets = [0, 32], sizes = [2, 32], strides = [1, 1]} : vector<2x128xf32> to vector<2x32xf32>
    %47 = vector.extract_strided_slice %44 {offsets = [0, 64], sizes = [2, 32], strides = [1, 1]} : vector<2x128xf32> to vector<2x32xf32>
    %48 = vector.extract_strided_slice %44 {offsets = [0, 96], sizes = [2, 32], strides = [1, 1]} : vector<2x128xf32> to vector<2x32xf32>
    %49 = arith.mulf %46, %32 : vector<2x32xf32>
    %50 = arith.mulf %45, %47 : vector<2x32xf32>
    %51 = arith.addf %49, %50 : vector<2x32xf32>
    %52 = math.tanh %51 : vector<2x32xf32>
    %53 = arith.mulf %48, %52 : vector<2x32xf32>
    %54 = vector.extract_strided_slice %13 {offsets = [4, 0], sizes = [2, 128], strides = [1, 1]} : vector<16x128xf32> to vector<2x128xf32>
    %cst_11 = arith.constant dense<0.000000e+00> : vector<2x128xf32>
    %55 = tpu.matmul %53, %15, %cst_11 {dimension_numbers = #tpu.dot_dimension_numbers<[1], [0], [0], [1], [0, 0, 1, 1], [], []>} : vector<2x32xf32>, vector<32x128xf32>, vector<2x128xf32> -> vector<2x128xf32>
    %56 = arith.addf %54, %55 : vector<2x128xf32>
    %57 = math.tanh %56 : vector<2x128xf32>
    %58 = arith.negf %56 : vector<2x128xf32>
    %59 = math.exp %58 : vector<2x128xf32>
    %cst_12 = arith.constant 1.000000e+00 : f32
    %60 = vector.broadcast %cst_12 : f32 to vector<2x128xf32>
    %61 = arith.addf %60, %59 : vector<2x128xf32>
    %62 = arith.divf %60, %61 : vector<2x128xf32>
    %63 = arith.select %5, %57, %62 : vector<2x128xi1>, vector<2x128xf32>
    %64 = vector.extract_strided_slice %63 {offsets = [0, 0], sizes = [2, 32], strides = [1, 1]} : vector<2x128xf32> to vector<2x32xf32>
    %65 = vector.extract_strided_slice %63 {offsets = [0, 32], sizes = [2, 32], strides = [1, 1]} : vector<2x128xf32> to vector<2x32xf32>
    %66 = vector.extract_strided_slice %63 {offsets = [0, 64], sizes = [2, 32], strides = [1, 1]} : vector<2x128xf32> to vector<2x32xf32>
    %67 = vector.extract_strided_slice %63 {offsets = [0, 96], sizes = [2, 32], strides = [1, 1]} : vector<2x128xf32> to vector<2x32xf32>
    %68 = arith.mulf %65, %51 : vector<2x32xf32>
    %69 = arith.mulf %64, %66 : vector<2x32xf32>
    %70 = arith.addf %68, %69 : vector<2x32xf32>
    %71 = math.tanh %70 : vector<2x32xf32>
    %72 = arith.mulf %67, %71 : vector<2x32xf32>
    %73 = vector.extract_strided_slice %13 {offsets = [6, 0], sizes = [2, 128], strides = [1, 1]} : vector<16x128xf32> to vector<2x128xf32>
    %cst_13 = arith.constant dense<0.000000e+00> : vector<2x128xf32>
    %74 = tpu.matmul %72, %15, %cst_13 {dimension_numbers = #tpu.dot_dimension_numbers<[1], [0], [0], [1], [0, 0, 1, 1], [], []>} : vector<2x32xf32>, vector<32x128xf32>, vector<2x128xf32> -> vector<2x128xf32>
    %75 = arith.addf %73, %74 : vector<2x128xf32>
    %76 = math.tanh %75 : vector<2x128xf32>
    %77 = arith.negf %75 : vector<2x128xf32>
    %78 = math.exp %77 : vector<2x128xf32>
    %cst_14 = arith.constant 1.000000e+00 : f32
    %79 = vector.broadcast %cst_14 : f32 to vector<2x128xf32>
    %80 = arith.addf %79, %78 : vector<2x128xf32>
    %81 = arith.divf %79, %80 : vector<2x128xf32>
    %82 = arith.select %5, %76, %81 : vector<2x128xi1>, vector<2x128xf32>
    %83 = vector.extract_strided_slice %82 {offsets = [0, 0], sizes = [2, 32], strides = [1, 1]} : vector<2x128xf32> to vector<2x32xf32>
    %84 = vector.extract_strided_slice %82 {offsets = [0, 32], sizes = [2, 32], strides = [1, 1]} : vector<2x128xf32> to vector<2x32xf32>
    %85 = vector.extract_strided_slice %82 {offsets = [0, 64], sizes = [2, 32], strides = [1, 1]} : vector<2x128xf32> to vector<2x32xf32>
    %86 = vector.extract_strided_slice %82 {offsets = [0, 96], sizes = [2, 32], strides = [1, 1]} : vector<2x128xf32> to vector<2x32xf32>
    %87 = arith.mulf %84, %70 : vector<2x32xf32>
    %88 = arith.mulf %83, %85 : vector<2x32xf32>
    %89 = arith.addf %87, %88 : vector<2x32xf32>
    %90 = math.tanh %89 : vector<2x32xf32>
    %91 = arith.mulf %86, %90 : vector<2x32xf32>
    %92 = vector.extract_strided_slice %13 {offsets = [8, 0], sizes = [2, 128], strides = [1, 1]} : vector<16x128xf32> to vector<2x128xf32>
    %cst_15 = arith.constant dense<0.000000e+00> : vector<2x128xf32>
    %93 = tpu.matmul %91, %15, %cst_15 {dimension_numbers = #tpu.dot_dimension_numbers<[1], [0], [0], [1], [0, 0, 1, 1], [], []>} : vector<2x32xf32>, vector<32x128xf32>, vector<2x128xf32> -> vector<2x128xf32>
    %94 = arith.addf %92, %93 : vector<2x128xf32>
    %95 = math.tanh %94 : vector<2x128xf32>
    %96 = arith.negf %94 : vector<2x128xf32>
    %97 = math.exp %96 : vector<2x128xf32>
    %cst_16 = arith.constant 1.000000e+00 : f32
    %98 = vector.broadcast %cst_16 : f32 to vector<2x128xf32>
    %99 = arith.addf %98, %97 : vector<2x128xf32>
    %100 = arith.divf %98, %99 : vector<2x128xf32>
    %101 = arith.select %5, %95, %100 : vector<2x128xi1>, vector<2x128xf32>
    %102 = vector.extract_strided_slice %101 {offsets = [0, 0], sizes = [2, 32], strides = [1, 1]} : vector<2x128xf32> to vector<2x32xf32>
    %103 = vector.extract_strided_slice %101 {offsets = [0, 32], sizes = [2, 32], strides = [1, 1]} : vector<2x128xf32> to vector<2x32xf32>
    %104 = vector.extract_strided_slice %101 {offsets = [0, 64], sizes = [2, 32], strides = [1, 1]} : vector<2x128xf32> to vector<2x32xf32>
    %105 = vector.extract_strided_slice %101 {offsets = [0, 96], sizes = [2, 32], strides = [1, 1]} : vector<2x128xf32> to vector<2x32xf32>
    %106 = arith.mulf %103, %89 : vector<2x32xf32>
    %107 = arith.mulf %102, %104 : vector<2x32xf32>
    %108 = arith.addf %106, %107 : vector<2x32xf32>
    %109 = math.tanh %108 : vector<2x32xf32>
    %110 = arith.mulf %105, %109 : vector<2x32xf32>
    %111 = vector.extract_strided_slice %13 {offsets = [10, 0], sizes = [2, 128], strides = [1, 1]} : vector<16x128xf32> to vector<2x128xf32>
    %cst_17 = arith.constant dense<0.000000e+00> : vector<2x128xf32>
    %112 = tpu.matmul %110, %15, %cst_17 {dimension_numbers = #tpu.dot_dimension_numbers<[1], [0], [0], [1], [0, 0, 1, 1], [], []>} : vector<2x32xf32>, vector<32x128xf32>, vector<2x128xf32> -> vector<2x128xf32>
    %113 = arith.addf %111, %112 : vector<2x128xf32>
    %114 = math.tanh %113 : vector<2x128xf32>
    %115 = arith.negf %113 : vector<2x128xf32>
    %116 = math.exp %115 : vector<2x128xf32>
    %cst_18 = arith.constant 1.000000e+00 : f32
    %117 = vector.broadcast %cst_18 : f32 to vector<2x128xf32>
    %118 = arith.addf %117, %116 : vector<2x128xf32>
    %119 = arith.divf %117, %118 : vector<2x128xf32>
    %120 = arith.select %5, %114, %119 : vector<2x128xi1>, vector<2x128xf32>
    %121 = vector.extract_strided_slice %120 {offsets = [0, 0], sizes = [2, 32], strides = [1, 1]} : vector<2x128xf32> to vector<2x32xf32>
    %122 = vector.extract_strided_slice %120 {offsets = [0, 32], sizes = [2, 32], strides = [1, 1]} : vector<2x128xf32> to vector<2x32xf32>
    %123 = vector.extract_strided_slice %120 {offsets = [0, 64], sizes = [2, 32], strides = [1, 1]} : vector<2x128xf32> to vector<2x32xf32>
    %124 = vector.extract_strided_slice %120 {offsets = [0, 96], sizes = [2, 32], strides = [1, 1]} : vector<2x128xf32> to vector<2x32xf32>
    %125 = arith.mulf %122, %108 : vector<2x32xf32>
    %126 = arith.mulf %121, %123 : vector<2x32xf32>
    %127 = arith.addf %125, %126 : vector<2x32xf32>
    %128 = math.tanh %127 : vector<2x32xf32>
    %129 = arith.mulf %124, %128 : vector<2x32xf32>
    %130 = vector.extract_strided_slice %13 {offsets = [12, 0], sizes = [2, 128], strides = [1, 1]} : vector<16x128xf32> to vector<2x128xf32>
    %cst_19 = arith.constant dense<0.000000e+00> : vector<2x128xf32>
    %131 = tpu.matmul %129, %15, %cst_19 {dimension_numbers = #tpu.dot_dimension_numbers<[1], [0], [0], [1], [0, 0, 1, 1], [], []>} : vector<2x32xf32>, vector<32x128xf32>, vector<2x128xf32> -> vector<2x128xf32>
    %132 = arith.addf %130, %131 : vector<2x128xf32>
    %133 = math.tanh %132 : vector<2x128xf32>
    %134 = arith.negf %132 : vector<2x128xf32>
    %135 = math.exp %134 : vector<2x128xf32>
    %cst_20 = arith.constant 1.000000e+00 : f32
    %136 = vector.broadcast %cst_20 : f32 to vector<2x128xf32>
    %137 = arith.addf %136, %135 : vector<2x128xf32>
    %138 = arith.divf %136, %137 : vector<2x128xf32>
    %139 = arith.select %5, %133, %138 : vector<2x128xi1>, vector<2x128xf32>
    %140 = vector.extract_strided_slice %139 {offsets = [0, 0], sizes = [2, 32], strides = [1, 1]} : vector<2x128xf32> to vector<2x32xf32>
    %141 = vector.extract_strided_slice %139 {offsets = [0, 32], sizes = [2, 32], strides = [1, 1]} : vector<2x128xf32> to vector<2x32xf32>
    %142 = vector.extract_strided_slice %139 {offsets = [0, 64], sizes = [2, 32], strides = [1, 1]} : vector<2x128xf32> to vector<2x32xf32>
    %143 = vector.extract_strided_slice %139 {offsets = [0, 96], sizes = [2, 32], strides = [1, 1]} : vector<2x128xf32> to vector<2x32xf32>
    %144 = arith.mulf %141, %127 : vector<2x32xf32>
    %145 = arith.mulf %140, %142 : vector<2x32xf32>
    %146 = arith.addf %144, %145 : vector<2x32xf32>
    %147 = math.tanh %146 : vector<2x32xf32>
    %148 = arith.mulf %143, %147 : vector<2x32xf32>
    %149 = vector.extract_strided_slice %13 {offsets = [14, 0], sizes = [2, 128], strides = [1, 1]} : vector<16x128xf32> to vector<2x128xf32>
    %cst_21 = arith.constant dense<0.000000e+00> : vector<2x128xf32>
    %150 = tpu.matmul %148, %15, %cst_21 {dimension_numbers = #tpu.dot_dimension_numbers<[1], [0], [0], [1], [0, 0, 1, 1], [], []>} : vector<2x32xf32>, vector<32x128xf32>, vector<2x128xf32> -> vector<2x128xf32>
    %151 = arith.addf %149, %150 : vector<2x128xf32>
    %152 = math.tanh %151 : vector<2x128xf32>
    %153 = arith.negf %151 : vector<2x128xf32>
    %154 = math.exp %153 : vector<2x128xf32>
    %cst_22 = arith.constant 1.000000e+00 : f32
    %155 = vector.broadcast %cst_22 : f32 to vector<2x128xf32>
    %156 = arith.addf %155, %154 : vector<2x128xf32>
    %157 = arith.divf %155, %156 : vector<2x128xf32>
    %158 = arith.select %5, %152, %157 : vector<2x128xi1>, vector<2x128xf32>
    %159 = vector.extract_strided_slice %158 {offsets = [0, 0], sizes = [2, 32], strides = [1, 1]} : vector<2x128xf32> to vector<2x32xf32>
    %160 = vector.extract_strided_slice %158 {offsets = [0, 32], sizes = [2, 32], strides = [1, 1]} : vector<2x128xf32> to vector<2x32xf32>
    %161 = vector.extract_strided_slice %158 {offsets = [0, 64], sizes = [2, 32], strides = [1, 1]} : vector<2x128xf32> to vector<2x32xf32>
    %162 = vector.extract_strided_slice %158 {offsets = [0, 96], sizes = [2, 32], strides = [1, 1]} : vector<2x128xf32> to vector<2x32xf32>
    %163 = arith.mulf %160, %146 : vector<2x32xf32>
    %164 = arith.mulf %159, %161 : vector<2x32xf32>
    %165 = arith.addf %163, %164 : vector<2x32xf32>
    %166 = math.tanh %165 : vector<2x32xf32>
    %167 = arith.mulf %162, %166 : vector<2x32xf32>
    %168 = tpu.concatenate %34, %53, %72, %91, %110, %129, %148, %167 in 0 : vector<2x32xf32>, vector<2x32xf32>, vector<2x32xf32>, vector<2x32xf32>, vector<2x32xf32>, vector<2x32xf32>, vector<2x32xf32>, vector<2x32xf32> -> vector<16x32xf32>
    %c64 = arith.constant 64 : index
    %c0_23 = arith.constant 0 : index
    %169 = vector.load %arg3[%c64, %c0_23] : memref<227x128xf32, #tpu.memory_space<vmem>>, vector<32x128xf32>
    %cst_24 = arith.constant dense<0.000000e+00> : vector<16x128xf32>
    %170 = tpu.matmul %168, %169, %cst_24 {dimension_numbers = #tpu.dot_dimension_numbers<[1], [0], [0], [1], [0, 0, 1, 1], [], []>} : vector<16x32xf32>, vector<32x128xf32>, vector<16x128xf32> -> vector<16x128xf32>
    %c224 = arith.constant 224 : index
    %c0_25 = arith.constant 0 : index
    %171 = vector.load %arg3[%c224, %c0_25] : memref<227x128xf32, #tpu.memory_space<vmem>>, vector<1x128xf32>
    %172 = vector.broadcast %171 : vector<1x128xf32> to vector<16x128xf32>
    %173 = arith.addf %170, %172 : vector<16x128xf32>
    %c96 = arith.constant 96 : index
    %c0_26 = arith.constant 0 : index
    %174 = vector.load %arg3[%c96, %c0_26] : memref<227x128xf32, #tpu.memory_space<vmem>>, vector<32x128xf32>
    %175 = vector.extract_strided_slice %173 {offsets = [0, 0], sizes = [2, 128], strides = [1, 1]} : vector<16x128xf32> to vector<2x128xf32>
    %cst_27 = arith.constant dense<0.000000e+00> : vector<2x128xf32>
    %176 = tpu.matmul %6, %174, %cst_27 {dimension_numbers = #tpu.dot_dimension_numbers<[1], [0], [0], [1], [0, 0, 1, 1], [], []>} : vector<2x32xf32>, vector<32x128xf32>, vector<2x128xf32> -> vector<2x128xf32>
    %177 = arith.addf %175, %176 : vector<2x128xf32>
    %178 = math.tanh %177 : vector<2x128xf32>
    %179 = arith.negf %177 : vector<2x128xf32>
    %180 = math.exp %179 : vector<2x128xf32>
    %cst_28 = arith.constant 1.000000e+00 : f32
    %181 = vector.broadcast %cst_28 : f32 to vector<2x128xf32>
    %182 = arith.addf %181, %180 : vector<2x128xf32>
    %183 = arith.divf %181, %182 : vector<2x128xf32>
    %184 = arith.select %5, %178, %183 : vector<2x128xi1>, vector<2x128xf32>
    %185 = vector.extract_strided_slice %184 {offsets = [0, 0], sizes = [2, 32], strides = [1, 1]} : vector<2x128xf32> to vector<2x32xf32>
    %186 = vector.extract_strided_slice %184 {offsets = [0, 32], sizes = [2, 32], strides = [1, 1]} : vector<2x128xf32> to vector<2x32xf32>
    %187 = vector.extract_strided_slice %184 {offsets = [0, 64], sizes = [2, 32], strides = [1, 1]} : vector<2x128xf32> to vector<2x32xf32>
    %188 = vector.extract_strided_slice %184 {offsets = [0, 96], sizes = [2, 32], strides = [1, 1]} : vector<2x128xf32> to vector<2x32xf32>
    %189 = arith.mulf %186, %6 : vector<2x32xf32>
    %190 = arith.mulf %185, %187 : vector<2x32xf32>
    %191 = arith.addf %189, %190 : vector<2x32xf32>
    %192 = math.tanh %191 : vector<2x32xf32>
    %193 = arith.mulf %188, %192 : vector<2x32xf32>
    %194 = vector.extract_strided_slice %173 {offsets = [2, 0], sizes = [2, 128], strides = [1, 1]} : vector<16x128xf32> to vector<2x128xf32>
    %cst_29 = arith.constant dense<0.000000e+00> : vector<2x128xf32>
    %195 = tpu.matmul %193, %174, %cst_29 {dimension_numbers = #tpu.dot_dimension_numbers<[1], [0], [0], [1], [0, 0, 1, 1], [], []>} : vector<2x32xf32>, vector<32x128xf32>, vector<2x128xf32> -> vector<2x128xf32>
    %196 = arith.addf %194, %195 : vector<2x128xf32>
    %197 = math.tanh %196 : vector<2x128xf32>
    %198 = arith.negf %196 : vector<2x128xf32>
    %199 = math.exp %198 : vector<2x128xf32>
    %cst_30 = arith.constant 1.000000e+00 : f32
    %200 = vector.broadcast %cst_30 : f32 to vector<2x128xf32>
    %201 = arith.addf %200, %199 : vector<2x128xf32>
    %202 = arith.divf %200, %201 : vector<2x128xf32>
    %203 = arith.select %5, %197, %202 : vector<2x128xi1>, vector<2x128xf32>
    %204 = vector.extract_strided_slice %203 {offsets = [0, 0], sizes = [2, 32], strides = [1, 1]} : vector<2x128xf32> to vector<2x32xf32>
    %205 = vector.extract_strided_slice %203 {offsets = [0, 32], sizes = [2, 32], strides = [1, 1]} : vector<2x128xf32> to vector<2x32xf32>
    %206 = vector.extract_strided_slice %203 {offsets = [0, 64], sizes = [2, 32], strides = [1, 1]} : vector<2x128xf32> to vector<2x32xf32>
    %207 = vector.extract_strided_slice %203 {offsets = [0, 96], sizes = [2, 32], strides = [1, 1]} : vector<2x128xf32> to vector<2x32xf32>
    %208 = arith.mulf %205, %191 : vector<2x32xf32>
    %209 = arith.mulf %204, %206 : vector<2x32xf32>
    %210 = arith.addf %208, %209 : vector<2x32xf32>
    %211 = math.tanh %210 : vector<2x32xf32>
    %212 = arith.mulf %207, %211 : vector<2x32xf32>
    %213 = vector.extract_strided_slice %173 {offsets = [4, 0], sizes = [2, 128], strides = [1, 1]} : vector<16x128xf32> to vector<2x128xf32>
    %cst_31 = arith.constant dense<0.000000e+00> : vector<2x128xf32>
    %214 = tpu.matmul %212, %174, %cst_31 {dimension_numbers = #tpu.dot_dimension_numbers<[1], [0], [0], [1], [0, 0, 1, 1], [], []>} : vector<2x32xf32>, vector<32x128xf32>, vector<2x128xf32> -> vector<2x128xf32>
    %215 = arith.addf %213, %214 : vector<2x128xf32>
    %216 = math.tanh %215 : vector<2x128xf32>
    %217 = arith.negf %215 : vector<2x128xf32>
    %218 = math.exp %217 : vector<2x128xf32>
    %cst_32 = arith.constant 1.000000e+00 : f32
    %219 = vector.broadcast %cst_32 : f32 to vector<2x128xf32>
    %220 = arith.addf %219, %218 : vector<2x128xf32>
    %221 = arith.divf %219, %220 : vector<2x128xf32>
    %222 = arith.select %5, %216, %221 : vector<2x128xi1>, vector<2x128xf32>
    %223 = vector.extract_strided_slice %222 {offsets = [0, 0], sizes = [2, 32], strides = [1, 1]} : vector<2x128xf32> to vector<2x32xf32>
    %224 = vector.extract_strided_slice %222 {offsets = [0, 32], sizes = [2, 32], strides = [1, 1]} : vector<2x128xf32> to vector<2x32xf32>
    %225 = vector.extract_strided_slice %222 {offsets = [0, 64], sizes = [2, 32], strides = [1, 1]} : vector<2x128xf32> to vector<2x32xf32>
    %226 = vector.extract_strided_slice %222 {offsets = [0, 96], sizes = [2, 32], strides = [1, 1]} : vector<2x128xf32> to vector<2x32xf32>
    %227 = arith.mulf %224, %210 : vector<2x32xf32>
    %228 = arith.mulf %223, %225 : vector<2x32xf32>
    %229 = arith.addf %227, %228 : vector<2x32xf32>
    %230 = math.tanh %229 : vector<2x32xf32>
    %231 = arith.mulf %226, %230 : vector<2x32xf32>
    %232 = vector.extract_strided_slice %173 {offsets = [6, 0], sizes = [2, 128], strides = [1, 1]} : vector<16x128xf32> to vector<2x128xf32>
    %cst_33 = arith.constant dense<0.000000e+00> : vector<2x128xf32>
    %233 = tpu.matmul %231, %174, %cst_33 {dimension_numbers = #tpu.dot_dimension_numbers<[1], [0], [0], [1], [0, 0, 1, 1], [], []>} : vector<2x32xf32>, vector<32x128xf32>, vector<2x128xf32> -> vector<2x128xf32>
    %234 = arith.addf %232, %233 : vector<2x128xf32>
    %235 = math.tanh %234 : vector<2x128xf32>
    %236 = arith.negf %234 : vector<2x128xf32>
    %237 = math.exp %236 : vector<2x128xf32>
    %cst_34 = arith.constant 1.000000e+00 : f32
    %238 = vector.broadcast %cst_34 : f32 to vector<2x128xf32>
    %239 = arith.addf %238, %237 : vector<2x128xf32>
    %240 = arith.divf %238, %239 : vector<2x128xf32>
    %241 = arith.select %5, %235, %240 : vector<2x128xi1>, vector<2x128xf32>
    %242 = vector.extract_strided_slice %241 {offsets = [0, 0], sizes = [2, 32], strides = [1, 1]} : vector<2x128xf32> to vector<2x32xf32>
    %243 = vector.extract_strided_slice %241 {offsets = [0, 32], sizes = [2, 32], strides = [1, 1]} : vector<2x128xf32> to vector<2x32xf32>
    %244 = vector.extract_strided_slice %241 {offsets = [0, 64], sizes = [2, 32], strides = [1, 1]} : vector<2x128xf32> to vector<2x32xf32>
    %245 = vector.extract_strided_slice %241 {offsets = [0, 96], sizes = [2, 32], strides = [1, 1]} : vector<2x128xf32> to vector<2x32xf32>
    %246 = arith.mulf %243, %229 : vector<2x32xf32>
    %247 = arith.mulf %242, %244 : vector<2x32xf32>
    %248 = arith.addf %246, %247 : vector<2x32xf32>
    %249 = math.tanh %248 : vector<2x32xf32>
    %250 = arith.mulf %245, %249 : vector<2x32xf32>
    %251 = vector.extract_strided_slice %173 {offsets = [8, 0], sizes = [2, 128], strides = [1, 1]} : vector<16x128xf32> to vector<2x128xf32>
    %cst_35 = arith.constant dense<0.000000e+00> : vector<2x128xf32>
    %252 = tpu.matmul %250, %174, %cst_35 {dimension_numbers = #tpu.dot_dimension_numbers<[1], [0], [0], [1], [0, 0, 1, 1], [], []>} : vector<2x32xf32>, vector<32x128xf32>, vector<2x128xf32> -> vector<2x128xf32>
    %253 = arith.addf %251, %252 : vector<2x128xf32>
    %254 = math.tanh %253 : vector<2x128xf32>
    %255 = arith.negf %253 : vector<2x128xf32>
    %256 = math.exp %255 : vector<2x128xf32>
    %cst_36 = arith.constant 1.000000e+00 : f32
    %257 = vector.broadcast %cst_36 : f32 to vector<2x128xf32>
    %258 = arith.addf %257, %256 : vector<2x128xf32>
    %259 = arith.divf %257, %258 : vector<2x128xf32>
    %260 = arith.select %5, %254, %259 : vector<2x128xi1>, vector<2x128xf32>
    %261 = vector.extract_strided_slice %260 {offsets = [0, 0], sizes = [2, 32], strides = [1, 1]} : vector<2x128xf32> to vector<2x32xf32>
    %262 = vector.extract_strided_slice %260 {offsets = [0, 32], sizes = [2, 32], strides = [1, 1]} : vector<2x128xf32> to vector<2x32xf32>
    %263 = vector.extract_strided_slice %260 {offsets = [0, 64], sizes = [2, 32], strides = [1, 1]} : vector<2x128xf32> to vector<2x32xf32>
    %264 = vector.extract_strided_slice %260 {offsets = [0, 96], sizes = [2, 32], strides = [1, 1]} : vector<2x128xf32> to vector<2x32xf32>
    %265 = arith.mulf %262, %248 : vector<2x32xf32>
    %266 = arith.mulf %261, %263 : vector<2x32xf32>
    %267 = arith.addf %265, %266 : vector<2x32xf32>
    %268 = math.tanh %267 : vector<2x32xf32>
    %269 = arith.mulf %264, %268 : vector<2x32xf32>
    %270 = vector.extract_strided_slice %173 {offsets = [10, 0], sizes = [2, 128], strides = [1, 1]} : vector<16x128xf32> to vector<2x128xf32>
    %cst_37 = arith.constant dense<0.000000e+00> : vector<2x128xf32>
    %271 = tpu.matmul %269, %174, %cst_37 {dimension_numbers = #tpu.dot_dimension_numbers<[1], [0], [0], [1], [0, 0, 1, 1], [], []>} : vector<2x32xf32>, vector<32x128xf32>, vector<2x128xf32> -> vector<2x128xf32>
    %272 = arith.addf %270, %271 : vector<2x128xf32>
    %273 = math.tanh %272 : vector<2x128xf32>
    %274 = arith.negf %272 : vector<2x128xf32>
    %275 = math.exp %274 : vector<2x128xf32>
    %cst_38 = arith.constant 1.000000e+00 : f32
    %276 = vector.broadcast %cst_38 : f32 to vector<2x128xf32>
    %277 = arith.addf %276, %275 : vector<2x128xf32>
    %278 = arith.divf %276, %277 : vector<2x128xf32>
    %279 = arith.select %5, %273, %278 : vector<2x128xi1>, vector<2x128xf32>
    %280 = vector.extract_strided_slice %279 {offsets = [0, 0], sizes = [2, 32], strides = [1, 1]} : vector<2x128xf32> to vector<2x32xf32>
    %281 = vector.extract_strided_slice %279 {offsets = [0, 32], sizes = [2, 32], strides = [1, 1]} : vector<2x128xf32> to vector<2x32xf32>
    %282 = vector.extract_strided_slice %279 {offsets = [0, 64], sizes = [2, 32], strides = [1, 1]} : vector<2x128xf32> to vector<2x32xf32>
    %283 = vector.extract_strided_slice %279 {offsets = [0, 96], sizes = [2, 32], strides = [1, 1]} : vector<2x128xf32> to vector<2x32xf32>
    %284 = arith.mulf %281, %267 : vector<2x32xf32>
    %285 = arith.mulf %280, %282 : vector<2x32xf32>
    %286 = arith.addf %284, %285 : vector<2x32xf32>
    %287 = math.tanh %286 : vector<2x32xf32>
    %288 = arith.mulf %283, %287 : vector<2x32xf32>
    %289 = vector.extract_strided_slice %173 {offsets = [12, 0], sizes = [2, 128], strides = [1, 1]} : vector<16x128xf32> to vector<2x128xf32>
    %cst_39 = arith.constant dense<0.000000e+00> : vector<2x128xf32>
    %290 = tpu.matmul %288, %174, %cst_39 {dimension_numbers = #tpu.dot_dimension_numbers<[1], [0], [0], [1], [0, 0, 1, 1], [], []>} : vector<2x32xf32>, vector<32x128xf32>, vector<2x128xf32> -> vector<2x128xf32>
    %291 = arith.addf %289, %290 : vector<2x128xf32>
    %292 = math.tanh %291 : vector<2x128xf32>
    %293 = arith.negf %291 : vector<2x128xf32>
    %294 = math.exp %293 : vector<2x128xf32>
    %cst_40 = arith.constant 1.000000e+00 : f32
    %295 = vector.broadcast %cst_40 : f32 to vector<2x128xf32>
    %296 = arith.addf %295, %294 : vector<2x128xf32>
    %297 = arith.divf %295, %296 : vector<2x128xf32>
    %298 = arith.select %5, %292, %297 : vector<2x128xi1>, vector<2x128xf32>
    %299 = vector.extract_strided_slice %298 {offsets = [0, 0], sizes = [2, 32], strides = [1, 1]} : vector<2x128xf32> to vector<2x32xf32>
    %300 = vector.extract_strided_slice %298 {offsets = [0, 32], sizes = [2, 32], strides = [1, 1]} : vector<2x128xf32> to vector<2x32xf32>
    %301 = vector.extract_strided_slice %298 {offsets = [0, 64], sizes = [2, 32], strides = [1, 1]} : vector<2x128xf32> to vector<2x32xf32>
    %302 = vector.extract_strided_slice %298 {offsets = [0, 96], sizes = [2, 32], strides = [1, 1]} : vector<2x128xf32> to vector<2x32xf32>
    %303 = arith.mulf %300, %286 : vector<2x32xf32>
    %304 = arith.mulf %299, %301 : vector<2x32xf32>
    %305 = arith.addf %303, %304 : vector<2x32xf32>
    %306 = math.tanh %305 : vector<2x32xf32>
    %307 = arith.mulf %302, %306 : vector<2x32xf32>
    %308 = vector.extract_strided_slice %173 {offsets = [14, 0], sizes = [2, 128], strides = [1, 1]} : vector<16x128xf32> to vector<2x128xf32>
    %cst_41 = arith.constant dense<0.000000e+00> : vector<2x128xf32>
    %309 = tpu.matmul %307, %174, %cst_41 {dimension_numbers = #tpu.dot_dimension_numbers<[1], [0], [0], [1], [0, 0, 1, 1], [], []>} : vector<2x32xf32>, vector<32x128xf32>, vector<2x128xf32> -> vector<2x128xf32>
    %310 = arith.addf %308, %309 : vector<2x128xf32>
    %311 = math.tanh %310 : vector<2x128xf32>
    %312 = arith.negf %310 : vector<2x128xf32>
    %313 = math.exp %312 : vector<2x128xf32>
    %cst_42 = arith.constant 1.000000e+00 : f32
    %314 = vector.broadcast %cst_42 : f32 to vector<2x128xf32>
    %315 = arith.addf %314, %313 : vector<2x128xf32>
    %316 = arith.divf %314, %315 : vector<2x128xf32>
    %317 = arith.select %5, %311, %316 : vector<2x128xi1>, vector<2x128xf32>
    %318 = vector.extract_strided_slice %317 {offsets = [0, 0], sizes = [2, 32], strides = [1, 1]} : vector<2x128xf32> to vector<2x32xf32>
    %319 = vector.extract_strided_slice %317 {offsets = [0, 32], sizes = [2, 32], strides = [1, 1]} : vector<2x128xf32> to vector<2x32xf32>
    %320 = vector.extract_strided_slice %317 {offsets = [0, 64], sizes = [2, 32], strides = [1, 1]} : vector<2x128xf32> to vector<2x32xf32>
    %321 = vector.extract_strided_slice %317 {offsets = [0, 96], sizes = [2, 32], strides = [1, 1]} : vector<2x128xf32> to vector<2x32xf32>
    %322 = arith.mulf %319, %305 : vector<2x32xf32>
    %323 = arith.mulf %318, %320 : vector<2x32xf32>
    %324 = arith.addf %322, %323 : vector<2x32xf32>
    %325 = math.tanh %324 : vector<2x32xf32>
    %326 = arith.mulf %321, %325 : vector<2x32xf32>
    %c32 = arith.constant 32 : index
    %c0_43 = arith.constant 0 : index
    %327 = vector.load %arg3[%c32, %c0_43] : memref<227x128xf32, #tpu.memory_space<vmem>>, vector<32x128xf32>
    %328 = vector.extract_strided_slice %14 {offsets = [0, 0], sizes = [2, 128], strides = [1, 1]} : vector<16x128xf32> to vector<2x128xf32>
    %cst_44 = arith.constant dense<0.000000e+00> : vector<2x128xf32>
    %329 = tpu.matmul %167, %327, %cst_44 {dimension_numbers = #tpu.dot_dimension_numbers<[1], [0], [0], [1], [0, 0, 1, 1], [], []>} : vector<2x32xf32>, vector<32x128xf32>, vector<2x128xf32> -> vector<2x128xf32>
    %330 = arith.addf %328, %329 : vector<2x128xf32>
    %331 = math.tanh %330 : vector<2x128xf32>
    %332 = arith.negf %330 : vector<2x128xf32>
    %333 = math.exp %332 : vector<2x128xf32>
    %cst_45 = arith.constant 1.000000e+00 : f32
    %334 = vector.broadcast %cst_45 : f32 to vector<2x128xf32>
    %335 = arith.addf %334, %333 : vector<2x128xf32>
    %336 = arith.divf %334, %335 : vector<2x128xf32>
    %337 = arith.select %5, %331, %336 : vector<2x128xi1>, vector<2x128xf32>
    %338 = vector.extract_strided_slice %337 {offsets = [0, 0], sizes = [2, 32], strides = [1, 1]} : vector<2x128xf32> to vector<2x32xf32>
    %339 = vector.extract_strided_slice %337 {offsets = [0, 32], sizes = [2, 32], strides = [1, 1]} : vector<2x128xf32> to vector<2x32xf32>
    %340 = vector.extract_strided_slice %337 {offsets = [0, 64], sizes = [2, 32], strides = [1, 1]} : vector<2x128xf32> to vector<2x32xf32>
    %341 = vector.extract_strided_slice %337 {offsets = [0, 96], sizes = [2, 32], strides = [1, 1]} : vector<2x128xf32> to vector<2x32xf32>
    %342 = arith.mulf %339, %165 : vector<2x32xf32>
    %343 = arith.mulf %338, %340 : vector<2x32xf32>
    %344 = arith.addf %342, %343 : vector<2x32xf32>
    %345 = math.tanh %344 : vector<2x32xf32>
    %346 = arith.mulf %341, %345 : vector<2x32xf32>
    %347 = vector.extract_strided_slice %14 {offsets = [2, 0], sizes = [2, 128], strides = [1, 1]} : vector<16x128xf32> to vector<2x128xf32>
    %cst_46 = arith.constant dense<0.000000e+00> : vector<2x128xf32>
    %348 = tpu.matmul %346, %327, %cst_46 {dimension_numbers = #tpu.dot_dimension_numbers<[1], [0], [0], [1], [0, 0, 1, 1], [], []>} : vector<2x32xf32>, vector<32x128xf32>, vector<2x128xf32> -> vector<2x128xf32>
    %349 = arith.addf %347, %348 : vector<2x128xf32>
    %350 = math.tanh %349 : vector<2x128xf32>
    %351 = arith.negf %349 : vector<2x128xf32>
    %352 = math.exp %351 : vector<2x128xf32>
    %cst_47 = arith.constant 1.000000e+00 : f32
    %353 = vector.broadcast %cst_47 : f32 to vector<2x128xf32>
    %354 = arith.addf %353, %352 : vector<2x128xf32>
    %355 = arith.divf %353, %354 : vector<2x128xf32>
    %356 = arith.select %5, %350, %355 : vector<2x128xi1>, vector<2x128xf32>
    %357 = vector.extract_strided_slice %356 {offsets = [0, 0], sizes = [2, 32], strides = [1, 1]} : vector<2x128xf32> to vector<2x32xf32>
    %358 = vector.extract_strided_slice %356 {offsets = [0, 32], sizes = [2, 32], strides = [1, 1]} : vector<2x128xf32> to vector<2x32xf32>
    %359 = vector.extract_strided_slice %356 {offsets = [0, 64], sizes = [2, 32], strides = [1, 1]} : vector<2x128xf32> to vector<2x32xf32>
    %360 = vector.extract_strided_slice %356 {offsets = [0, 96], sizes = [2, 32], strides = [1, 1]} : vector<2x128xf32> to vector<2x32xf32>
    %361 = arith.mulf %358, %344 : vector<2x32xf32>
    %362 = arith.mulf %357, %359 : vector<2x32xf32>
    %363 = arith.addf %361, %362 : vector<2x32xf32>
    %364 = math.tanh %363 : vector<2x32xf32>
    %365 = arith.mulf %360, %364 : vector<2x32xf32>
    %366 = vector.extract_strided_slice %14 {offsets = [4, 0], sizes = [2, 128], strides = [1, 1]} : vector<16x128xf32> to vector<2x128xf32>
    %cst_48 = arith.constant dense<0.000000e+00> : vector<2x128xf32>
    %367 = tpu.matmul %365, %327, %cst_48 {dimension_numbers = #tpu.dot_dimension_numbers<[1], [0], [0], [1], [0, 0, 1, 1], [], []>} : vector<2x32xf32>, vector<32x128xf32>, vector<2x128xf32> -> vector<2x128xf32>
    %368 = arith.addf %366, %367 : vector<2x128xf32>
    %369 = math.tanh %368 : vector<2x128xf32>
    %370 = arith.negf %368 : vector<2x128xf32>
    %371 = math.exp %370 : vector<2x128xf32>
    %cst_49 = arith.constant 1.000000e+00 : f32
    %372 = vector.broadcast %cst_49 : f32 to vector<2x128xf32>
    %373 = arith.addf %372, %371 : vector<2x128xf32>
    %374 = arith.divf %372, %373 : vector<2x128xf32>
    %375 = arith.select %5, %369, %374 : vector<2x128xi1>, vector<2x128xf32>
    %376 = vector.extract_strided_slice %375 {offsets = [0, 0], sizes = [2, 32], strides = [1, 1]} : vector<2x128xf32> to vector<2x32xf32>
    %377 = vector.extract_strided_slice %375 {offsets = [0, 32], sizes = [2, 32], strides = [1, 1]} : vector<2x128xf32> to vector<2x32xf32>
    %378 = vector.extract_strided_slice %375 {offsets = [0, 64], sizes = [2, 32], strides = [1, 1]} : vector<2x128xf32> to vector<2x32xf32>
    %379 = vector.extract_strided_slice %375 {offsets = [0, 96], sizes = [2, 32], strides = [1, 1]} : vector<2x128xf32> to vector<2x32xf32>
    %380 = arith.mulf %377, %363 : vector<2x32xf32>
    %381 = arith.mulf %376, %378 : vector<2x32xf32>
    %382 = arith.addf %380, %381 : vector<2x32xf32>
    %383 = math.tanh %382 : vector<2x32xf32>
    %384 = arith.mulf %379, %383 : vector<2x32xf32>
    %385 = vector.extract_strided_slice %14 {offsets = [6, 0], sizes = [2, 128], strides = [1, 1]} : vector<16x128xf32> to vector<2x128xf32>
    %cst_50 = arith.constant dense<0.000000e+00> : vector<2x128xf32>
    %386 = tpu.matmul %384, %327, %cst_50 {dimension_numbers = #tpu.dot_dimension_numbers<[1], [0], [0], [1], [0, 0, 1, 1], [], []>} : vector<2x32xf32>, vector<32x128xf32>, vector<2x128xf32> -> vector<2x128xf32>
    %387 = arith.addf %385, %386 : vector<2x128xf32>
    %388 = math.tanh %387 : vector<2x128xf32>
    %389 = arith.negf %387 : vector<2x128xf32>
    %390 = math.exp %389 : vector<2x128xf32>
    %cst_51 = arith.constant 1.000000e+00 : f32
    %391 = vector.broadcast %cst_51 : f32 to vector<2x128xf32>
    %392 = arith.addf %391, %390 : vector<2x128xf32>
    %393 = arith.divf %391, %392 : vector<2x128xf32>
    %394 = arith.select %5, %388, %393 : vector<2x128xi1>, vector<2x128xf32>
    %395 = vector.extract_strided_slice %394 {offsets = [0, 0], sizes = [2, 32], strides = [1, 1]} : vector<2x128xf32> to vector<2x32xf32>
    %396 = vector.extract_strided_slice %394 {offsets = [0, 32], sizes = [2, 32], strides = [1, 1]} : vector<2x128xf32> to vector<2x32xf32>
    %397 = vector.extract_strided_slice %394 {offsets = [0, 64], sizes = [2, 32], strides = [1, 1]} : vector<2x128xf32> to vector<2x32xf32>
    %398 = vector.extract_strided_slice %394 {offsets = [0, 96], sizes = [2, 32], strides = [1, 1]} : vector<2x128xf32> to vector<2x32xf32>
    %399 = arith.mulf %396, %382 : vector<2x32xf32>
    %400 = arith.mulf %395, %397 : vector<2x32xf32>
    %401 = arith.addf %399, %400 : vector<2x32xf32>
    %402 = math.tanh %401 : vector<2x32xf32>
    %403 = arith.mulf %398, %402 : vector<2x32xf32>
    %404 = vector.extract_strided_slice %14 {offsets = [8, 0], sizes = [2, 128], strides = [1, 1]} : vector<16x128xf32> to vector<2x128xf32>
    %cst_52 = arith.constant dense<0.000000e+00> : vector<2x128xf32>
    %405 = tpu.matmul %403, %327, %cst_52 {dimension_numbers = #tpu.dot_dimension_numbers<[1], [0], [0], [1], [0, 0, 1, 1], [], []>} : vector<2x32xf32>, vector<32x128xf32>, vector<2x128xf32> -> vector<2x128xf32>
    %406 = arith.addf %404, %405 : vector<2x128xf32>
    %407 = math.tanh %406 : vector<2x128xf32>
    %408 = arith.negf %406 : vector<2x128xf32>
    %409 = math.exp %408 : vector<2x128xf32>
    %cst_53 = arith.constant 1.000000e+00 : f32
    %410 = vector.broadcast %cst_53 : f32 to vector<2x128xf32>
    %411 = arith.addf %410, %409 : vector<2x128xf32>
    %412 = arith.divf %410, %411 : vector<2x128xf32>
    %413 = arith.select %5, %407, %412 : vector<2x128xi1>, vector<2x128xf32>
    %414 = vector.extract_strided_slice %413 {offsets = [0, 0], sizes = [2, 32], strides = [1, 1]} : vector<2x128xf32> to vector<2x32xf32>
    %415 = vector.extract_strided_slice %413 {offsets = [0, 32], sizes = [2, 32], strides = [1, 1]} : vector<2x128xf32> to vector<2x32xf32>
    %416 = vector.extract_strided_slice %413 {offsets = [0, 64], sizes = [2, 32], strides = [1, 1]} : vector<2x128xf32> to vector<2x32xf32>
    %417 = vector.extract_strided_slice %413 {offsets = [0, 96], sizes = [2, 32], strides = [1, 1]} : vector<2x128xf32> to vector<2x32xf32>
    %418 = arith.mulf %415, %401 : vector<2x32xf32>
    %419 = arith.mulf %414, %416 : vector<2x32xf32>
    %420 = arith.addf %418, %419 : vector<2x32xf32>
    %421 = math.tanh %420 : vector<2x32xf32>
    %422 = arith.mulf %417, %421 : vector<2x32xf32>
    %423 = vector.extract_strided_slice %14 {offsets = [10, 0], sizes = [2, 128], strides = [1, 1]} : vector<16x128xf32> to vector<2x128xf32>
    %cst_54 = arith.constant dense<0.000000e+00> : vector<2x128xf32>
    %424 = tpu.matmul %422, %327, %cst_54 {dimension_numbers = #tpu.dot_dimension_numbers<[1], [0], [0], [1], [0, 0, 1, 1], [], []>} : vector<2x32xf32>, vector<32x128xf32>, vector<2x128xf32> -> vector<2x128xf32>
    %425 = arith.addf %423, %424 : vector<2x128xf32>
    %426 = math.tanh %425 : vector<2x128xf32>
    %427 = arith.negf %425 : vector<2x128xf32>
    %428 = math.exp %427 : vector<2x128xf32>
    %cst_55 = arith.constant 1.000000e+00 : f32
    %429 = vector.broadcast %cst_55 : f32 to vector<2x128xf32>
    %430 = arith.addf %429, %428 : vector<2x128xf32>
    %431 = arith.divf %429, %430 : vector<2x128xf32>
    %432 = arith.select %5, %426, %431 : vector<2x128xi1>, vector<2x128xf32>
    %433 = vector.extract_strided_slice %432 {offsets = [0, 0], sizes = [2, 32], strides = [1, 1]} : vector<2x128xf32> to vector<2x32xf32>
    %434 = vector.extract_strided_slice %432 {offsets = [0, 32], sizes = [2, 32], strides = [1, 1]} : vector<2x128xf32> to vector<2x32xf32>
    %435 = vector.extract_strided_slice %432 {offsets = [0, 64], sizes = [2, 32], strides = [1, 1]} : vector<2x128xf32> to vector<2x32xf32>
    %436 = vector.extract_strided_slice %432 {offsets = [0, 96], sizes = [2, 32], strides = [1, 1]} : vector<2x128xf32> to vector<2x32xf32>
    %437 = arith.mulf %434, %420 : vector<2x32xf32>
    %438 = arith.mulf %433, %435 : vector<2x32xf32>
    %439 = arith.addf %437, %438 : vector<2x32xf32>
    %440 = math.tanh %439 : vector<2x32xf32>
    %441 = arith.mulf %436, %440 : vector<2x32xf32>
    %442 = vector.extract_strided_slice %14 {offsets = [12, 0], sizes = [2, 128], strides = [1, 1]} : vector<16x128xf32> to vector<2x128xf32>
    %cst_56 = arith.constant dense<0.000000e+00> : vector<2x128xf32>
    %443 = tpu.matmul %441, %327, %cst_56 {dimension_numbers = #tpu.dot_dimension_numbers<[1], [0], [0], [1], [0, 0, 1, 1], [], []>} : vector<2x32xf32>, vector<32x128xf32>, vector<2x128xf32> -> vector<2x128xf32>
    %444 = arith.addf %442, %443 : vector<2x128xf32>
    %445 = math.tanh %444 : vector<2x128xf32>
    %446 = arith.negf %444 : vector<2x128xf32>
    %447 = math.exp %446 : vector<2x128xf32>
    %cst_57 = arith.constant 1.000000e+00 : f32
    %448 = vector.broadcast %cst_57 : f32 to vector<2x128xf32>
    %449 = arith.addf %448, %447 : vector<2x128xf32>
    %450 = arith.divf %448, %449 : vector<2x128xf32>
    %451 = arith.select %5, %445, %450 : vector<2x128xi1>, vector<2x128xf32>
    %452 = vector.extract_strided_slice %451 {offsets = [0, 0], sizes = [2, 32], strides = [1, 1]} : vector<2x128xf32> to vector<2x32xf32>
    %453 = vector.extract_strided_slice %451 {offsets = [0, 32], sizes = [2, 32], strides = [1, 1]} : vector<2x128xf32> to vector<2x32xf32>
    %454 = vector.extract_strided_slice %451 {offsets = [0, 64], sizes = [2, 32], strides = [1, 1]} : vector<2x128xf32> to vector<2x32xf32>
    %455 = vector.extract_strided_slice %451 {offsets = [0, 96], sizes = [2, 32], strides = [1, 1]} : vector<2x128xf32> to vector<2x32xf32>
    %456 = arith.mulf %453, %439 : vector<2x32xf32>
    %457 = arith.mulf %452, %454 : vector<2x32xf32>
    %458 = arith.addf %456, %457 : vector<2x32xf32>
    %459 = math.tanh %458 : vector<2x32xf32>
    %460 = arith.mulf %455, %459 : vector<2x32xf32>
    %461 = vector.extract_strided_slice %14 {offsets = [14, 0], sizes = [2, 128], strides = [1, 1]} : vector<16x128xf32> to vector<2x128xf32>
    %cst_58 = arith.constant dense<0.000000e+00> : vector<2x128xf32>
    %462 = tpu.matmul %460, %327, %cst_58 {dimension_numbers = #tpu.dot_dimension_numbers<[1], [0], [0], [1], [0, 0, 1, 1], [], []>} : vector<2x32xf32>, vector<32x128xf32>, vector<2x128xf32> -> vector<2x128xf32>
    %463 = arith.addf %461, %462 : vector<2x128xf32>
    %464 = math.tanh %463 : vector<2x128xf32>
    %465 = arith.negf %463 : vector<2x128xf32>
    %466 = math.exp %465 : vector<2x128xf32>
    %cst_59 = arith.constant 1.000000e+00 : f32
    %467 = vector.broadcast %cst_59 : f32 to vector<2x128xf32>
    %468 = arith.addf %467, %466 : vector<2x128xf32>
    %469 = arith.divf %467, %468 : vector<2x128xf32>
    %470 = arith.select %5, %464, %469 : vector<2x128xi1>, vector<2x128xf32>
    %471 = vector.extract_strided_slice %470 {offsets = [0, 0], sizes = [2, 32], strides = [1, 1]} : vector<2x128xf32> to vector<2x32xf32>
    %472 = vector.extract_strided_slice %470 {offsets = [0, 32], sizes = [2, 32], strides = [1, 1]} : vector<2x128xf32> to vector<2x32xf32>
    %473 = vector.extract_strided_slice %470 {offsets = [0, 64], sizes = [2, 32], strides = [1, 1]} : vector<2x128xf32> to vector<2x32xf32>
    %474 = vector.extract_strided_slice %470 {offsets = [0, 96], sizes = [2, 32], strides = [1, 1]} : vector<2x128xf32> to vector<2x32xf32>
    %475 = arith.mulf %472, %458 : vector<2x32xf32>
    %476 = arith.mulf %471, %473 : vector<2x32xf32>
    %477 = arith.addf %475, %476 : vector<2x32xf32>
    %478 = math.tanh %477 : vector<2x32xf32>
    %479 = arith.mulf %474, %478 : vector<2x32xf32>
    %480 = tpu.concatenate %346, %365, %384, %403, %422, %441, %460, %479 in 0 : vector<2x32xf32>, vector<2x32xf32>, vector<2x32xf32>, vector<2x32xf32>, vector<2x32xf32>, vector<2x32xf32>, vector<2x32xf32>, vector<2x32xf32> -> vector<16x32xf32>
    %c128 = arith.constant 128 : index
    %c0_60 = arith.constant 0 : index
    %481 = vector.load %arg3[%c128, %c0_60] : memref<227x128xf32, #tpu.memory_space<vmem>>, vector<32x128xf32>
    %cst_61 = arith.constant dense<0.000000e+00> : vector<16x128xf32>
    %482 = tpu.matmul %480, %481, %cst_61 {dimension_numbers = #tpu.dot_dimension_numbers<[1], [0], [0], [1], [0, 0, 1, 1], [], []>} : vector<16x32xf32>, vector<32x128xf32>, vector<16x128xf32> -> vector<16x128xf32>
    %c225 = arith.constant 225 : index
    %c0_62 = arith.constant 0 : index
    %483 = vector.load %arg3[%c225, %c0_62] : memref<227x128xf32, #tpu.memory_space<vmem>>, vector<1x128xf32>
    %484 = vector.broadcast %483 : vector<1x128xf32> to vector<16x128xf32>
    %485 = arith.addf %482, %484 : vector<16x128xf32>
    %c160 = arith.constant 160 : index
    %c0_63 = arith.constant 0 : index
    %486 = vector.load %arg3[%c160, %c0_63] : memref<227x128xf32, #tpu.memory_space<vmem>>, vector<32x128xf32>
    %487 = vector.extract_strided_slice %485 {offsets = [0, 0], sizes = [2, 128], strides = [1, 1]} : vector<16x128xf32> to vector<2x128xf32>
    %cst_64 = arith.constant dense<0.000000e+00> : vector<2x128xf32>
    %488 = tpu.matmul %326, %486, %cst_64 {dimension_numbers = #tpu.dot_dimension_numbers<[1], [0], [0], [1], [0, 0, 1, 1], [], []>} : vector<2x32xf32>, vector<32x128xf32>, vector<2x128xf32> -> vector<2x128xf32>
    %489 = arith.addf %487, %488 : vector<2x128xf32>
    %490 = math.tanh %489 : vector<2x128xf32>
    %491 = arith.negf %489 : vector<2x128xf32>
    %492 = math.exp %491 : vector<2x128xf32>
    %cst_65 = arith.constant 1.000000e+00 : f32
    %493 = vector.broadcast %cst_65 : f32 to vector<2x128xf32>
    %494 = arith.addf %493, %492 : vector<2x128xf32>
    %495 = arith.divf %493, %494 : vector<2x128xf32>
    %496 = arith.select %5, %490, %495 : vector<2x128xi1>, vector<2x128xf32>
    %497 = vector.extract_strided_slice %496 {offsets = [0, 0], sizes = [2, 32], strides = [1, 1]} : vector<2x128xf32> to vector<2x32xf32>
    %498 = vector.extract_strided_slice %496 {offsets = [0, 32], sizes = [2, 32], strides = [1, 1]} : vector<2x128xf32> to vector<2x32xf32>
    %499 = vector.extract_strided_slice %496 {offsets = [0, 64], sizes = [2, 32], strides = [1, 1]} : vector<2x128xf32> to vector<2x32xf32>
    %500 = vector.extract_strided_slice %496 {offsets = [0, 96], sizes = [2, 32], strides = [1, 1]} : vector<2x128xf32> to vector<2x32xf32>
    %501 = arith.mulf %498, %324 : vector<2x32xf32>
    %502 = arith.mulf %497, %499 : vector<2x32xf32>
    %503 = arith.addf %501, %502 : vector<2x32xf32>
    %504 = math.tanh %503 : vector<2x32xf32>
    %505 = arith.mulf %500, %504 : vector<2x32xf32>
    %506 = vector.extract_strided_slice %485 {offsets = [2, 0], sizes = [2, 128], strides = [1, 1]} : vector<16x128xf32> to vector<2x128xf32>
    %cst_66 = arith.constant dense<0.000000e+00> : vector<2x128xf32>
    %507 = tpu.matmul %505, %486, %cst_66 {dimension_numbers = #tpu.dot_dimension_numbers<[1], [0], [0], [1], [0, 0, 1, 1], [], []>} : vector<2x32xf32>, vector<32x128xf32>, vector<2x128xf32> -> vector<2x128xf32>
    %508 = arith.addf %506, %507 : vector<2x128xf32>
    %509 = math.tanh %508 : vector<2x128xf32>
    %510 = arith.negf %508 : vector<2x128xf32>
    %511 = math.exp %510 : vector<2x128xf32>
    %cst_67 = arith.constant 1.000000e+00 : f32
    %512 = vector.broadcast %cst_67 : f32 to vector<2x128xf32>
    %513 = arith.addf %512, %511 : vector<2x128xf32>
    %514 = arith.divf %512, %513 : vector<2x128xf32>
    %515 = arith.select %5, %509, %514 : vector<2x128xi1>, vector<2x128xf32>
    %516 = vector.extract_strided_slice %515 {offsets = [0, 0], sizes = [2, 32], strides = [1, 1]} : vector<2x128xf32> to vector<2x32xf32>
    %517 = vector.extract_strided_slice %515 {offsets = [0, 32], sizes = [2, 32], strides = [1, 1]} : vector<2x128xf32> to vector<2x32xf32>
    %518 = vector.extract_strided_slice %515 {offsets = [0, 64], sizes = [2, 32], strides = [1, 1]} : vector<2x128xf32> to vector<2x32xf32>
    %519 = vector.extract_strided_slice %515 {offsets = [0, 96], sizes = [2, 32], strides = [1, 1]} : vector<2x128xf32> to vector<2x32xf32>
    %520 = arith.mulf %517, %503 : vector<2x32xf32>
    %521 = arith.mulf %516, %518 : vector<2x32xf32>
    %522 = arith.addf %520, %521 : vector<2x32xf32>
    %523 = math.tanh %522 : vector<2x32xf32>
    %524 = arith.mulf %519, %523 : vector<2x32xf32>
    %525 = vector.extract_strided_slice %485 {offsets = [4, 0], sizes = [2, 128], strides = [1, 1]} : vector<16x128xf32> to vector<2x128xf32>
    %cst_68 = arith.constant dense<0.000000e+00> : vector<2x128xf32>
    %526 = tpu.matmul %524, %486, %cst_68 {dimension_numbers = #tpu.dot_dimension_numbers<[1], [0], [0], [1], [0, 0, 1, 1], [], []>} : vector<2x32xf32>, vector<32x128xf32>, vector<2x128xf32> -> vector<2x128xf32>
    %527 = arith.addf %525, %526 : vector<2x128xf32>
    %528 = math.tanh %527 : vector<2x128xf32>
    %529 = arith.negf %527 : vector<2x128xf32>
    %530 = math.exp %529 : vector<2x128xf32>
    %cst_69 = arith.constant 1.000000e+00 : f32
    %531 = vector.broadcast %cst_69 : f32 to vector<2x128xf32>
    %532 = arith.addf %531, %530 : vector<2x128xf32>
    %533 = arith.divf %531, %532 : vector<2x128xf32>
    %534 = arith.select %5, %528, %533 : vector<2x128xi1>, vector<2x128xf32>
    %535 = vector.extract_strided_slice %534 {offsets = [0, 0], sizes = [2, 32], strides = [1, 1]} : vector<2x128xf32> to vector<2x32xf32>
    %536 = vector.extract_strided_slice %534 {offsets = [0, 32], sizes = [2, 32], strides = [1, 1]} : vector<2x128xf32> to vector<2x32xf32>
    %537 = vector.extract_strided_slice %534 {offsets = [0, 64], sizes = [2, 32], strides = [1, 1]} : vector<2x128xf32> to vector<2x32xf32>
    %538 = vector.extract_strided_slice %534 {offsets = [0, 96], sizes = [2, 32], strides = [1, 1]} : vector<2x128xf32> to vector<2x32xf32>
    %539 = arith.mulf %536, %522 : vector<2x32xf32>
    %540 = arith.mulf %535, %537 : vector<2x32xf32>
    %541 = arith.addf %539, %540 : vector<2x32xf32>
    %542 = math.tanh %541 : vector<2x32xf32>
    %543 = arith.mulf %538, %542 : vector<2x32xf32>
    %544 = vector.extract_strided_slice %485 {offsets = [6, 0], sizes = [2, 128], strides = [1, 1]} : vector<16x128xf32> to vector<2x128xf32>
    %cst_70 = arith.constant dense<0.000000e+00> : vector<2x128xf32>
    %545 = tpu.matmul %543, %486, %cst_70 {dimension_numbers = #tpu.dot_dimension_numbers<[1], [0], [0], [1], [0, 0, 1, 1], [], []>} : vector<2x32xf32>, vector<32x128xf32>, vector<2x128xf32> -> vector<2x128xf32>
    %546 = arith.addf %544, %545 : vector<2x128xf32>
    %547 = math.tanh %546 : vector<2x128xf32>
    %548 = arith.negf %546 : vector<2x128xf32>
    %549 = math.exp %548 : vector<2x128xf32>
    %cst_71 = arith.constant 1.000000e+00 : f32
    %550 = vector.broadcast %cst_71 : f32 to vector<2x128xf32>
    %551 = arith.addf %550, %549 : vector<2x128xf32>
    %552 = arith.divf %550, %551 : vector<2x128xf32>
    %553 = arith.select %5, %547, %552 : vector<2x128xi1>, vector<2x128xf32>
    %554 = vector.extract_strided_slice %553 {offsets = [0, 0], sizes = [2, 32], strides = [1, 1]} : vector<2x128xf32> to vector<2x32xf32>
    %555 = vector.extract_strided_slice %553 {offsets = [0, 32], sizes = [2, 32], strides = [1, 1]} : vector<2x128xf32> to vector<2x32xf32>
    %556 = vector.extract_strided_slice %553 {offsets = [0, 64], sizes = [2, 32], strides = [1, 1]} : vector<2x128xf32> to vector<2x32xf32>
    %557 = vector.extract_strided_slice %553 {offsets = [0, 96], sizes = [2, 32], strides = [1, 1]} : vector<2x128xf32> to vector<2x32xf32>
    %558 = arith.mulf %555, %541 : vector<2x32xf32>
    %559 = arith.mulf %554, %556 : vector<2x32xf32>
    %560 = arith.addf %558, %559 : vector<2x32xf32>
    %561 = math.tanh %560 : vector<2x32xf32>
    %562 = arith.mulf %557, %561 : vector<2x32xf32>
    %563 = vector.extract_strided_slice %485 {offsets = [8, 0], sizes = [2, 128], strides = [1, 1]} : vector<16x128xf32> to vector<2x128xf32>
    %cst_72 = arith.constant dense<0.000000e+00> : vector<2x128xf32>
    %564 = tpu.matmul %562, %486, %cst_72 {dimension_numbers = #tpu.dot_dimension_numbers<[1], [0], [0], [1], [0, 0, 1, 1], [], []>} : vector<2x32xf32>, vector<32x128xf32>, vector<2x128xf32> -> vector<2x128xf32>
    %565 = arith.addf %563, %564 : vector<2x128xf32>
    %566 = math.tanh %565 : vector<2x128xf32>
    %567 = arith.negf %565 : vector<2x128xf32>
    %568 = math.exp %567 : vector<2x128xf32>
    %cst_73 = arith.constant 1.000000e+00 : f32
    %569 = vector.broadcast %cst_73 : f32 to vector<2x128xf32>
    %570 = arith.addf %569, %568 : vector<2x128xf32>
    %571 = arith.divf %569, %570 : vector<2x128xf32>
    %572 = arith.select %5, %566, %571 : vector<2x128xi1>, vector<2x128xf32>
    %573 = vector.extract_strided_slice %572 {offsets = [0, 0], sizes = [2, 32], strides = [1, 1]} : vector<2x128xf32> to vector<2x32xf32>
    %574 = vector.extract_strided_slice %572 {offsets = [0, 32], sizes = [2, 32], strides = [1, 1]} : vector<2x128xf32> to vector<2x32xf32>
    %575 = vector.extract_strided_slice %572 {offsets = [0, 64], sizes = [2, 32], strides = [1, 1]} : vector<2x128xf32> to vector<2x32xf32>
    %576 = vector.extract_strided_slice %572 {offsets = [0, 96], sizes = [2, 32], strides = [1, 1]} : vector<2x128xf32> to vector<2x32xf32>
    %577 = arith.mulf %574, %560 : vector<2x32xf32>
    %578 = arith.mulf %573, %575 : vector<2x32xf32>
    %579 = arith.addf %577, %578 : vector<2x32xf32>
    %580 = math.tanh %579 : vector<2x32xf32>
    %581 = arith.mulf %576, %580 : vector<2x32xf32>
    %582 = vector.extract_strided_slice %485 {offsets = [10, 0], sizes = [2, 128], strides = [1, 1]} : vector<16x128xf32> to vector<2x128xf32>
    %cst_74 = arith.constant dense<0.000000e+00> : vector<2x128xf32>
    %583 = tpu.matmul %581, %486, %cst_74 {dimension_numbers = #tpu.dot_dimension_numbers<[1], [0], [0], [1], [0, 0, 1, 1], [], []>} : vector<2x32xf32>, vector<32x128xf32>, vector<2x128xf32> -> vector<2x128xf32>
    %584 = arith.addf %582, %583 : vector<2x128xf32>
    %585 = math.tanh %584 : vector<2x128xf32>
    %586 = arith.negf %584 : vector<2x128xf32>
    %587 = math.exp %586 : vector<2x128xf32>
    %cst_75 = arith.constant 1.000000e+00 : f32
    %588 = vector.broadcast %cst_75 : f32 to vector<2x128xf32>
    %589 = arith.addf %588, %587 : vector<2x128xf32>
    %590 = arith.divf %588, %589 : vector<2x128xf32>
    %591 = arith.select %5, %585, %590 : vector<2x128xi1>, vector<2x128xf32>
    %592 = vector.extract_strided_slice %591 {offsets = [0, 0], sizes = [2, 32], strides = [1, 1]} : vector<2x128xf32> to vector<2x32xf32>
    %593 = vector.extract_strided_slice %591 {offsets = [0, 32], sizes = [2, 32], strides = [1, 1]} : vector<2x128xf32> to vector<2x32xf32>
    %594 = vector.extract_strided_slice %591 {offsets = [0, 64], sizes = [2, 32], strides = [1, 1]} : vector<2x128xf32> to vector<2x32xf32>
    %595 = vector.extract_strided_slice %591 {offsets = [0, 96], sizes = [2, 32], strides = [1, 1]} : vector<2x128xf32> to vector<2x32xf32>
    %596 = arith.mulf %593, %579 : vector<2x32xf32>
    %597 = arith.mulf %592, %594 : vector<2x32xf32>
    %598 = arith.addf %596, %597 : vector<2x32xf32>
    %599 = math.tanh %598 : vector<2x32xf32>
    %600 = arith.mulf %595, %599 : vector<2x32xf32>
    %601 = vector.extract_strided_slice %485 {offsets = [12, 0], sizes = [2, 128], strides = [1, 1]} : vector<16x128xf32> to vector<2x128xf32>
    %cst_76 = arith.constant dense<0.000000e+00> : vector<2x128xf32>
    %602 = tpu.matmul %600, %486, %cst_76 {dimension_numbers = #tpu.dot_dimension_numbers<[1], [0], [0], [1], [0, 0, 1, 1], [], []>} : vector<2x32xf32>, vector<32x128xf32>, vector<2x128xf32> -> vector<2x128xf32>
    %603 = arith.addf %601, %602 : vector<2x128xf32>
    %604 = math.tanh %603 : vector<2x128xf32>
    %605 = arith.negf %603 : vector<2x128xf32>
    %606 = math.exp %605 : vector<2x128xf32>
    %cst_77 = arith.constant 1.000000e+00 : f32
    %607 = vector.broadcast %cst_77 : f32 to vector<2x128xf32>
    %608 = arith.addf %607, %606 : vector<2x128xf32>
    %609 = arith.divf %607, %608 : vector<2x128xf32>
    %610 = arith.select %5, %604, %609 : vector<2x128xi1>, vector<2x128xf32>
    %611 = vector.extract_strided_slice %610 {offsets = [0, 0], sizes = [2, 32], strides = [1, 1]} : vector<2x128xf32> to vector<2x32xf32>
    %612 = vector.extract_strided_slice %610 {offsets = [0, 32], sizes = [2, 32], strides = [1, 1]} : vector<2x128xf32> to vector<2x32xf32>
    %613 = vector.extract_strided_slice %610 {offsets = [0, 64], sizes = [2, 32], strides = [1, 1]} : vector<2x128xf32> to vector<2x32xf32>
    %614 = vector.extract_strided_slice %610 {offsets = [0, 96], sizes = [2, 32], strides = [1, 1]} : vector<2x128xf32> to vector<2x32xf32>
    %615 = arith.mulf %612, %598 : vector<2x32xf32>
    %616 = arith.mulf %611, %613 : vector<2x32xf32>
    %617 = arith.addf %615, %616 : vector<2x32xf32>
    %618 = math.tanh %617 : vector<2x32xf32>
    %619 = arith.mulf %614, %618 : vector<2x32xf32>
    %620 = vector.extract_strided_slice %485 {offsets = [14, 0], sizes = [2, 128], strides = [1, 1]} : vector<16x128xf32> to vector<2x128xf32>
    %cst_78 = arith.constant dense<0.000000e+00> : vector<2x128xf32>
    %621 = tpu.matmul %619, %486, %cst_78 {dimension_numbers = #tpu.dot_dimension_numbers<[1], [0], [0], [1], [0, 0, 1, 1], [], []>} : vector<2x32xf32>, vector<32x128xf32>, vector<2x128xf32> -> vector<2x128xf32>
    %622 = arith.addf %620, %621 : vector<2x128xf32>
    %623 = math.tanh %622 : vector<2x128xf32>
    %624 = arith.negf %622 : vector<2x128xf32>
    %625 = math.exp %624 : vector<2x128xf32>
    %cst_79 = arith.constant 1.000000e+00 : f32
    %626 = vector.broadcast %cst_79 : f32 to vector<2x128xf32>
    %627 = arith.addf %626, %625 : vector<2x128xf32>
    %628 = arith.divf %626, %627 : vector<2x128xf32>
    %629 = arith.select %5, %623, %628 : vector<2x128xi1>, vector<2x128xf32>
    %630 = vector.extract_strided_slice %629 {offsets = [0, 0], sizes = [2, 32], strides = [1, 1]} : vector<2x128xf32> to vector<2x32xf32>
    %631 = vector.extract_strided_slice %629 {offsets = [0, 32], sizes = [2, 32], strides = [1, 1]} : vector<2x128xf32> to vector<2x32xf32>
    %632 = vector.extract_strided_slice %629 {offsets = [0, 64], sizes = [2, 32], strides = [1, 1]} : vector<2x128xf32> to vector<2x32xf32>
    %633 = vector.extract_strided_slice %629 {offsets = [0, 96], sizes = [2, 32], strides = [1, 1]} : vector<2x128xf32> to vector<2x32xf32>
    %634 = arith.mulf %631, %617 : vector<2x32xf32>
    %635 = arith.mulf %630, %632 : vector<2x32xf32>
    %636 = arith.addf %634, %635 : vector<2x32xf32>
    %637 = math.tanh %636 : vector<2x32xf32>
    %638 = arith.mulf %633, %637 : vector<2x32xf32>
    %639 = tpu.concatenate %505, %524, %543, %562, %581, %600, %619, %638 in 0 : vector<2x32xf32>, vector<2x32xf32>, vector<2x32xf32>, vector<2x32xf32>, vector<2x32xf32>, vector<2x32xf32>, vector<2x32xf32>, vector<2x32xf32> -> vector<16x32xf32>
    %c192 = arith.constant 192 : index
    %c0_80 = arith.constant 0 : index
    %640 = vector.load %arg3[%c192, %c0_80] : memref<227x128xf32, #tpu.memory_space<vmem>>, vector<32x16xf32>
    %c226 = arith.constant 226 : index
    %c0_81 = arith.constant 0 : index
    %641 = vector.load %arg3[%c226, %c0_81] : memref<227x128xf32, #tpu.memory_space<vmem>>, vector<1x16xf32>
    %cst_82 = arith.constant dense<0.000000e+00> : vector<16x16xf32>
    %642 = tpu.matmul %639, %640, %cst_82 {dimension_numbers = #tpu.dot_dimension_numbers<[1], [0], [0], [1], [0, 0, 1, 1], [], []>} : vector<16x32xf32>, vector<32x16xf32>, vector<16x16xf32> -> vector<16x16xf32>
    %643 = vector.broadcast %641 : vector<1x16xf32> to vector<16x16xf32>
    %644 = arith.addf %642, %643 : vector<16x16xf32>
    %c0_83 = arith.constant 0 : index
    %c0_84 = arith.constant 0 : index
    %645 = vector.load %arg4[%c0_83, %c0_84] : memref<16x16xf32, #tpu.memory_space<vmem>>, vector<16x16xf32>
    tpu.vector_store %arg4[%c0_83, %c0_84], %644 {strides = array<i32>} : memref<16x16xf32, #tpu.memory_space<vmem>>, vector<16x16xf32>,
    %c0_85 = arith.constant 0 : index
    %c0_86 = arith.constant 0 : index
    %646 = vector.load %arg1[%c0_85, %c0_86] : memref<2x16xi32, #tpu.memory_space<vmem>>, vector<2x16xi32>
    %647 = vector.extract_strided_slice %644 {offsets = [0, 0], sizes = [2, 16], strides = [1, 1]} : vector<16x16xf32> to vector<2x16xf32>
    %648 = vector.extract_strided_slice %644 {offsets = [2, 0], sizes = [2, 16], strides = [1, 1]} : vector<16x16xf32> to vector<2x16xf32>
    %649 = vector.extract_strided_slice %644 {offsets = [4, 0], sizes = [2, 16], strides = [1, 1]} : vector<16x16xf32> to vector<2x16xf32>
    %650 = vector.extract_strided_slice %644 {offsets = [6, 0], sizes = [2, 16], strides = [1, 1]} : vector<16x16xf32> to vector<2x16xf32>
    %651 = vector.extract_strided_slice %644 {offsets = [8, 0], sizes = [2, 16], strides = [1, 1]} : vector<16x16xf32> to vector<2x16xf32>
    %652 = vector.extract_strided_slice %644 {offsets = [10, 0], sizes = [2, 16], strides = [1, 1]} : vector<16x16xf32> to vector<2x16xf32>
    %653 = vector.extract_strided_slice %644 {offsets = [12, 0], sizes = [2, 16], strides = [1, 1]} : vector<16x16xf32> to vector<2x16xf32>
    %654 = vector.extract_strided_slice %644 {offsets = [14, 0], sizes = [2, 16], strides = [1, 1]} : vector<16x16xf32> to vector<2x16xf32>
    %655 = arith.maximumf %647, %648 : vector<2x16xf32>
    %656 = arith.maximumf %655, %649 : vector<2x16xf32>
    %657 = arith.maximumf %656, %650 : vector<2x16xf32>
    %658 = arith.maximumf %657, %651 : vector<2x16xf32>
    %659 = arith.maximumf %658, %652 : vector<2x16xf32>
    %660 = arith.maximumf %659, %653 : vector<2x16xf32>
    %661 = arith.maximumf %660, %654 : vector<2x16xf32>
    %cst_87 = arith.constant 0.000000e+00 : f32
    %662 = vector.broadcast %cst_87 : f32 to vector<2x16xf32>
    %cst_88 = arith.constant 0.000000e+00 : f32
    %663 = vector.broadcast %cst_88 : f32 to vector<2x16xf32>
    %664 = arith.subf %647, %661 : vector<2x16xf32>
    %665 = math.exp %664 : vector<2x16xf32>
    %666 = arith.addf %662, %665 : vector<2x16xf32>
    %c0_i32 = arith.constant 0 : i32
    %667 = vector.broadcast %c0_i32 : i32 to vector<2x16xi32>
    %668 = arith.cmpi eq, %646, %667 : vector<2x16xi32>
    %cst_89 = arith.constant 0.000000e+00 : f32
    %669 = vector.broadcast %cst_89 : f32 to vector<2x16xf32>
    %670 = arith.select %668, %647, %669 : vector<2x16xi1>, vector<2x16xf32>
    %671 = arith.addf %663, %670 : vector<2x16xf32>
    %672 = arith.subf %648, %661 : vector<2x16xf32>
    %673 = math.exp %672 : vector<2x16xf32>
    %674 = arith.addf %666, %673 : vector<2x16xf32>
    %c1_i32 = arith.constant 1 : i32
    %675 = vector.broadcast %c1_i32 : i32 to vector<2x16xi32>
    %676 = arith.cmpi eq, %646, %675 : vector<2x16xi32>
    %cst_90 = arith.constant 0.000000e+00 : f32
    %677 = vector.broadcast %cst_90 : f32 to vector<2x16xf32>
    %678 = arith.select %676, %648, %677 : vector<2x16xi1>, vector<2x16xf32>
    %679 = arith.addf %671, %678 : vector<2x16xf32>
    %680 = arith.subf %649, %661 : vector<2x16xf32>
    %681 = math.exp %680 : vector<2x16xf32>
    %682 = arith.addf %674, %681 : vector<2x16xf32>
    %c2_i32 = arith.constant 2 : i32
    %683 = vector.broadcast %c2_i32 : i32 to vector<2x16xi32>
    %684 = arith.cmpi eq, %646, %683 : vector<2x16xi32>
    %cst_91 = arith.constant 0.000000e+00 : f32
    %685 = vector.broadcast %cst_91 : f32 to vector<2x16xf32>
    %686 = arith.select %684, %649, %685 : vector<2x16xi1>, vector<2x16xf32>
    %687 = arith.addf %679, %686 : vector<2x16xf32>
    %688 = arith.subf %650, %661 : vector<2x16xf32>
    %689 = math.exp %688 : vector<2x16xf32>
    %690 = arith.addf %682, %689 : vector<2x16xf32>
    %c3_i32 = arith.constant 3 : i32
    %691 = vector.broadcast %c3_i32 : i32 to vector<2x16xi32>
    %692 = arith.cmpi eq, %646, %691 : vector<2x16xi32>
    %cst_92 = arith.constant 0.000000e+00 : f32
    %693 = vector.broadcast %cst_92 : f32 to vector<2x16xf32>
    %694 = arith.select %692, %650, %693 : vector<2x16xi1>, vector<2x16xf32>
    %695 = arith.addf %687, %694 : vector<2x16xf32>
    %696 = arith.subf %651, %661 : vector<2x16xf32>
    %697 = math.exp %696 : vector<2x16xf32>
    %698 = arith.addf %690, %697 : vector<2x16xf32>
    %c4_i32 = arith.constant 4 : i32
    %699 = vector.broadcast %c4_i32 : i32 to vector<2x16xi32>
    %700 = arith.cmpi eq, %646, %699 : vector<2x16xi32>
    %cst_93 = arith.constant 0.000000e+00 : f32
    %701 = vector.broadcast %cst_93 : f32 to vector<2x16xf32>
    %702 = arith.select %700, %651, %701 : vector<2x16xi1>, vector<2x16xf32>
    %703 = arith.addf %695, %702 : vector<2x16xf32>
    %704 = arith.subf %652, %661 : vector<2x16xf32>
    %705 = math.exp %704 : vector<2x16xf32>
    %706 = arith.addf %698, %705 : vector<2x16xf32>
    %c5_i32 = arith.constant 5 : i32
    %707 = vector.broadcast %c5_i32 : i32 to vector<2x16xi32>
    %708 = arith.cmpi eq, %646, %707 : vector<2x16xi32>
    %cst_94 = arith.constant 0.000000e+00 : f32
    %709 = vector.broadcast %cst_94 : f32 to vector<2x16xf32>
    %710 = arith.select %708, %652, %709 : vector<2x16xi1>, vector<2x16xf32>
    %711 = arith.addf %703, %710 : vector<2x16xf32>
    %712 = arith.subf %653, %661 : vector<2x16xf32>
    %713 = math.exp %712 : vector<2x16xf32>
    %714 = arith.addf %706, %713 : vector<2x16xf32>
    %c6_i32 = arith.constant 6 : i32
    %715 = vector.broadcast %c6_i32 : i32 to vector<2x16xi32>
    %716 = arith.cmpi eq, %646, %715 : vector<2x16xi32>
    %cst_95 = arith.constant 0.000000e+00 : f32
    %717 = vector.broadcast %cst_95 : f32 to vector<2x16xf32>
    %718 = arith.select %716, %653, %717 : vector<2x16xi1>, vector<2x16xf32>
    %719 = arith.addf %711, %718 : vector<2x16xf32>
    %720 = arith.subf %654, %661 : vector<2x16xf32>
    %721 = math.exp %720 : vector<2x16xf32>
    %722 = arith.addf %714, %721 : vector<2x16xf32>
    %c7_i32 = arith.constant 7 : i32
    %723 = vector.broadcast %c7_i32 : i32 to vector<2x16xi32>
    %724 = arith.cmpi eq, %646, %723 : vector<2x16xi32>
    %cst_96 = arith.constant 0.000000e+00 : f32
    %725 = vector.broadcast %cst_96 : f32 to vector<2x16xf32>
    %726 = arith.select %724, %654, %725 : vector<2x16xi1>, vector<2x16xf32>
    %727 = arith.addf %719, %726 : vector<2x16xf32>
    %728 = math.log %722 : vector<2x16xf32>
    %729 = arith.addf %728, %661 : vector<2x16xf32>
    %730 = arith.subf %729, %727 : vector<2x16xf32>
    %731 = vector.shape_cast %730 : vector<2x16xf32> to vector<1x2x16xf32>
    %cst_97 = arith.constant dense<0.000000e+00> : vector<1xf32>
    %732 = vector.multi_reduction <add>, %731, %cst_97 [1, 2] : vector<1x2x16xf32> to vector<1xf32>
    %733 = vector.shape_cast %732 : vector<1xf32> to vector<1x1x1xf32>
    %734 = vector.extract %733[0, 0, 0] : f32 from vector<1x1x1xf32>
    %cst_98 = arith.constant 3.200000e+01 : f32
    %735 = arith.divf %734, %cst_98 : f32
    %736 = vector.broadcast %735 : f32 to vector<1x1xf32>
    %c0_99 = arith.constant 0 : index
    %c0_100 = arith.constant 0 : index
    %737 = vector.load %arg5[%c0_99, %c0_100] : memref<1x1xf32, #tpu.memory_space<vmem>>, vector<1x1xf32>
    tpu.vector_store %arg5[%c0_99, %c0_100], %736 {strides = array<i32>} : memref<1x1xf32, #tpu.memory_space<vmem>>, vector<1x1xf32>,
    return
  }
}

</mosaic_0001>

<bundles_post_ra>
// kernel: forward.1
= control target key start
LH: loop header
LB: loop body
LE: loop exit
PB: predicated region body
PF: predicated region fallthrough
CT: control target
= control target key end

     0   :  { %11 = vsyncpa [#allocation3], 0  ;;  %s5939_s0 = inlined_call_operand.vmem [shape: f32[16,16], index: 0, kind: input, shape index: {}]   ;;  %s5940_s1 = inlined_call_operand.vmem [shape: s32[2,16], index: 1, kind: input, shape index: {}]   ;;  %s5941_s2 = inlined_call_operand.hbm [shape: f32[17,256], index: 2, kind: input, shape index: {}]   ;;  %s5942_s3 = inlined_call_operand.hbm [shape: f32[227,128], index: 3, kind: input, shape index: {}]   ;;  %s5943_s4 = inlined_call_operand.vmem [shape: f32[16,16], index: 4, kind: output, shape index: {0}]   ;;  %s5944_s5 = inlined_call_operand.hbm [shape: f32[1,1], index: 5, kind: output, shape index: {1}]  }
   0x1   :  { %12 = vsyncpa [#allocation6], 0 }
   0x2   :  { %13 = vsyncpa [#allocation4], 0  ;;  %s5248_s18 = smov [#allocation2]   ;;  %s5176_s22 = scalar_lea.hbm %s5941_s2, 768 }
   0x3   :  { %s23_s19 = sshll.u32 %s5248_s18, 4  ;;  %p5177_p0 = scmp.ne.s32.totalorder %s5941_s2, %s5176_s22  ;;  %s24_s19 = int_to_ptr.vmem [resolvable:$true] %s23_s19 }
   0x4   :  { %p5180_p1 = scmp.lt.u32.totalorder %s5176_s22, %s5941_s2 }
   0x6   :  { %p5182_p2 = pnand %p5180_p1, %p5177_p0 }
   0x8   :  { %5185 = shalt.err (!%p5182_p2)
}
   0x9   :  { %s5186_s27 = scalar_lea.vmem %s24_s19, 768  ;;  %p5191_p4 = scmp.lt.s32.totalorder %s24_s19, %s24_s19 }
   0xa   :  { %p5187_p3 = scmp.ne.s32.totalorder %s24_s19, %s5186_s27  ;;  %p5192_p5 = scmp.lt.s32.totalorder %s5186_s27, %s5186_s27 }
   0xc   :  { %p5193_p6 = por %p5192_p5, %p5191_p4 }
   0xe   :  { %p5194_p7 = pnand %p5193_p6, %p5187_p3 }
  0x10   :  { %5197 = shalt.err (!%p5194_p7)
}
  0x11   :  { %s5249_s28 = smov 256   ;;  %s5250_s29 = smov 16  }
  0x12   :  { %29 = dma.hbm_to_vmem [thread:$0]  %s5941_s2, 768, %s24_s19, [#allocation3], %s5249_s28, %s5249_s28, %s5250_s29  }
  0x13   :  { %s5251_s7 = smov [#allocation5]   ;;  %s5198_s11 = scalar_lea.hbm %s5942_s3, 3712 }
  0x14   :  { %s35_s8 = sshll.u32 %s5251_s7, 4  ;;  %p5199_p8 = scmp.ne.s32.totalorder %s5942_s3, %s5198_s11  ;;  %s36_s8 = int_to_ptr.vmem [resolvable:$true] %s35_s8 }
  0x15   :  { %p5202_p9 = scmp.lt.u32.totalorder %s5198_s11, %s5942_s3 }
  0x17   :  { %p5204_p10 = pnand %p5202_p9, %p5199_p8 }
  0x19   :  { %5207 = shalt.err (!%p5204_p10)
}
  0x1a   :  { %s5208_s16 = scalar_lea.vmem %s36_s8, 3712  ;;  %p5213_p12 = scmp.lt.s32.totalorder %s36_s8, %s36_s8 }
  0x1b   :  { %p5209_p11 = scmp.ne.s32.totalorder %s36_s8, %s5208_s16  ;;  %p5214_p13 = scmp.lt.s32.totalorder %s5208_s16, %s5208_s16 }
  0x1d   :  { %p5215_p0 = por %p5214_p13, %p5213_p12 }
  0x1f   :  { %p5216_p1 = pnand %p5215_p0, %p5209_p11 }
  0x21   :  { %5219 = shalt.err (!%p5216_p1)
}
  0x22   :  { %s5252_s2 = smov 128   ;;  %s5253_s17 = smov 8  }
  0x23   :  { %41 = dma.hbm_to_vmem [thread:$0]  %s5942_s3, 3712, %s36_s8, [#allocation6], %s5252_s2, %s5252_s2, %s5253_s17  }
  0x24   :  { %5242 = dma.done.wait [#allocation3], 768  }
  0x25   :  { %5243 = vsyncadd [#allocation3], 4294966528 }
  0x26   :  { %5244 = dma.done.wait [#allocation6], 3712  }
  0x27   :  { %5245 = vsyncadd [#allocation6], 4294963584  ;;  %v5254_v0 = vmov 0.0|0.0   ;;  %v5255_v1 = vmov 0.0   ;;  %vm5256_vm0 = vmmov 0   ;;  %v56_v2 = vld [vmem:[#allocation2 + $0x8] sm:$0xff]  ;;  %v48_v15 = vlaneseq }
  0x28   :  { %4671 = vmatprep.subr.bf16.mxu1 %v5254_v0  ;;  %143 = vmatprep.mubr.f32.mxu0 %v5255_v1  ;;  %v58_v3 = vld [vmem:[#allocation2 + $0x18] sm:$0xff]  ;;  %v156_v4 = vld [vmem:[#allocation5] sm:$0xff]  ;;  %v55_v7 = vld [vmem:[#allocation2] sm:$0xff]  ;;  %vm72_vm1 = vcmask 130048   ;;  %s5257_s21 = smov 64   ;;  %s5258_s22 = smov 32  }
  0x29   :  { %4290 = vmatprep.mubr.msk.f32.mxu1 %vm5256_vm0, %v5255_v1  ;;  %v4667_v5 = vpack.c.bf16 %v58_v3, %v56_v2  ;;  %v157_v6 = vld [vmem:[#allocation5 + $0x8] sm:$0xff]  ;;  %v57_v8 = vld [vmem:[#allocation2 + $0x10] sm:$0xff]  ;;  %v158_v11 = vld [vmem:[#allocation5 + $0x10] sm:$0xff]  ;;  %v5343_v16 = vshrl.u32 %v48_v15, 7  ;;  %v49_v29 = vand.u32 127, %v48_v15  ;;  %vm160_vm5 = vcmask 261120  }
  0x2a   :  { %v5318_v9 = vpack.c.bf16 %v157_v6, %v156_v4  ;;  %v4669_v10 = vpack.c.bf16 %v57_v8, %v55_v7  ;;  %v159_v12 = vld [vmem:[#allocation5 + $0x18] sm:$0xff]  ;;  %v53_v13 = vld [vmem:[%s5939_s0] sm:$0xff]  ;;  %vm1011_vm6 = vcmask 1041408   ;;  %vm1013_vm7 = vcmask 1043456  }
  0x2b   :  { %4668 = vmatprep.subr.bf16.mxu0 %v4667_v5  ;;  %v5324_v14 = vpack.c.bf16 %v159_v12, %v158_v11  ;;  %v64_v17 = vsub.s32 0, %v5343_v16  ;;  %v60_v18 = vld [vmem:[#allocation2 + $0x20] ss:$8 sm:$0x3]  ;;  %vm50_vm2 = vcmp.ge.s32.totalorder %v49_v29, 64  ;;  %vm51_vm3 = vcmp.lt.s32.totalorder %v49_v29, 96 }
  0x2c   :  { %4673 = vmatpush3.bf16.msra.mxu1 %v5318_v9  ;;  %4670 = vmatpush1.bf16.msra.mxu0 %v4669_v10  ;;  %vm5354_vm4 = vmand %vm50_vm2, %vm51_vm3  ;;  %v54_v39 = vld [vmem:[%s5939_s0 + $0x8] sm:$0xff]  ;;  %vm1015_vm8 = vcmask 1045504   ;;  %vm4009_vm2 = vcmask 0  }
  0x2d   :  { %4674 = vmatprep.subr.bf16.mxu1 %v5254_v0  ;;  %4677 = vmatprep.subr.bf16.mxu0 %v5254_v0  ;;  %v5346_v19 = vrot.slane %v60_v18, %v64_v17 }
  0x2f   :  { %4031 = vmatmul.mubr.msk.f32.vlgmr.msra.gmra.mrb[0].mxu0 %vm72_vm1, %v53_v13 }
  0x30   :  { %4676 = vmatpush3.bf16.msra.mxu1 %v5324_v14  ;;  %4679 = vmatpush3.bf16.msra.mxu0 %v5318_v9 }
  0x31   :  { %149 = vmatprep.mubr.f32.mxu0 %v5255_v1  ;;  %4680 = vmatprep.subr.bf16.mxu0 %v5254_v0 }
  0x32   :  { %4683 = vmatprep.subr.bf16.mxu1 %v5254_v0 }
  0x33   :  { %4291 = vmatmul.mubr.f32.vlgmr.msra.gmra.mrb[0].mxu1 %v5255_v1  ;;  %4032 = vmatmul.mubr.msk.f32.gmra.mrb[2].mxu0 %vm72_vm1, %v54_v39 }
  0x34   :  { %4682 = vmatpush3.bf16.msra.mxu0 %v5324_v14  ;;  %4685 = vmatpush3.bf16.msra.mxu1 %v5318_v9 }
  0x35   :  { %4686 = vmatprep.subr.bf16.mxu1 %v5254_v0  ;;  %4312 = vmatprep.mubr.msk.f32.mxu1 %vm5256_vm0, %v5255_v1 }
  0x36   :  { %4689 = vmatprep.subr.bf16.mxu0 %v5254_v0  ;;  %4301 = vmatprep.mubr.msk.f32.mxu0 %vm5256_vm0, %v5255_v1 }
  0x38   :  { %4688 = vmatpush3.bf16.msra.mxu1 %v5324_v14 }
  0x39   :  { %4695 = vmatprep.subr.bf16.mxu1 %v5254_v0 }
 0x102   :  { %v145_v20 = vpop.f32.mrb[0].mxu0 }
 0x103   :  { %v5349_v21 = vadd.f32 %v145_v20, %v5346_v19  ;;  %v5351_v22 = vpop.f32.mrb[1].mxu0 }
 0x106   :  { %v230_v23 = vpop.f32.mrb[0].mxu1  ;;  %v5373_v43 = vpop.f32.mrb[2].mxu0 }
 0x107   :  { %v234_v24 = vadd.f32 %v230_v23, %v5349_v21  ;;  %v4292_v25 = vpop.f32.mrb[1].mxu1  ;;  %v5375_v44 = vpop.f32.mrb[3].mxu0 }
 0x109   :  { %v4033_v26 = vmul.f32 -1.442695, %v234_v24 }
 0x10b   :  { %4901 = vpow2.f32 %v4033_v26 }
 0x10c   :  { %4903 = vtanh.f32 %v234_v24 }
 0x115   :  { %v4902_v27 = vpop.eup %4901 }
 0x116   :  { %v239_v28 = vadd.f32 1.0, %v4902_v27  ;;  %v4904_v31 = vpop.eup %4903 }
 0x118   :  { %4905 = vrcp.f32 %v239_v28 }
 0x122   :  { %v4906_v32 = vpop.eup %4905 }
 0x123   :  { %v242_v33 = vsel %vm5354_vm4, %v4904_v31, %v4906_v32 }
 0x124   :  { %245 = vrot.lane.b32.xlu0 %v242_v33, %s5257_s21  ;;  %v243_v36 = vmul.f32 0.0, %v242_v33 }
 0x196   :  { %v246_v34 = vpop.permute.xlu0 %245 }
 0x197   :  { %v248_v35 = vmul.f32 %v246_v34, %v242_v33 }
 0x199   :  { %250 = vrot.lane.b32.xlu0 %v248_v35, %s5258_s22 }
 0x20b   :  { %v251_v37 = vpop.permute.xlu0 %250 }
 0x20c   :  { %v253_v38 = vadd.f32 %v251_v37, %v243_v36 }
 0x20e   :  { %4907 = vtanh.f32 %v253_v38  ;;  %v348_v58 = vrot.slane %v253_v38, 6 }
 0x218   :  { %v4908_v40 = vpop.eup %4907 }
 0x219   :  { %256 = vrot.lane.b32.xlu1 %v4908_v40, %s5257_s21 }
 0x28b   :  { %v257_v41 = vpop.permute.xlu1 %256 }
 0x28c   :  { %v5369_v42 = vmul.f32 %v257_v41, %v242_v33 }
 0x28e   :  { %261 = vrot.lane.b32.xlu1 %v5369_v42, %s5258_s22 }
 0x300   :  { %v262_v45 = vpop.permute.xlu1 %261 }
 0x301   :  { %4302 = vmatmul.mubr.msk.f32.vlgmr.msra.gmra.mrb[4].mxu0 %vm160_vm5, %v262_v45 }
 0x302   :  { %4691 = vmatpush3.bf16.msra.mxu0 %v5318_v9  ;;  %4323 = vmatprep.mubr.msk.f32.mxu0 %vm5256_vm0, %v5255_v1 }
 0x303   :  { %4692 = vmatprep.subr.bf16.mxu0 %v5254_v0 }
 0x306   :  { %4694 = vmatpush3.bf16.msra.mxu0 %v5324_v14 }
 0x307   :  { %4701 = vmatprep.subr.bf16.mxu0 %v5254_v0 }
 0x3d4   :  { %v331_v46 = vpop.f32.mrb[4].mxu0 }
 0x3d5   :  { %v336_v47 = vrot.slane %v331_v46, 6  ;;  %v4303_v48 = vpop.f32.mrb[5].mxu0 }
 0x3d7   :  { %v338_v49 = vadd.f32 %v336_v47, %v5349_v21 }
 0x3d9   :  { %v4035_v50 = vmul.f32 -1.442695, %v338_v49 }
 0x3db   :  { %4909 = vpow2.f32 %v4035_v50 }
 0x3dc   :  { %4911 = vtanh.f32 %v338_v49 }
 0x3e5   :  { %v4910_v51 = vpop.eup %4909 }
 0x3e6   :  { %v343_v52 = vadd.f32 1.0, %v4910_v51  ;;  %v4912_v53 = vpop.eup %4911 }
 0x3e8   :  { %4913 = vrcp.f32 %v343_v52 }
 0x3f2   :  { %v4914_v54 = vpop.eup %4913 }
 0x3f3   :  { %v346_v55 = vsel %vm5354_vm4, %v4912_v53, %v4914_v54 }
 0x3f4   :  { %352 = vrot.lane.b32.xlu0 %v346_v55, %s5257_s21  ;;  %v350_v59 = vmul.f32 %v348_v58, %v346_v55  ;;  %v5433_v58 = vadd.f32 %v5373_v43, %v5346_v19 }
 0x466   :  { %v353_v56 = vpop.permute.xlu0 %352 }
 0x467   :  { %v355_v57 = vmul.f32 %v353_v56, %v346_v55 }
 0x469   :  { %357 = vrot.lane.b32.xlu1 %v355_v57, %s5258_s22 }
 0x4db   :  { %v358_v60 = vpop.permute.xlu1 %357 }
 0x4dc   :  { %v360_v61 = vadd.f32 %v358_v60, %v350_v59 }
 0x4de   :  { %4915 = vtanh.f32 %v360_v61  ;;  %v456_v23 = vrot.slane %v360_v61, 6 }
 0x4e8   :  { %v4916_v62 = vpop.eup %4915 }
 0x4e9   :  { %363 = vrot.lane.b32.xlu0 %v4916_v62, %s5257_s21 }
 0x55b   :  { %v364_v63 = vpop.permute.xlu0 %363 }
 0x55c   :  { %v366_v2 = vmul.f32 %v364_v63, %v346_v55 }
 0x55e   :  { %v368_v3 = vrot.slane %v366_v2, 2  ;;  %v1012_v31 = vsel %vm1011_vm6, %v5369_v42, %v366_v2 }
 0x560   :  { %369 = vrot.lane.b32.xlu1 %v368_v3, %s5258_s22 }
 0x5d2   :  { %v370_v4 = vpop.permute.xlu1 %369 }
 0x5d3   :  { %4313 = vmatmul.mubr.msk.f32.vlgmr.msra.gmra.mrb[2].mxu1 %vm160_vm5, %v370_v4 }
 0x5d4   :  { %4697 = vmatpush3.bf16.msra.mxu1 %v5318_v9  ;;  %4334 = vmatprep.mubr.msk.f32.mxu1 %vm5256_vm0, %v5255_v1 }
 0x5d5   :  { %4698 = vmatprep.subr.bf16.mxu1 %v5254_v0 }
 0x5d8   :  { %4700 = vmatpush3.bf16.msra.mxu1 %v5324_v14 }
 0x5d9   :  { %4707 = vmatprep.subr.bf16.mxu1 %v5254_v0 }
 0x6a6   :  { %v439_v5 = vpop.f32.mrb[2].mxu1 }
 0x6a7   :  { %v444_v6 = vrot.slane %v439_v5, 4  ;;  %v4314_v7 = vpop.f32.mrb[3].mxu1 }
 0x6a9   :  { %v446_v8 = vadd.f32 %v444_v6, %v5349_v21 }
 0x6ab   :  { %v4037_v10 = vmul.f32 -1.442695, %v446_v8 }
 0x6ad   :  { %4917 = vpow2.f32 %v4037_v10 }
 0x6ae   :  { %4919 = vtanh.f32 %v446_v8 }
 0x6b7   :  { %v4918_v11 = vpop.eup %4917 }
 0x6b8   :  { %v451_v12 = vadd.f32 1.0, %v4918_v11  ;;  %v4920_v13 = vpop.eup %4919 }
 0x6ba   :  { %4921 = vrcp.f32 %v451_v12 }
 0x6c4   :  { %v4922_v15 = vpop.eup %4921 }
 0x6c5   :  { %v454_v17 = vsel %vm5354_vm4, %v4920_v13, %v4922_v15 }
 0x6c6   :  { %460 = vrot.lane.b32.xlu0 %v454_v17, %s5257_s21  ;;  %v458_v24 = vmul.f32 %v456_v23, %v454_v17 }
 0x738   :  { %v461_v18 = vpop.permute.xlu0 %460 }
 0x739   :  { %v463_v20 = vmul.f32 %v461_v18, %v454_v17 }
 0x73b   :  { %465 = vrot.lane.b32.xlu1 %v463_v20, %s5258_s22 }
 0x7ad   :  { %v466_v25 = vpop.permute.xlu1 %465 }
 0x7ae   :  { %v468_v26 = vadd.f32 %v466_v25, %v458_v24 }
 0x7b0   :  { %4923 = vtanh.f32 %v468_v26  ;;  %v564_v49 = vrot.slane %v468_v26, 6 }
 0x7ba   :  { %v4924_v27 = vpop.eup %4923 }
 0x7bb   :  { %471 = vrot.lane.b32.xlu0 %v4924_v27, %s5257_s21 }
 0x82d   :  { %v472_v28 = vpop.permute.xlu0 %471 }
 0x82e   :  { %v474_v29 = vmul.f32 %v472_v28, %v454_v17 }
 0x830   :  { %v476_v32 = vrot.slane %v474_v29, 4  ;;  %v1014_v33 = vsel %vm1013_vm7, %v1012_v31, %v474_v29 }
 0x832   :  { %477 = vrot.lane.b32.xlu1 %v476_v32, %s5258_s22 }
 0x8a4   :  { %v478_v34 = vpop.permute.xlu1 %477 }
 0x8a5   :  { %4324 = vmatmul.mubr.msk.f32.vlgmr.msra.gmra.mrb[6].mxu0 %vm160_vm5, %v478_v34 }
 0x8a6   :  { %4703 = vmatpush3.bf16.msra.mxu0 %v5318_v9  ;;  %4345 = vmatprep.mubr.msk.f32.mxu0 %vm5256_vm0, %v5255_v1 }
 0x8a7   :  { %4704 = vmatprep.subr.bf16.mxu0 %v5254_v0 }
 0x8aa   :  { %4706 = vmatpush3.bf16.msra.mxu0 %v5324_v14 }
 0x8ab   :  { %4713 = vmatprep.subr.bf16.mxu0 %v5254_v0 }
 0x978   :  { %v547_v35 = vpop.f32.mrb[6].mxu0 }
 0x979   :  { %v552_v36 = vrot.slane %v547_v35, 2  ;;  %v4325_v37 = vpop.f32.mrb[7].mxu0 }
 0x97b   :  { %v554_v38 = vadd.f32 %v552_v36, %v5349_v21 }
 0x97d   :  { %v4039_v39 = vmul.f32 -1.442695, %v554_v38 }
 0x97f   :  { %4925 = vpow2.f32 %v4039_v39 }
 0x980   :  { %4927 = vtanh.f32 %v554_v38 }
 0x989   :  { %v4926_v40 = vpop.eup %4925 }
 0x98a   :  { %v559_v41 = vadd.f32 1.0, %v4926_v40  ;;  %v4928_v42 = vpop.eup %4927 }
 0x98c   :  { %4929 = vrcp.f32 %v559_v41 }
 0x996   :  { %v4930_v45 = vpop.eup %4929 }
 0x997   :  { %v562_v46 = vsel %vm5354_vm4, %v4928_v42, %v4930_v45 }
 0x998   :  { %568 = vrot.lane.b32.xlu0 %v562_v46, %s5257_s21  ;;  %v566_v50 = vmul.f32 %v564_v49, %v562_v46 }
 0xa0a   :  { %v569_v47 = vpop.permute.xlu0 %568 }
 0xa0b   :  { %v571_v48 = vmul.f32 %v569_v47, %v562_v46 }
 0xa0d   :  { %573 = vrot.lane.b32.xlu1 %v571_v48, %s5258_s22 }
 0xa7f   :  { %v574_v21 = vpop.permute.xlu1 %573 }
 0xa80   :  { %v576_v51 = vadd.f32 %v574_v21, %v566_v50 }
 0xa82   :  { %4931 = vtanh.f32 %v576_v51  ;;  %v669_v43 = vrot.slane %v576_v51, 6 }
 0xa8c   :  { %v4932_v52 = vpop.eup %4931 }
 0xa8d   :  { %579 = vrot.lane.b32.xlu0 %v4932_v52, %s5257_s21 }
 0xaff   :  { %v580_v53 = vpop.permute.xlu0 %579 }
 0xb00   :  { %v582_v54 = vmul.f32 %v580_v53, %v562_v46 }
 0xb02   :  { %v584_v55 = vrot.slane %v582_v54, 6  ;;  %v5422_v56 = vsel %vm1015_vm8, %v1014_v33, %v582_v54 }
 0xb04   :  { %585 = vrot.lane.b32.xlu1 %v584_v55, %s5258_s22 }
 0xb76   :  { %v586_v57 = vpop.permute.xlu1 %585 }
 0xb77   :  { %4335 = vmatmul.mubr.msk.f32.vlgmr.msra.gmra.mrb[4].mxu1 %vm160_vm5, %v586_v57 }
 0xb78   :  { %4709 = vmatpush3.bf16.msra.mxu1 %v5318_v9  ;;  %4356 = vmatprep.mubr.msk.f32.mxu1 %vm5256_vm0, %v5255_v1 }
 0xb79   :  { %4710 = vmatprep.subr.bf16.mxu1 %v5254_v0 }
 0xb7c   :  { %4712 = vmatpush3.bf16.msra.mxu1 %v5324_v14 }
 0xc4a   :  { %v655_v59 = vpop.f32.mrb[4].mxu1 }
 0xc4b   :  { %v659_v60 = vadd.f32 %v655_v59, %v5433_v58  ;;  %v4336_v61 = vpop.f32.mrb[5].mxu1 }
 0xc4d   :  { %v4041_v62 = vmul.f32 -1.442695, %v659_v60 }
 0xc4f   :  { %4933 = vpow2.f32 %v4041_v62 }
 0xc50   :  { %4935 = vtanh.f32 %v659_v60 }
 0xc59   :  { %v4934_v63 = vpop.eup %4933 }
 0xc5a   :  { %v664_v2 = vadd.f32 1.0, %v4934_v63  ;;  %v4936_v3 = vpop.eup %4935 }
 0xc5c   :  { %4937 = vrcp.f32 %v664_v2 }
 0xc66   :  { %v4938_v4 = vpop.eup %4937 }
 0xc67   :  { %v667_v5 = vsel %vm5354_vm4, %v4936_v3, %v4938_v4 }
 0xc68   :  { %673 = vrot.lane.b32.xlu0 %v667_v5, %s5257_s21  ;;  %v671_v7 = vmul.f32 %v669_v43, %v667_v5 }
 0xcda   :  { %v674_v6 = vpop.permute.xlu0 %673 }
 0xcdb   :  { %v676_v19 = vmul.f32 %v674_v6, %v667_v5 }
 0xcdd   :  { %678 = vrot.lane.b32.xlu1 %v676_v19, %s5258_s22 }
 0xd4f   :  { %v679_v8 = vpop.permute.xlu1 %678 }
 0xd50   :  { %v681_v10 = vadd.f32 %v679_v8, %v671_v7 }
 0xd52   :  { %4939 = vtanh.f32 %v681_v10  ;;  %v776_v31 = vrot.slane %v681_v10, 6 }
 0xd5c   :  { %v4940_v11 = vpop.eup %4939 }
 0xd5d   :  { %684 = vrot.lane.b32.xlu0 %v4940_v11, %s5257_s21 }
 0xdcf   :  { %v685_v12 = vpop.permute.xlu0 %684 }
 0xdd0   :  { %v5441_v13 = vmul.f32 %v685_v12, %v667_v5 }
 0xdd2   :  { %689 = vrot.lane.b32.xlu1 %v5441_v13, %s5258_s22 }
 0xe44   :  { %v690_v15 = vpop.permute.xlu1 %689 }
 0xe45   :  { %4346 = vmatmul.mubr.msk.f32.vlgmr.msra.gmra.mrb[8].mxu0 %vm160_vm5, %v690_v15 }
 0xe46   :  { %4715 = vmatpush3.bf16.msra.mxu0 %v5318_v9  ;;  %4367 = vmatprep.mubr.msk.f32.mxu0 %vm5256_vm0, %v5255_v1 }
 0xe47   :  { %4716 = vmatprep.subr.bf16.mxu0 %v5254_v0 }
 0xe4a   :  { %4718 = vmatpush3.bf16.msra.mxu0 %v5324_v14 }
 0xe4b   :  { %4727 = vmatprep.subr.bf16.mxu0 %v5254_v0 }
 0xf18   :  { %v759_v17 = vpop.f32.mrb[8].mxu0 }
 0xf19   :  { %v764_v18 = vrot.slane %v759_v17, 6  ;;  %v4347_v20 = vpop.f32.mrb[9].mxu0 }
 0xf1b   :  { %v766_v23 = vadd.f32 %v764_v18, %v5433_v58 }
 0xf1d   :  { %v4043_v24 = vmul.f32 -1.442695, %v766_v23 }
 0xf1f   :  { %4941 = vpow2.f32 %v4043_v24  ;;  %v1020_v24 = vld [vmem:[#allocation5 + $0x40] sm:$0xff] }
 0xf20   :  { %4943 = vtanh.f32 %v766_v23 }
 0xf29   :  { %v4942_v25 = vpop.eup %4941 }
 0xf2a   :  { %v771_v26 = vadd.f32 1.0, %v4942_v25  ;;  %v4944_v9 = vpop.eup %4943  ;;  %v1021_v25 = vld [vmem:[#allocation5 + $0x48] sm:$0xff] }
 0xf2c   :  { %4945 = vrcp.f32 %v771_v26  ;;  %v1114_v26 = vld [vmem:[#allocation5 + $0x60] sm:$0xff] }
 0xf36   :  { %v4946_v27 = vpop.eup %4945 }
 0xf37   :  { %v774_v28 = vsel %vm5354_vm4, %v4944_v9, %v4946_v27  ;;  %v4719_v9 = vpack.c.bf16 %v1021_v25, %v1020_v24  ;;  %v1115_v27 = vld [vmem:[#allocation5 + $0x68] sm:$0xff] }
 0xf38   :  { %780 = vrot.lane.b32.xlu0 %v774_v28, %s5257_s21  ;;  %v778_v32 = vmul.f32 %v776_v31, %v774_v28  ;;  %v1116_v31 = vld [vmem:[#allocation5 + $0x70] sm:$0xff] }
 0xf39   :  { %4720 = vmatprep.subr.bf16.mxu1 %v4719_v9 }
 0xfaa   :  { %v781_v14 = vpop.permute.xlu0 %780 }
 0xfab   :  { %v783_v29 = vmul.f32 %v781_v14, %v774_v28  ;;  %v1023_v14 = vld [vmem:[#allocation5 + $0x58] sm:$0xff] }
 0xfad   :  { %785 = vrot.lane.b32.xlu1 %v783_v29, %s5258_s22  ;;  %v5484_v29 = vpack.c.bf16 %v1115_v27, %v1114_v26 }
0x101f   :  { %v786_v33 = vpop.permute.xlu1 %785 }
0x1020   :  { %v788_v34 = vadd.f32 %v786_v33, %v778_v32  ;;  %v1117_v32 = vld [vmem:[#allocation5 + $0x78] sm:$0xff] }
0x1021   :  { %v5487_v33 = vpack.c.bf16 %v1117_v32, %v1116_v31 }
0x1022   :  { %4947 = vtanh.f32 %v788_v34  ;;  %v884_v53 = vrot.slane %v788_v34, 6 }
0x102c   :  { %v4948_v35 = vpop.eup %4947 }
0x102d   :  { %791 = vrot.lane.b32.xlu0 %v4948_v35, %s5257_s21 }
0x109f   :  { %v792_v36 = vpop.permute.xlu0 %791 }
0x10a0   :  { %v794_v37 = vmul.f32 %v792_v36, %v774_v28  ;;  %v1022_v28 = vld [vmem:[#allocation5 + $0x50] sm:$0xff] }
0x10a2   :  { %v796_v38 = vrot.slane %v794_v37, 2  ;;  %v1017_v62 = vsel %vm1011_vm6, %v5441_v13, %v794_v37 }
0x10a4   :  { %797 = vrot.lane.b32.xlu1 %v796_v38, %s5258_s22 }
0x1116   :  { %v798_v39 = vpop.permute.xlu1 %797 }
0x1117   :  { %4357 = vmatmul.mubr.msk.f32.vlgmr.msra.gmra.mrb[6].mxu1 %vm160_vm5, %v798_v39 }
0x1118   :  { %4722 = vmatpush3.bf16.msra.mxu1 %v4719_v9 }
0x11ea   :  { %v867_v40 = vpop.f32.mrb[6].mxu1 }
0x11eb   :  { %v872_v41 = vrot.slane %v867_v40, 4  ;;  %v4358_v42 = vpop.f32.mrb[7].mxu1 }
0x11ed   :  { %v874_v45 = vadd.f32 %v872_v41, %v5433_v58  ;;  %v4048_v41 = vld [vmem:[#allocation5 + $0xe0] ss:$0 sm:$0xff] }
0x11ef   :  { %v4045_v46 = vmul.f32 -1.442695, %v874_v45 }
0x11f1   :  { %4949 = vpow2.f32 %v4045_v46 }
0x11f2   :  { %4951 = vtanh.f32 %v874_v45 }
0x11fb   :  { %v4950_v47 = vpop.eup %4949 }
0x11fc   :  { %v879_v48 = vadd.f32 1.0, %v4950_v47  ;;  %v4952_v49 = vpop.eup %4951 }
0x11fe   :  { %4953 = vrcp.f32 %v879_v48 }
0x1208   :  { %v4954_v50 = vpop.eup %4953 }
0x1209   :  { %v882_v21 = vsel %vm5354_vm4, %v4952_v49, %v4954_v50 }
0x120a   :  { %888 = vrot.lane.b32.xlu0 %v882_v21, %s5257_s21  ;;  %v886_v54 = vmul.f32 %v884_v53, %v882_v21 }
0x127c   :  { %v889_v51 = vpop.permute.xlu0 %888 }
0x127d   :  { %v891_v52 = vmul.f32 %v889_v51, %v882_v21 }
0x127f   :  { %893 = vrot.lane.b32.xlu1 %v891_v52, %s5258_s22 }
0x12f1   :  { %v894_v55 = vpop.permute.xlu1 %893 }
0x12f2   :  { %v896_v57 = vadd.f32 %v894_v55, %v886_v54 }
0x12f4   :  { %4955 = vtanh.f32 %v896_v57 }
0x12fe   :  { %v4956_v59 = vpop.eup %4955 }
0x12ff   :  { %899 = vrot.lane.b32.xlu0 %v4956_v59, %s5257_s21 }
0x1371   :  { %v900_v60 = vpop.permute.xlu0 %899 }
0x1372   :  { %v902_v61 = vmul.f32 %v900_v60, %v882_v21 }
0x1374   :  { %v904_v63 = vrot.slane %v902_v61, 4  ;;  %v1018_v2 = vsel %vm1013_vm7, %v1017_v62, %v902_v61 }
0x1376   :  { %905 = vrot.lane.b32.xlu1 %v904_v63, %s5258_s22 }
0x13e8   :  { %v906_v3 = vpop.permute.xlu1 %905 }
0x13e9   :  { %4368 = vmatmul.mubr.msk.f32.vlgmr.msra.gmra.mrb[10].mxu0 %vm160_vm5, %v906_v3 }
0x13ea   :  { %4389 = vmatprep.mubr.msk.f32.mxu0 %vm5256_vm0, %v5255_v1  ;;  %4729 = vmatpush3.bf16.msra.mxu0 %v5484_v29 }
0x13eb   :  { %4730 = vmatprep.subr.bf16.mxu0 %v5254_v0 }
0x13ee   :  { %4732 = vmatpush3.bf16.msra.mxu0 %v5487_v33 }
0x13ef   :  { %4739 = vmatprep.subr.bf16.mxu0 %v5254_v0 }
0x13f1   :  { %4390 = vmatmul.mubr.f32.vlgmr.msra.gmra.mrb[12].mxu0 %v5255_v1 }
0x13f2   :  { %4741 = vmatpush3.bf16.msra.mxu0 %v5484_v29  ;;  %4411 = vmatprep.mubr.msk.f32.mxu0 %vm5256_vm0, %v5255_v1 }
0x13f3   :  { %4742 = vmatprep.subr.bf16.mxu0 %v5254_v0 }
0x13f6   :  { %4744 = vmatpush3.bf16.msra.mxu0 %v5487_v33 }
0x13f7   :  { %4751 = vmatprep.subr.bf16.mxu0 %v5254_v0 }
0x14bc   :  { %v975_v4 = vpop.f32.mrb[10].mxu0 }
0x14bd   :  { %v980_v5 = vrot.slane %v975_v4, 2  ;;  %v4369_v6 = vpop.f32.mrb[11].mxu0 }
0x14bf   :  { %v982_v19 = vadd.f32 %v980_v5, %v5433_v58  ;;  %v992_v58 = vrot.slane %v896_v57, 6 }
0x14c1   :  { %v4047_v43 = vmul.f32 -1.442695, %v982_v19 }
0x14c3   :  { %4957 = vpow2.f32 %v4047_v43 }
0x14c4   :  { %4959 = vtanh.f32 %v982_v19  ;;  %v1184_v39 = vpop.f32.mrb[12].mxu0 }
0x14c5   :  { %v4391_v40 = vpop.f32.mrb[13].mxu0 }
0x14cd   :  { %v4958_v7 = vpop.eup %4957 }
0x14ce   :  { %v987_v8 = vadd.f32 1.0, %v4958_v7  ;;  %v4960_v10 = vpop.eup %4959 }
0x14d0   :  { %4961 = vrcp.f32 %v987_v8 }
0x14da   :  { %v4962_v11 = vpop.eup %4961 }
0x14db   :  { %v990_v12 = vsel %vm5354_vm4, %v4960_v10, %v4962_v11 }
0x14dc   :  { %996 = vrot.lane.b32.xlu0 %v990_v12, %s5257_s21  ;;  %v994_v17 = vmul.f32 %v992_v58, %v990_v12 }
0x154e   :  { %v997_v13 = vpop.permute.xlu0 %996 }
0x154f   :  { %v999_v15 = vmul.f32 %v997_v13, %v990_v12 }
0x1551   :  { %1001 = vrot.lane.b32.xlu1 %v999_v15, %s5258_s22 }
0x1555   :  { %1031 = vrot.lane.b32.xlu1 %v5422_v56, %s5258_s22  ;;  %v4723_v56 = vpack.c.bf16 %v1023_v14, %v1022_v28 }
0x1557   :  { %4724 = vmatprep.subr.bf16.mxu1 %v4723_v56 }
0x1558   :  { %4726 = vmatpush3.bf16.msra.mxu1 %v4723_v56 }
0x1559   :  { %4733 = vmatprep.subr.bf16.mxu1 %v5254_v0 }
0x15c3   :  { %v1002_v18 = vpop.permute.xlu1 %1001 }
0x15c4   :  { %v5480_v20 = vadd.f32 %v1002_v18, %v994_v17 }
0x15c6   :  { %4963 = vtanh.f32 %v5480_v20 }
0x15c7   :  { %v1032_v23 = vpop.permute.xlu1 %1031 }
0x15c8   :  { %4378 = vmatprep.mubr.msk.f32.mxu1 %vm160_vm5, %v1032_v23 }
0x15d0   :  { %v4964_v34 = vpop.eup %4963 }
0x15d1   :  { %1007 = vrot.lane.b32.xlu0 %v4964_v34, %s5257_s21 }
0x1643   :  { %v1008_v35 = vpop.permute.xlu0 %1007 }
0x1644   :  { %v5501_v36 = vmul.f32 %v1008_v35, %v990_v12 }
0x1646   :  { %v1019_v37 = vsel %vm1015_vm8, %v1018_v2, %v5501_v36 }
0x1647   :  { %1033 = vrot.lane.b32.xlu0 %v1019_v37, %s5258_s22 }
0x16b9   :  { %v1034_v38 = vpop.permute.xlu0 %1033 }
0x16ba   :  { %4379 = vmatmul.mubr.msk.f32.vlgmr.msra.gmra.mrb[8].mxu1 %vm160_vm5, %v1034_v38 }
0x16bb   :  { %4735 = vmatpush3.bf16.msra.mxu1 %v5484_v29  ;;  %4400 = vmatprep.mubr.msk.f32.mxu1 %vm5256_vm0, %v5255_v1 }
0x16bc   :  { %4736 = vmatprep.subr.bf16.mxu1 %v5254_v0 }
0x16bf   :  { %4738 = vmatpush3.bf16.msra.mxu1 %v5487_v33 }
0x16c0   :  { %4745 = vmatprep.subr.bf16.mxu1 %v5254_v0 }
0x178d   :  { %v4380_v42 = vpop.f32.mrb[8].mxu1 }
0x178e   :  { %v5513_v45 = vadd.f32 %v4380_v42, %v4048_v41  ;;  %v1105_v46 = vpop.f32.mrb[9].mxu1 }
0x178f   :  { %v5515_v47 = vadd.f32 %v4048_v41, %v1105_v46 }
0x1791   :  { %v1188_v48 = vadd.f32 %v1184_v39, %v5515_v47 }
0x1793   :  { %v4051_v49 = vmul.f32 -1.442695, %v1188_v48 }
0x1795   :  { %4965 = vpow2.f32 %v4051_v49 }
0x1796   :  { %4967 = vtanh.f32 %v1188_v48 }
0x179f   :  { %v4966_v50 = vpop.eup %4965 }
0x17a0   :  { %v1193_v21 = vadd.f32 1.0, %v4966_v50  ;;  %v4968_v51 = vpop.eup %4967 }
0x17a2   :  { %4969 = vrcp.f32 %v1193_v21 }
0x17ac   :  { %v4970_v52 = vpop.eup %4969 }
0x17ad   :  { %v1196_v53 = vsel %vm5354_vm4, %v4968_v51, %v4970_v52 }
0x17ae   :  { %1199 = vrot.lane.b32.xlu1 %v1196_v53, %s5257_s21  ;;  %v1197_v57 = vmul.f32 0.0, %v1196_v53 }
0x1820   :  { %v1200_v54 = vpop.permute.xlu1 %1199 }
0x1821   :  { %v1202_v55 = vmul.f32 %v1200_v54, %v1196_v53 }
0x1823   :  { %1204 = vrot.lane.b32.xlu0 %v1202_v55, %s5258_s22 }
0x1895   :  { %v1205_v59 = vpop.permute.xlu0 %1204 }
0x1896   :  { %v1207_v60 = vadd.f32 %v1205_v59, %v1197_v57 }
0x1898   :  { %4971 = vtanh.f32 %v1207_v60  ;;  %v1302_v15 = vrot.slane %v1207_v60, 6 }
0x18a2   :  { %v4972_v61 = vpop.eup %4971 }
0x18a3   :  { %1210 = vrot.lane.b32.xlu1 %v4972_v61, %s5257_s21 }
0x1915   :  { %v1211_v62 = vpop.permute.xlu1 %1210 }
0x1916   :  { %v1213_v63 = vmul.f32 %v1211_v62, %v1196_v53 }
0x1918   :  { %1215 = vrot.lane.b32.xlu0 %v1213_v63, %s5258_s22 }
0x198a   :  { %v1216_v2 = vpop.permute.xlu0 %1215 }
0x198b   :  { %4401 = vmatmul.mubr.msk.f32.vlgmr.msra.gmra.mrb[10].mxu1 %vm160_vm5, %v1216_v2 }
0x198c   :  { %4747 = vmatpush3.bf16.msra.mxu1 %v5484_v29  ;;  %4422 = vmatprep.mubr.msk.f32.mxu1 %vm5256_vm0, %v5255_v1 }
0x198d   :  { %4748 = vmatprep.subr.bf16.mxu1 %v5254_v0 }
0x1990   :  { %4750 = vmatpush3.bf16.msra.mxu1 %v5487_v33 }
0x1991   :  { %4757 = vmatprep.subr.bf16.mxu1 %v5254_v0 }
0x1a5e   :  { %v1285_v3 = vpop.f32.mrb[10].mxu1 }
0x1a5f   :  { %v1290_v4 = vrot.slane %v1285_v3, 6  ;;  %v4402_v5 = vpop.f32.mrb[11].mxu1 }
0x1a61   :  { %v1292_v6 = vadd.f32 %v1290_v4, %v5515_v47 }
0x1a63   :  { %v4053_v19 = vmul.f32 -1.442695, %v1292_v6 }
0x1a65   :  { %4973 = vpow2.f32 %v4053_v19 }
0x1a66   :  { %4975 = vtanh.f32 %v1292_v6 }
0x1a6f   :  { %v4974_v43 = vpop.eup %4973 }
0x1a70   :  { %v1297_v7 = vadd.f32 1.0, %v4974_v43  ;;  %v4976_v8 = vpop.eup %4975 }
0x1a72   :  { %4977 = vrcp.f32 %v1297_v7 }
0x1a7c   :  { %v4978_v10 = vpop.eup %4977 }
0x1a7d   :  { %v1300_v11 = vsel %vm5354_vm4, %v4976_v8, %v4978_v10 }
0x1a7e   :  { %1306 = vrot.lane.b32.xlu1 %v1300_v11, %s5257_s21  ;;  %v1304_v58 = vmul.f32 %v1302_v15, %v1300_v11 }
0x1af0   :  { %v1307_v12 = vpop.permute.xlu1 %1306 }
0x1af1   :  { %v1309_v13 = vmul.f32 %v1307_v12, %v1300_v11 }
0x1af3   :  { %1311 = vrot.lane.b32.xlu0 %v1309_v13, %s5258_s22 }
0x1b65   :  { %v1312_v17 = vpop.permute.xlu0 %1311 }
0x1b66   :  { %v1314_v18 = vadd.f32 %v1312_v17, %v1304_v58 }
0x1b68   :  { %4979 = vtanh.f32 %v1314_v18  ;;  %v1410_v41 = vrot.slane %v1314_v18, 6 }
0x1b72   :  { %v4980_v23 = vpop.eup %4979 }
0x1b73   :  { %1317 = vrot.lane.b32.xlu1 %v4980_v23, %s5257_s21 }
0x1be5   :  { %v1318_v24 = vpop.permute.xlu1 %1317 }
0x1be6   :  { %v1320_v25 = vmul.f32 %v1318_v24, %v1300_v11 }
0x1be8   :  { %v1322_v26 = vrot.slane %v1320_v25, 2 }
0x1bea   :  { %1323 = vrot.lane.b32.xlu0 %v1322_v26, %s5258_s22 }
0x1c5c   :  { %v1324_v9 = vpop.permute.xlu0 %1323 }
0x1c5d   :  { %4412 = vmatmul.mubr.msk.f32.vlgmr.msra.gmra.mrb[14].mxu0 %vm160_vm5, %v1324_v9 }
0x1c5e   :  { %4753 = vmatpush3.bf16.msra.mxu0 %v5484_v29  ;;  %4433 = vmatprep.mubr.msk.f32.mxu0 %vm5256_vm0, %v5255_v1 }
0x1c5f   :  { %4754 = vmatprep.subr.bf16.mxu0 %v5254_v0 }
0x1c62   :  { %4756 = vmatpush3.bf16.msra.mxu0 %v5487_v33 }
0x1c63   :  { %4763 = vmatprep.subr.bf16.mxu0 %v5254_v0 }
0x1d30   :  { %v1393_v27 = vpop.f32.mrb[14].mxu0 }
0x1d31   :  { %v1398_v28 = vrot.slane %v1393_v27, 4  ;;  %v4413_v14 = vpop.f32.mrb[15].mxu0 }
0x1d33   :  { %v1400_v56 = vadd.f32 %v1398_v28, %v5515_v47 }
0x1d35   :  { %v4055_v31 = vmul.f32 -1.442695, %v1400_v56 }
0x1d37   :  { %4981 = vpow2.f32 %v4055_v31 }
0x1d38   :  { %4983 = vtanh.f32 %v1400_v56 }
0x1d41   :  { %v4982_v32 = vpop.eup %4981 }
0x1d42   :  { %v1405_v34 = vadd.f32 1.0, %v4982_v32  ;;  %v4984_v35 = vpop.eup %4983 }
0x1d44   :  { %4985 = vrcp.f32 %v1405_v34 }
0x1d4e   :  { %v4986_v37 = vpop.eup %4985 }
0x1d4f   :  { %v1408_v38 = vsel %vm5354_vm4, %v4984_v35, %v4986_v37 }
0x1d50   :  { %1414 = vrot.lane.b32.xlu1 %v1408_v38, %s5257_s21  ;;  %v1412_v42 = vmul.f32 %v1410_v41, %v1408_v38 }
0x1dc2   :  { %v1415_v39 = vpop.permute.xlu1 %1414 }
0x1dc3   :  { %v1417_v40 = vmul.f32 %v1415_v39, %v1408_v38 }
0x1dc5   :  { %1419 = vrot.lane.b32.xlu0 %v1417_v40, %s5258_s22 }
0x1e37   :  { %v1420_v46 = vpop.permute.xlu0 %1419 }
0x1e38   :  { %v1422_v48 = vadd.f32 %v1420_v46, %v1412_v42 }
0x1e3a   :  { %4987 = vtanh.f32 %v1422_v48  ;;  %v1518_v5 = vrot.slane %v1422_v48, 6 }
0x1e44   :  { %v4988_v49 = vpop.eup %4987 }
0x1e45   :  { %1425 = vrot.lane.b32.xlu1 %v4988_v49, %s5257_s21 }
0x1eb7   :  { %v1426_v50 = vpop.permute.xlu1 %1425 }
0x1eb8   :  { %v1428_v21 = vmul.f32 %v1426_v50, %v1408_v38 }
0x1eba   :  { %v1430_v51 = vrot.slane %v1428_v21, 4 }
0x1ebc   :  { %1431 = vrot.lane.b32.xlu0 %v1430_v51, %s5258_s22 }
0x1f2e   :  { %v1432_v52 = vpop.permute.xlu0 %1431 }
0x1f2f   :  { %4423 = vmatmul.mubr.msk.f32.vlgmr.msra.gmra.mrb[12].mxu1 %vm160_vm5, %v1432_v52 }
0x1f30   :  { %4759 = vmatpush3.bf16.msra.mxu1 %v5484_v29  ;;  %4444 = vmatprep.mubr.msk.f32.mxu1 %vm5256_vm0, %v5255_v1 }
0x1f31   :  { %4760 = vmatprep.subr.bf16.mxu1 %v5254_v0 }
0x1f34   :  { %4762 = vmatpush3.bf16.msra.mxu1 %v5487_v33 }
0x1f35   :  { %4769 = vmatprep.subr.bf16.mxu1 %v5254_v0 }
0x2002   :  { %v1501_v53 = vpop.f32.mrb[12].mxu1 }
0x2003   :  { %v1506_v54 = vrot.slane %v1501_v53, 2  ;;  %v4424_v55 = vpop.f32.mrb[13].mxu1 }
0x2004   :  { %v1970_v55 = vrot.slane %v5501_v36, 6 }
0x2005   :  { %v1508_v57 = vadd.f32 %v1506_v54, %v5515_v47 }
0x2007   :  { %v4057_v59 = vmul.f32 -1.442695, %v1508_v57 }
0x2009   :  { %4989 = vpow2.f32 %v4057_v59 }
0x200a   :  { %4991 = vtanh.f32 %v1508_v57 }
0x2013   :  { %v4990_v60 = vpop.eup %4989 }
0x2014   :  { %v1513_v61 = vadd.f32 1.0, %v4990_v60  ;;  %v4992_v62 = vpop.eup %4991 }
0x2016   :  { %4993 = vrcp.f32 %v1513_v61  ;;  %v1965_v61 = vld [vmem:[#allocation5 + $0x20] sm:$0xff] }
0x2020   :  { %v4994_v63 = vpop.eup %4993 }
0x2021   :  { %v1516_v2 = vsel %vm5354_vm4, %v4992_v62, %v4994_v63  ;;  %v1966_v62 = vld [vmem:[#allocation5 + $0x28] sm:$0xff] }
0x2022   :  { %1522 = vrot.lane.b32.xlu1 %v1516_v2, %s5257_s21  ;;  %v1520_v6 = vmul.f32 %v1518_v5, %v1516_v2  ;;  %v5599_v63 = vpack.c.bf16 %v1966_v62, %v1965_v61 }
0x2094   :  { %v1523_v3 = vpop.permute.xlu1 %1522 }
0x2095   :  { %v1525_v4 = vmul.f32 %v1523_v3, %v1516_v2  ;;  %v1968_v3 = vld [vmem:[#allocation5 + $0x38] sm:$0xff] }
0x2097   :  { %1527 = vrot.lane.b32.xlu0 %v1525_v4, %s5258_s22 }
0x2109   :  { %v1528_v47 = vpop.permute.xlu0 %1527 }
0x210a   :  { %v1530_v19 = vadd.f32 %v1528_v47, %v1520_v6  ;;  %v68_v6 = vsub.s32 1, %v5343_v16 }
0x210c   :  { %4995 = vtanh.f32 %v1530_v19  ;;  %v1623_v27 = vrot.slane %v1530_v19, 6 }
0x2116   :  { %v4996_v43 = vpop.eup %4995 }
0x2117   :  { %1533 = vrot.lane.b32.xlu1 %v4996_v43, %s5257_s21 }
0x2189   :  { %v1534_v7 = vpop.permute.xlu1 %1533 }
0x218a   :  { %v1536_v8 = vmul.f32 %v1534_v7, %v1516_v2  ;;  %v1967_v2 = vld [vmem:[#allocation5 + $0x30] sm:$0xff] }
0x218b   :  { %v5603_v5 = vpack.c.bf16 %v1968_v3, %v1967_v2  ;;  %v5175_v7 = vld [vmem:[#allocation2 + $0x20] ss:$8 sm:$0x3] }
0x218c   :  { %v1538_v10 = vrot.slane %v1536_v8, 6  ;;  %v5618_v8 = vrot.slane %v5175_v7, %v68_v6 }
0x218e   :  { %1539 = vrot.lane.b32.xlu0 %v1538_v10, %s5258_s22 }
0x2200   :  { %v1540_v11 = vpop.permute.xlu0 %1539 }
0x2201   :  { %4434 = vmatmul.mubr.msk.f32.vlgmr.msra.gmra.mrb[16].mxu0 %vm160_vm5, %v1540_v11 }
0x2202   :  { %4765 = vmatpush3.bf16.msra.mxu0 %v5484_v29  ;;  %4455 = vmatprep.mubr.msk.f32.mxu0 %vm5256_vm0, %v5255_v1 }
0x2203   :  { %4766 = vmatprep.subr.bf16.mxu0 %v5254_v0 }
0x2206   :  { %4768 = vmatpush3.bf16.msra.mxu0 %v5487_v33 }
0x2207   :  { %4775 = vmatprep.subr.bf16.mxu0 %v5254_v0 }
0x22d4   :  { %v1609_v12 = vpop.f32.mrb[16].mxu0 }
0x22d5   :  { %v1613_v13 = vadd.f32 %v1609_v12, %v5513_v45  ;;  %v4435_v15 = vpop.f32.mrb[17].mxu0  ;;  %v5623_v12 = vadd.f32 %v5351_v22, %v5618_v8 }
0x22d7   :  { %v4059_v58 = vmul.f32 -1.442695, %v1613_v13 }
0x22d9   :  { %4997 = vpow2.f32 %v4059_v58 }
0x22da   :  { %4999 = vtanh.f32 %v1613_v13 }
0x22e3   :  { %v4998_v17 = vpop.eup %4997 }
0x22e4   :  { %v1618_v18 = vadd.f32 1.0, %v4998_v17  ;;  %v5000_v23 = vpop.eup %4999 }
0x22e6   :  { %5001 = vrcp.f32 %v1618_v18 }
0x22f0   :  { %v5002_v24 = vpop.eup %5001 }
0x22f1   :  { %v1621_v25 = vsel %vm5354_vm4, %v5000_v23, %v5002_v24 }
0x22f2   :  { %1627 = vrot.lane.b32.xlu1 %v1621_v25, %s5257_s21  ;;  %v1625_v28 = vmul.f32 %v1623_v27, %v1621_v25 }
0x2364   :  { %v1628_v26 = vpop.permute.xlu1 %1627 }
0x2365   :  { %v1630_v9 = vmul.f32 %v1628_v26, %v1621_v25 }
0x2367   :  { %1632 = vrot.lane.b32.xlu0 %v1630_v9, %s5258_s22 }
0x23d9   :  { %v1633_v14 = vpop.permute.xlu0 %1632 }
0x23da   :  { %v1635_v56 = vadd.f32 %v1633_v14, %v1625_v28 }
0x23dc   :  { %5003 = vtanh.f32 %v1635_v56  ;;  %v1730_v21 = vrot.slane %v1635_v56, 6 }
0x23e6   :  { %v5004_v31 = vpop.eup %5003 }
0x23e7   :  { %1638 = vrot.lane.b32.xlu1 %v5004_v31, %s5257_s21 }
0x2459   :  { %v1639_v32 = vpop.permute.xlu1 %1638 }
0x245a   :  { %v1641_v34 = vmul.f32 %v1639_v32, %v1621_v25 }
0x245c   :  { %1643 = vrot.lane.b32.xlu0 %v1641_v34, %s5258_s22 }
0x24ce   :  { %v1644_v35 = vpop.permute.xlu0 %1643 }
0x24cf   :  { %4445 = vmatmul.mubr.msk.f32.vlgmr.msra.gmra.mrb[14].mxu1 %vm160_vm5, %v1644_v35 }
0x24d0   :  { %4771 = vmatpush3.bf16.msra.mxu1 %v5484_v29  ;;  %4466 = vmatprep.mubr.msk.f32.mxu1 %vm5256_vm0, %v5255_v1 }
0x24d1   :  { %4772 = vmatprep.subr.bf16.mxu1 %v5254_v0 }
0x24d4   :  { %4774 = vmatpush3.bf16.msra.mxu1 %v5487_v33 }
0x24d5   :  { %4781 = vmatprep.subr.bf16.mxu1 %v5254_v0 }
0x25a2   :  { %v1713_v37 = vpop.f32.mrb[14].mxu1 }
0x25a3   :  { %v1718_v38 = vrot.slane %v1713_v37, 6  ;;  %v4446_v39 = vpop.f32.mrb[15].mxu1 }
0x25a4   :  { %v2055_v39 = vrot.slane %v5480_v20, 6 }
0x25a5   :  { %v1720_v40 = vadd.f32 %v1718_v38, %v5513_v45 }
0x25a7   :  { %v4061_v41 = vmul.f32 -1.442695, %v1720_v40 }
0x25a9   :  { %5005 = vpow2.f32 %v4061_v41 }
0x25aa   :  { %5007 = vtanh.f32 %v1720_v40 }
0x25b3   :  { %v5006_v42 = vpop.eup %5005 }
0x25b4   :  { %v1725_v46 = vadd.f32 1.0, %v5006_v42  ;;  %v5008_v29 = vpop.eup %5007 }
0x25b6   :  { %5009 = vrcp.f32 %v1725_v46 }
0x25c0   :  { %v5010_v48 = vpop.eup %5009 }
0x25c1   :  { %v1728_v49 = vsel %vm5354_vm4, %v5008_v29, %v5010_v48 }
0x25c2   :  { %1734 = vrot.lane.b32.xlu1 %v1728_v49, %s5257_s21  ;;  %v1732_v51 = vmul.f32 %v1730_v21, %v1728_v49 }
0x2634   :  { %v1735_v33 = vpop.permute.xlu1 %1734 }
0x2635   :  { %v1737_v50 = vmul.f32 %v1735_v33, %v1728_v49 }
0x2637   :  { %1739 = vrot.lane.b32.xlu0 %v1737_v50, %s5258_s22 }
0x26a9   :  { %v1740_v52 = vpop.permute.xlu0 %1739 }
0x26aa   :  { %v5592_v53 = vadd.f32 %v1740_v52, %v1732_v51 }
0x26ac   :  { %5011 = vtanh.f32 %v5592_v53  ;;  %v1838_v34 = vrot.slane %v5592_v53, 6 }
0x26b6   :  { %v5012_v54 = vpop.eup %5011 }
0x26b7   :  { %1745 = vrot.lane.b32.xlu1 %v5012_v54, %s5257_s21 }
0x26bb   :  { %1971 = vrot.lane.b32.xlu1 %v1970_v55, %s5258_s22 }
0x2729   :  { %v1746_v57 = vpop.permute.xlu1 %1745 }
0x272a   :  { %v1748_v59 = vmul.f32 %v1746_v57, %v1728_v49 }
0x272c   :  { %v1750_v60 = vrot.slane %v1748_v59, 2 }
0x272d   :  { %v1972_v36 = vpop.permute.xlu1 %1971 }
0x272e   :  { %1751 = vrot.lane.b32.xlu0 %v1750_v60, %s5258_s22 }
0x27a0   :  { %v1752_v4 = vpop.permute.xlu0 %1751 }
0x27a1   :  { %4456 = vmatmul.mubr.msk.f32.vlgmr.msra.gmra.mrb[18].mxu0 %vm160_vm5, %v1752_v4 }
0x27a2   :  { %4777 = vmatpush3.bf16.msra.mxu0 %v5599_v63  ;;  %4477 = vmatprep.mubr.msk.f32.mxu0 %vm5256_vm0, %v5255_v1 }
0x27a3   :  { %4778 = vmatprep.subr.bf16.mxu0 %v5254_v0 }
0x27a6   :  { %4780 = vmatpush3.bf16.msra.mxu0 %v5603_v5 }
0x27a7   :  { %4787 = vmatprep.subr.bf16.mxu0 %v5254_v0 }
0x27a9   :  { %4478 = vmatmul.mubr.msk.f32.vlgmr.msra.gmra.mrb[20].mxu0 %vm160_vm5, %v1972_v36 }
0x27aa   :  { %4789 = vmatpush3.bf16.msra.mxu0 %v5599_v63  ;;  %4499 = vmatprep.mubr.msk.f32.mxu0 %vm5256_vm0, %v5255_v1 }
0x27ab   :  { %4790 = vmatprep.subr.bf16.mxu0 %v5254_v0 }
0x27ae   :  { %4792 = vmatpush3.bf16.msra.mxu0 %v5603_v5 }
0x27af   :  { %4799 = vmatprep.subr.bf16.mxu0 %v5254_v0 }
0x2874   :  { %v1821_v47 = vpop.f32.mrb[18].mxu0 }
0x2875   :  { %v1826_v19 = vrot.slane %v1821_v47, 4  ;;  %v4457_v43 = vpop.f32.mrb[19].mxu0 }
0x2877   :  { %v1828_v10 = vadd.f32 %v1826_v19, %v5513_v45 }
0x2879   :  { %v4063_v11 = vmul.f32 -1.442695, %v1828_v10 }
0x287b   :  { %5013 = vpow2.f32 %v4063_v11 }
0x287c   :  { %v2041_v13 = vpop.f32.mrb[20].mxu0 }
0x287d   :  { %v2045_v15 = vadd.f32 %v2041_v13, %v5623_v12  ;;  %v4479_v58 = vpop.f32.mrb[21].mxu0 }
0x287f   :  { %v4067_v17 = vmul.f32 -1.442695, %v2045_v15 }
0x2881   :  { %5015 = vpow2.f32 %v4067_v17 }
0x2882   :  { %5017 = vtanh.f32 %v1828_v10 }
0x2885   :  { %v5014_v16 = vpop.eup %5013 }
0x2886   :  { %v1833_v18 = vadd.f32 1.0, %v5014_v16 }
0x2888   :  { %5019 = vrcp.f32 %v1833_v18 }
0x2889   :  { %5021 = vtanh.f32 %v2045_v15 }
0x288b   :  { %v5016_v23 = vpop.eup %5015 }
0x288c   :  { %v2050_v24 = vadd.f32 1.0, %v5016_v23  ;;  %v5018_v25 = vpop.eup %5017 }
0x288e   :  { %5023 = vrcp.f32 %v2050_v24 }
0x2892   :  { %v5020_v26 = vpop.eup %5019 }
0x2893   :  { %v1836_v22 = vsel %vm5354_vm4, %v5018_v25, %v5020_v26  ;;  %v5022_v9 = vpop.eup %5021 }
0x2894   :  { %1842 = vrot.lane.b32.xlu0 %v1836_v22, %s5257_s21  ;;  %v1840_v35 = vmul.f32 %v1838_v34, %v1836_v22 }
0x2898   :  { %v5024_v27 = vpop.eup %5023 }
0x2899   :  { %v2053_v28 = vsel %vm5354_vm4, %v5022_v9, %v5024_v27 }
0x289a   :  { %2059 = vrot.lane.b32.xlu1 %v2053_v28, %s5257_s21  ;;  %v2057_v40 = vmul.f32 %v2055_v39, %v2053_v28 }
0x2906   :  { %v1843_v14 = vpop.permute.xlu0 %1842 }
0x2907   :  { %v1845_v56 = vmul.f32 %v1843_v14, %v1836_v22 }
0x2909   :  { %1847 = vrot.lane.b32.xlu0 %v1845_v56, %s5258_s22 }
0x290c   :  { %v2060_v31 = vpop.permute.xlu1 %2059 }
0x290d   :  { %v2062_v32 = vmul.f32 %v2060_v31, %v2053_v28 }
0x290f   :  { %2064 = vrot.lane.b32.xlu1 %v2062_v32, %s5258_s22 }
0x297b   :  { %v1848_v37 = vpop.permute.xlu0 %1847 }
0x297c   :  { %v5635_v38 = vadd.f32 %v1848_v37, %v1840_v35 }
0x297e   :  { %5025 = vtanh.f32 %v5635_v38 }
0x2981   :  { %v2065_v41 = vpop.permute.xlu1 %2064 }
0x2982   :  { %v2067_v42 = vadd.f32 %v2065_v41, %v2057_v40 }
0x2984   :  { %5027 = vtanh.f32 %v2067_v42  ;;  %v2162_v47 = vrot.slane %v2067_v42, 6 }
0x2988   :  { %v5026_v46 = vpop.eup %5025 }
0x2989   :  { %1853 = vrot.lane.b32.xlu0 %v5026_v46, %s5257_s21 }
0x298e   :  { %v5028_v29 = vpop.eup %5027 }
0x298f   :  { %2070 = vrot.lane.b32.xlu1 %v5028_v29, %s5257_s21 }
0x29fb   :  { %v1854_v48 = vpop.permute.xlu0 %1853 }
0x29fc   :  { %v1856_v49 = vmul.f32 %v1854_v48, %v1836_v22 }
0x29fe   :  { %v1858_v33 = vrot.slane %v1856_v49, 4 }
0x2a00   :  { %1859 = vrot.lane.b32.xlu0 %v1858_v33, %s5258_s22 }
0x2a01   :  { %v2071_v50 = vpop.permute.xlu1 %2070 }
0x2a02   :  { %v5642_v21 = vmul.f32 %v2071_v50, %v2053_v28 }
0x2a04   :  { %2075 = vrot.lane.b32.xlu1 %v5642_v21, %s5258_s22 }
0x2a72   :  { %v1860_v20 = vpop.permute.xlu0 %1859 }
0x2a73   :  { %4467 = vmatmul.mubr.msk.f32.vlgmr.msra.gmra.mrb[16].mxu1 %vm160_vm5, %v1860_v20 }
0x2a74   :  { %4783 = vmatpush3.bf16.msra.mxu1 %v5599_v63  ;;  %4488 = vmatprep.mubr.msk.f32.mxu1 %vm5256_vm0, %v5255_v1 }
0x2a75   :  { %4784 = vmatprep.subr.bf16.mxu1 %v5254_v0 }
0x2a76   :  { %v2076_v51 = vpop.permute.xlu1 %2075 }
0x2a78   :  { %4786 = vmatpush3.bf16.msra.mxu1 %v5603_v5 }
0x2a79   :  { %4793 = vmatprep.subr.bf16.mxu1 %v5254_v0 }
0x2a7b   :  { %4489 = vmatmul.mubr.msk.f32.vlgmr.msra.gmra.mrb[18].mxu1 %vm160_vm5, %v2076_v51 }
0x2a7c   :  { %4795 = vmatpush3.bf16.msra.mxu1 %v5599_v63  ;;  %4510 = vmatprep.mubr.msk.f32.mxu1 %vm5256_vm0, %v5255_v1 }
0x2a7d   :  { %4796 = vmatprep.subr.bf16.mxu1 %v5254_v0 }
0x2a80   :  { %4798 = vmatpush3.bf16.msra.mxu1 %v5603_v5 }
0x2a81   :  { %4805 = vmatprep.subr.bf16.mxu1 %v5254_v0 }
0x2b46   :  { %v5660_v52 = vpop.f32.mrb[16].mxu1 }
0x2b47   :  { %v4468_v53 = vpop.f32.mrb[17].mxu1 }
0x2b4e   :  { %v2145_v54 = vpop.f32.mrb[18].mxu1 }
0x2b4f   :  { %v2150_v55 = vrot.slane %v2145_v54, 6  ;;  %v4490_v57 = vpop.f32.mrb[19].mxu1 }
0x2b51   :  { %v2152_v59 = vadd.f32 %v2150_v55, %v5623_v12 }
0x2b53   :  { %v4069_v60 = vmul.f32 -1.442695, %v2152_v59 }
0x2b55   :  { %5029 = vpow2.f32 %v4069_v60 }
0x2b56   :  { %5031 = vtanh.f32 %v2152_v59 }
0x2b5f   :  { %v5030_v61 = vpop.eup %5029 }
0x2b60   :  { %v2157_v62 = vadd.f32 1.0, %v5030_v61  ;;  %v5032_v2 = vpop.eup %5031 }
0x2b62   :  { %5033 = vrcp.f32 %v2157_v62 }
0x2b6c   :  { %v5034_v3 = vpop.eup %5033 }
0x2b6d   :  { %v2160_v4 = vsel %vm5354_vm4, %v5032_v2, %v5034_v3 }
0x2b6e   :  { %2166 = vrot.lane.b32.xlu0 %v2160_v4, %s5257_s21  ;;  %v2164_v19 = vmul.f32 %v2162_v47, %v2160_v4  ;;  %v5711_v47 = vadd.f32 %v5375_v44, %v5618_v8 }
0x2be0   :  { %v2167_v36 = vpop.permute.xlu0 %2166 }
0x2be1   :  { %v2169_v6 = vmul.f32 %v2167_v36, %v2160_v4 }
0x2be3   :  { %2171 = vrot.lane.b32.xlu1 %v2169_v6, %s5258_s22 }
0x2c55   :  { %v2172_v43 = vpop.permute.xlu1 %2171 }
0x2c56   :  { %v2174_v7 = vadd.f32 %v2172_v43, %v2164_v19 }
0x2c58   :  { %5035 = vtanh.f32 %v2174_v7  ;;  %v2270_v56 = vrot.slane %v2174_v7, 6 }
0x2c62   :  { %v5036_v10 = vpop.eup %5035 }
0x2c63   :  { %2177 = vrot.lane.b32.xlu0 %v5036_v10, %s5257_s21 }
0x2cd5   :  { %v2178_v11 = vpop.permute.xlu0 %2177 }
0x2cd6   :  { %v2180_v13 = vmul.f32 %v2178_v11, %v2160_v4 }
0x2cd8   :  { %v2182_v15 = vrot.slane %v2180_v13, 2  ;;  %v2825_v40 = vsel %vm1011_vm6, %v5642_v21, %v2180_v13 }
0x2cda   :  { %2183 = vrot.lane.b32.xlu1 %v2182_v15, %s5258_s22 }
0x2d4c   :  { %v2184_v58 = vpop.permute.xlu1 %2183 }
0x2d4d   :  { %4500 = vmatmul.mubr.msk.f32.vlgmr.msra.gmra.mrb[22].mxu0 %vm160_vm5, %v2184_v58 }
0x2d4e   :  { %4801 = vmatpush3.bf16.msra.mxu0 %v5599_v63  ;;  %4521 = vmatprep.mubr.msk.f32.mxu0 %vm5256_vm0, %v5255_v1 }
0x2d4f   :  { %4802 = vmatprep.subr.bf16.mxu0 %v5254_v0 }
0x2d52   :  { %4804 = vmatpush3.bf16.msra.mxu0 %v5603_v5 }
0x2d53   :  { %4811 = vmatprep.subr.bf16.mxu0 %v5254_v0 }
0x2e20   :  { %v2253_v17 = vpop.f32.mrb[22].mxu0 }
0x2e21   :  { %v2258_v16 = vrot.slane %v2253_v17, 4  ;;  %v4501_v18 = vpop.f32.mrb[23].mxu0 }
0x2e23   :  { %v2260_v23 = vadd.f32 %v2258_v16, %v5623_v12 }
0x2e25   :  { %v4071_v24 = vmul.f32 -1.442695, %v2260_v23 }
0x2e27   :  { %5037 = vpow2.f32 %v4071_v24 }
0x2e28   :  { %5039 = vtanh.f32 %v2260_v23 }
0x2e31   :  { %v5038_v25 = vpop.eup %5037 }
0x2e32   :  { %v2265_v26 = vadd.f32 1.0, %v5038_v25  ;;  %v5040_v22 = vpop.eup %5039 }
0x2e34   :  { %5041 = vrcp.f32 %v2265_v26 }
0x2e3e   :  { %v5042_v9 = vpop.eup %5041 }
0x2e3f   :  { %v2268_v27 = vsel %vm5354_vm4, %v5040_v22, %v5042_v9 }
0x2e40   :  { %2274 = vrot.lane.b32.xlu0 %v2268_v27, %s5257_s21  ;;  %v2272_v31 = vmul.f32 %v2270_v56, %v2268_v27 }
0x2eb2   :  { %v2275_v28 = vpop.permute.xlu0 %2274 }
0x2eb3   :  { %v2277_v14 = vmul.f32 %v2275_v28, %v2268_v27 }
0x2eb5   :  { %2279 = vrot.lane.b32.xlu1 %v2277_v14, %s5258_s22 }
0x2f27   :  { %v2280_v32 = vpop.permute.xlu1 %2279 }
0x2f28   :  { %v2282_v34 = vadd.f32 %v2280_v32, %v2272_v31 }
0x2f2a   :  { %5043 = vtanh.f32 %v2282_v34  ;;  %v2378_v59 = vrot.slane %v2282_v34, 6 }
0x2f34   :  { %v5044_v35 = vpop.eup %5043 }
0x2f35   :  { %2285 = vrot.lane.b32.xlu0 %v5044_v35, %s5257_s21 }
0x2fa7   :  { %v2286_v37 = vpop.permute.xlu0 %2285 }
0x2fa8   :  { %v2288_v39 = vmul.f32 %v2286_v37, %v2268_v27 }
0x2faa   :  { %v2290_v41 = vrot.slane %v2288_v39, 4  ;;  %v2826_v42 = vsel %vm1013_vm7, %v2825_v40, %v2288_v39 }
0x2fac   :  { %2291 = vrot.lane.b32.xlu1 %v2290_v41, %s5258_s22 }
0x301e   :  { %v2292_v46 = vpop.permute.xlu1 %2291 }
0x301f   :  { %4511 = vmatmul.mubr.msk.f32.vlgmr.msra.gmra.mrb[20].mxu1 %vm160_vm5, %v2292_v46 }
0x3020   :  { %4807 = vmatpush3.bf16.msra.mxu1 %v5599_v63  ;;  %4532 = vmatprep.mubr.msk.f32.mxu1 %vm5256_vm0, %v5255_v1 }
0x3021   :  { %4808 = vmatprep.subr.bf16.mxu1 %v5254_v0 }
0x3024   :  { %4810 = vmatpush3.bf16.msra.mxu1 %v5603_v5 }
0x3025   :  { %4817 = vmatprep.subr.bf16.mxu1 %v5254_v0 }
0x30f2   :  { %v2361_v29 = vpop.f32.mrb[20].mxu1 }
0x30f3   :  { %v2366_v48 = vrot.slane %v2361_v29, 2  ;;  %v4512_v49 = vpop.f32.mrb[21].mxu1 }
0x30f5   :  { %v2368_v33 = vadd.f32 %v2366_v48, %v5623_v12 }
0x30f7   :  { %v4073_v50 = vmul.f32 -1.442695, %v2368_v33 }
0x30f9   :  { %5045 = vpow2.f32 %v4073_v50 }
0x30fa   :  { %5047 = vtanh.f32 %v2368_v33 }
0x3103   :  { %v5046_v21 = vpop.eup %5045 }
0x3104   :  { %v2373_v20 = vadd.f32 1.0, %v5046_v21  ;;  %v5048_v51 = vpop.eup %5047 }
0x3106   :  { %5049 = vrcp.f32 %v2373_v20 }
0x3110   :  { %v5050_v53 = vpop.eup %5049 }
0x3111   :  { %v2376_v54 = vsel %vm5354_vm4, %v5048_v51, %v5050_v53 }
0x3112   :  { %2382 = vrot.lane.b32.xlu0 %v2376_v54, %s5257_s21  ;;  %v2380_v60 = vmul.f32 %v2378_v59, %v2376_v54 }
0x3184   :  { %v2383_v55 = vpop.permute.xlu0 %2382 }
0x3185   :  { %v2385_v57 = vmul.f32 %v2383_v55, %v2376_v54 }
0x3187   :  { %2387 = vrot.lane.b32.xlu1 %v2385_v57, %s5258_s22 }
0x31f9   :  { %v2388_v12 = vpop.permute.xlu1 %2387 }
0x31fa   :  { %v2390_v61 = vadd.f32 %v2388_v12, %v2380_v60 }
0x31fc   :  { %5051 = vtanh.f32 %v2390_v61  ;;  %v2483_v8 = vrot.slane %v2390_v61, 6 }
0x3206   :  { %v5052_v62 = vpop.eup %5051 }
0x3207   :  { %2393 = vrot.lane.b32.xlu0 %v5052_v62, %s5257_s21 }
0x3279   :  { %v2394_v2 = vpop.permute.xlu0 %2393 }
0x327a   :  { %v2396_v3 = vmul.f32 %v2394_v2, %v2376_v54 }
0x327c   :  { %v2398_v4 = vrot.slane %v2396_v3, 6  ;;  %v5700_v36 = vsel %vm1015_vm8, %v2826_v42, %v2396_v3 }
0x327e   :  { %2399 = vrot.lane.b32.xlu1 %v2398_v4, %s5258_s22 }
0x32f0   :  { %v2400_v6 = vpop.permute.xlu1 %2399 }
0x32f1   :  { %4522 = vmatmul.mubr.msk.f32.vlgmr.msra.gmra.mrb[24].mxu0 %vm160_vm5, %v2400_v6 }
0x32f2   :  { %4813 = vmatpush3.bf16.msra.mxu0 %v5599_v63  ;;  %4543 = vmatprep.mubr.msk.f32.mxu0 %vm5256_vm0, %v5255_v1 }
0x32f3   :  { %4814 = vmatprep.subr.bf16.mxu0 %v5254_v0 }
0x32f6   :  { %4816 = vmatpush3.bf16.msra.mxu0 %v5603_v5 }
0x33c4   :  { %v2469_v19 = vpop.f32.mrb[24].mxu0 }
0x33c5   :  { %v2473_v43 = vadd.f32 %v2469_v19, %v5711_v47  ;;  %v4523_v7 = vpop.f32.mrb[25].mxu0 }
0x33c7   :  { %v4075_v10 = vmul.f32 -1.442695, %v2473_v43 }
0x33c9   :  { %5053 = vpow2.f32 %v4075_v10 }
0x33ca   :  { %5055 = vtanh.f32 %v2473_v43  ;;  %v1934_v43 = vrot.slane %v5660_v52, 2 }
0x33cc   :  { %v1936_v7 = vadd.f32 %v1934_v43, %v5513_v45  ;;  %v4082_v43 = vld [vmem:[#allocation5 + $0xe1] ss:$0 sm:$0xff] }
0x33ce   :  { %v4065_v10 = vmul.f32 -1.442695, %v1936_v7 }
0x33d3   :  { %v5054_v11 = vpop.eup %5053 }
0x33d4   :  { %v2478_v13 = vadd.f32 1.0, %v5054_v11  ;;  %v5056_v15 = vpop.eup %5055 }
0x33d6   :  { %5057 = vrcp.f32 %v2478_v13 }
0x33e0   :  { %v5058_v58 = vpop.eup %5057 }
0x33e1   :  { %v2481_v17 = vsel %vm5354_vm4, %v5056_v15, %v5058_v58 }
0x33e2   :  { %2487 = vrot.lane.b32.xlu0 %v2481_v17, %s5257_s21  ;;  %v2485_v18 = vmul.f32 %v2483_v8, %v2481_v17 }
0x3454   :  { %v2488_v16 = vpop.permute.xlu0 %2487 }
0x3455   :  { %v2490_v44 = vmul.f32 %v2488_v16, %v2481_v17 }
0x3457   :  { %2492 = vrot.lane.b32.xlu1 %v2490_v44, %s5258_s22 }
0x34c9   :  { %v2493_v23 = vpop.permute.xlu1 %2492 }
0x34ca   :  { %v2495_v24 = vadd.f32 %v2493_v23, %v2485_v18 }
0x34cc   :  { %5059 = vtanh.f32 %v2495_v24  ;;  %v2590_v40 = vrot.slane %v2495_v24, 6 }
0x34d6   :  { %v5060_v25 = vpop.eup %5059 }
0x34d7   :  { %2498 = vrot.lane.b32.xlu0 %v5060_v25, %s5257_s21  ;;  %v1946_v25 = vrot.slane %v5635_v38, 6 }
0x3549   :  { %v2499_v26 = vpop.permute.xlu0 %2498 }
0x354a   :  { %v5719_v22 = vmul.f32 %v2499_v26, %v2481_v17 }
0x354c   :  { %2503 = vrot.lane.b32.xlu1 %v5719_v22, %s5258_s22 }
0x35be   :  { %v2504_v9 = vpop.permute.xlu1 %2503 }
0x35bf   :  { %4533 = vmatmul.mubr.msk.f32.vlgmr.msra.gmra.mrb[22].mxu1 %vm160_vm5, %v2504_v9 }
0x35c0   :  { %4819 = vmatpush3.bf16.msra.mxu1 %v5599_v63  ;;  %4554 = vmatprep.mubr.msk.f32.mxu1 %vm5256_vm0, %v5255_v1 }
0x35c1   :  { %4820 = vmatprep.subr.bf16.mxu1 %v5254_v0 }
0x35c4   :  { %4822 = vmatpush3.bf16.msra.mxu1 %v5603_v5 }
0x35c5   :  { %4831 = vmatprep.subr.bf16.mxu1 %v5254_v0 }
0x3692   :  { %v2573_v27 = vpop.f32.mrb[22].mxu1 }
0x3693   :  { %v2578_v28 = vrot.slane %v2573_v27, 6  ;;  %v4534_v14 = vpop.f32.mrb[23].mxu1 }
0x3695   :  { %v2580_v56 = vadd.f32 %v2578_v28, %v5711_v47 }
0x3697   :  { %v4077_v31 = vmul.f32 -1.442695, %v2580_v56 }
0x3699   :  { %5061 = vpow2.f32 %v4077_v31 }
0x369a   :  { %5063 = vtanh.f32 %v2580_v56 }
0x36a3   :  { %v5062_v32 = vpop.eup %5061 }
0x36a4   :  { %v2585_v34 = vadd.f32 1.0, %v5062_v32  ;;  %v5064_v63 = vpop.eup %5063 }
0x36a6   :  { %5065 = vrcp.f32 %v2585_v34 }
0x36b0   :  { %v5066_v35 = vpop.eup %5065 }
0x36b1   :  { %v2588_v37 = vsel %vm5354_vm4, %v5064_v63, %v5066_v35 }
0x36b2   :  { %2594 = vrot.lane.b32.xlu0 %v2588_v37, %s5257_s21  ;;  %v2592_v41 = vmul.f32 %v2590_v40, %v2588_v37 }
0x3724   :  { %v2595_v5 = vpop.permute.xlu0 %2594 }
0x3725   :  { %v2597_v39 = vmul.f32 %v2595_v5, %v2588_v37 }
0x3727   :  { %2599 = vrot.lane.b32.xlu1 %v2597_v39, %s5258_s22 }
0x3799   :  { %v2600_v42 = vpop.permute.xlu1 %2599 }
0x379a   :  { %v2602_v46 = vadd.f32 %v2600_v42, %v2592_v41  ;;  %v2926_v42 = vld [vmem:[#allocation5 + $0xa8] sm:$0xff] }
0x379c   :  { %5067 = vtanh.f32 %v2602_v46  ;;  %v2698_v2 = vrot.slane %v2602_v46, 6 }
0x37a6   :  { %v5068_v29 = vpop.eup %5067 }
0x37a7   :  { %2605 = vrot.lane.b32.xlu0 %v5068_v29, %s5257_s21 }
0x3819   :  { %v2606_v48 = vpop.permute.xlu0 %2605 }
0x381a   :  { %v2608_v49 = vmul.f32 %v2606_v48, %v2588_v37 }
0x381c   :  { %v2610_v33 = vrot.slane %v2608_v49, 2  ;;  %v2828_v17 = vsel %vm1011_vm6, %v5719_v22, %v2608_v49  ;;  %v2927_v49 = vld [vmem:[#allocation5 + $0xb0] sm:$0xff] }
0x381e   :  { %2611 = vrot.lane.b32.xlu1 %v2610_v33, %s5258_s22  ;;  %v2928_v33 = vld [vmem:[#allocation5 + $0xb8] sm:$0xff] }
0x3890   :  { %v2612_v50 = vpop.permute.xlu1 %2611 }
0x3891   :  { %4544 = vmatmul.mubr.msk.f32.vlgmr.msra.gmra.mrb[26].mxu0 %vm160_vm5, %v2612_v50  ;;  %v5773_v50 = vpack.c.bf16 %v2928_v33, %v2927_v49 }
0x3964   :  { %v2681_v21 = vpop.f32.mrb[26].mxu0 }
0x3965   :  { %v2686_v20 = vrot.slane %v2681_v21, 4  ;;  %v4545_v51 = vpop.f32.mrb[27].mxu0  ;;  %v2831_v21 = vld [vmem:[#allocation5 + $0x80] sm:$0xff] }
0x3966   :  { %v2833_v51 = vld [vmem:[#allocation5 + $0x90] sm:$0xff] }
0x3967   :  { %v2688_v53 = vadd.f32 %v2686_v20, %v5711_v47  ;;  %v2832_v20 = vld [vmem:[#allocation5 + $0x88] sm:$0xff] }
0x3969   :  { %v4079_v54 = vmul.f32 -1.442695, %v2688_v53 }
0x396b   :  { %5069 = vpow2.f32 %v4079_v54  ;;  %v2834_v54 = vld [vmem:[#allocation5 + $0x98] sm:$0xff] }
0x396c   :  { %5071 = vtanh.f32 %v2688_v53  ;;  %v4823_v53 = vpack.c.bf16 %v2832_v20, %v2831_v21 }
0x396e   :  { %4824 = vmatprep.subr.bf16.mxu0 %v4823_v53 }
0x396f   :  { %4826 = vmatpush3.bf16.msra.mxu0 %v4823_v53 }
0x3975   :  { %v5070_v55 = vpop.eup %5069 }
0x3976   :  { %v2693_v57 = vadd.f32 1.0, %v5070_v55  ;;  %v5072_v59 = vpop.eup %5071  ;;  %v4827_v55 = vpack.c.bf16 %v2834_v54, %v2833_v51 }
0x3978   :  { %5073 = vrcp.f32 %v2693_v57  ;;  %4828 = vmatprep.subr.bf16.mxu0 %v4827_v55 }
0x3979   :  { %4830 = vmatpush3.bf16.msra.mxu0 %v4827_v55 }
0x397a   :  { %4837 = vmatprep.subr.bf16.mxu0 %v5254_v0 }
0x3982   :  { %v5074_v60 = vpop.eup %5073 }
0x3983   :  { %v2696_v12 = vsel %vm5354_vm4, %v5072_v59, %v5074_v60 }
0x3984   :  { %2702 = vrot.lane.b32.xlu0 %v2696_v12, %s5257_s21  ;;  %v2700_v3 = vmul.f32 %v2698_v2, %v2696_v12 }
0x39f6   :  { %v2703_v61 = vpop.permute.xlu0 %2702 }
0x39f7   :  { %v2705_v62 = vmul.f32 %v2703_v61, %v2696_v12 }
0x39f9   :  { %2707 = vrot.lane.b32.xlu1 %v2705_v62, %s5258_s22 }
0x3a6b   :  { %v2708_v4 = vpop.permute.xlu1 %2707 }
0x3a6c   :  { %v2710_v6 = vadd.f32 %v2708_v4, %v2700_v3 }
0x3a6e   :  { %5075 = vtanh.f32 %v2710_v6  ;;  %v2806_v40 = vrot.slane %v2710_v6, 6 }
0x3a6f   :  { %5077 = vpow2.f32 %v4065_v10 }
0x3a78   :  { %v5076_v19 = vpop.eup %5075 }
0x3a79   :  { %2713 = vrot.lane.b32.xlu0 %v5076_v19, %s5257_s21  ;;  %v5078_v11 = vpop.eup %5077 }
0x3a7a   :  { %v1941_v13 = vadd.f32 1.0, %v5078_v11 }
0x3a7c   :  { %5079 = vrcp.f32 %v1941_v13 }
0x3a7d   :  { %5081 = vtanh.f32 %v1936_v7 }
0x3a86   :  { %v5080_v8 = vpop.eup %5079 }
0x3a87   :  { %v5082_v52 = vpop.eup %5081 }
0x3a88   :  { %v1944_v45 = vsel %vm5354_vm4, %v5082_v52, %v5080_v8 }
0x3a89   :  { %v1948_v26 = vmul.f32 %v1946_v25, %v1944_v45 }
0x3aeb   :  { %v2714_v15 = vpop.permute.xlu0 %2713 }
0x3aec   :  { %v2716_v58 = vmul.f32 %v2714_v15, %v2696_v12 }
0x3aee   :  { %v2718_v16 = vrot.slane %v2716_v58, 4  ;;  %v5749_v44 = vsel %vm1013_vm7, %v2828_v17, %v2716_v58 }
0x3af0   :  { %2719 = vrot.lane.b32.xlu1 %v2718_v16, %s5258_s22 }
0x3af4   :  { %1950 = vrot.lane.b32.xlu1 %v1944_v45, %s5257_s21 }
0x3b62   :  { %v2720_v18 = vpop.permute.xlu1 %2719 }
0x3b63   :  { %4555 = vmatmul.mubr.msk.f32.vlgmr.msra.gmra.mrb[24].mxu1 %vm160_vm5, %v2720_v18 }
0x3b64   :  { %4576 = vmatprep.mubr.msk.f32.mxu1 %vm5256_vm0, %v5255_v1 }
0x3b66   :  { %v1951_v23 = vpop.permute.xlu1 %1950 }
0x3b67   :  { %v1953_v24 = vmul.f32 %v1951_v23, %v1944_v45 }
0x3b69   :  { %1955 = vrot.lane.b32.xlu1 %v1953_v24, %s5258_s22 }
0x3bdb   :  { %v1956_v22 = vpop.permute.xlu1 %1955 }
0x3bdc   :  { %v5760_v9 = vadd.f32 %v1956_v22, %v1948_v26 }
0x3bde   :  { %5083 = vtanh.f32 %v5760_v9  ;;  %v3015_v23 = vrot.slane %v5760_v9, 6 }
0x3be8   :  { %v5084_v27 = vpop.eup %5083 }
0x3be9   :  { %1961 = vrot.lane.b32.xlu1 %v5084_v27, %s5257_s21 }
0x3c36   :  { %v2789_v28 = vpop.f32.mrb[24].mxu1 }
0x3c37   :  { %v2794_v14 = vrot.slane %v2789_v28, 2  ;;  %v4556_v56 = vpop.f32.mrb[25].mxu1 }
0x3c39   :  { %v2796_v31 = vadd.f32 %v2794_v14, %v5711_v47  ;;  %v2925_v47 = vld [vmem:[#allocation5 + $0xa0] sm:$0xff] }
0x3c3a   :  { %v5769_v29 = vpack.c.bf16 %v2926_v42, %v2925_v47 }
0x3c3b   :  { %v4081_v32 = vmul.f32 -1.442695, %v2796_v31 }
0x3c3c   :  { %4833 = vmatpush3.bf16.msra.mxu1 %v5769_v29 }
0x3c3d   :  { %5085 = vpow2.f32 %v4081_v32  ;;  %4834 = vmatprep.subr.bf16.mxu1 %v5254_v0 }
0x3c3e   :  { %5087 = vtanh.f32 %v2796_v31 }
0x3c40   :  { %4836 = vmatpush3.bf16.msra.mxu1 %v5773_v50 }
0x3c41   :  { %4843 = vmatprep.subr.bf16.mxu1 %v5254_v0 }
0x3c47   :  { %v5086_v34 = vpop.eup %5085 }
0x3c48   :  { %v2801_v63 = vadd.f32 1.0, %v5086_v34  ;;  %v5088_v38 = vpop.eup %5087 }
0x3c4a   :  { %5089 = vrcp.f32 %v2801_v63 }
0x3c54   :  { %v5090_v35 = vpop.eup %5089 }
0x3c55   :  { %v2804_v37 = vsel %vm5354_vm4, %v5088_v38, %v5090_v35 }
0x3c56   :  { %2810 = vrot.lane.b32.xlu0 %v2804_v37, %s5257_s21  ;;  %v2808_v41 = vmul.f32 %v2806_v40, %v2804_v37 }
0x3c5b   :  { %v1962_v59 = vpop.permute.xlu1 %1961 }
0x3c5c   :  { %v1964_v60 = vmul.f32 %v1962_v59, %v1944_v45 }
0x3c5e   :  { %v2930_v12 = vrot.slane %v1964_v60, 6 }
0x3cc8   :  { %v2811_v5 = vpop.permute.xlu0 %2810 }
0x3cc9   :  { %v2813_v39 = vmul.f32 %v2811_v5, %v2804_v37 }
0x3ccb   :  { %2815 = vrot.lane.b32.xlu0 %v2813_v39, %s5258_s22 }
0x3d3d   :  { %v2816_v46 = vpop.permute.xlu0 %2815 }
0x3d3e   :  { %v2818_v48 = vadd.f32 %v2816_v46, %v2808_v41 }
0x3d40   :  { %5091 = vtanh.f32 %v2818_v48 }
0x3d4a   :  { %v5092_v57 = vpop.eup %5091 }
0x3d4b   :  { %2821 = vrot.lane.b32.xlu0 %v5092_v57, %s5257_s21 }
0x3d4f   :  { %2842 = vrot.lane.b32.xlu0 %v5700_v36, %s5258_s22 }
0x3d53   :  { %2931 = vrot.lane.b32.xlu0 %v2930_v12, %s5258_s22 }
0x3dbd   :  { %v2822_v61 = vpop.permute.xlu0 %2821 }
0x3dbe   :  { %v2824_v62 = vmul.f32 %v2822_v61, %v2804_v37 }
0x3dc0   :  { %v2830_v2 = vsel %vm1015_vm8, %v5749_v44, %v2824_v62 }
0x3dc1   :  { %v2843_v3 = vpop.permute.xlu0 %2842  ;;  %2844 = vrot.lane.b32.xlu1 %v2830_v2, %s5258_s22 }
0x3dc2   :  { %4565 = vmatprep.mubr.msk.f32.mxu0 %vm160_vm5, %v2843_v3 }
0x3dc5   :  { %v2932_v4 = vpop.permute.xlu0 %2931 }
0x3dc6   :  { %4577 = vmatmul.mubr.msk.f32.vlgmr.msra.gmra.mrb[26].mxu1 %vm160_vm5, %v2932_v4 }
0x3dc7   :  { %4845 = vmatpush3.bf16.msra.mxu1 %v5769_v29  ;;  %4598 = vmatprep.mubr.msk.f32.mxu1 %vm5256_vm0, %v5255_v1 }
0x3dc8   :  { %4846 = vmatprep.subr.bf16.mxu1 %v5254_v0 }
0x3dcb   :  { %4848 = vmatpush3.bf16.msra.mxu1 %v5773_v50 }
0x3dcc   :  { %4855 = vmatprep.subr.bf16.mxu1 %v5254_v0 }
0x3e33   :  { %v2845_v36 = vpop.permute.xlu1 %2844 }
0x3e34   :  { %4566 = vmatmul.mubr.msk.f32.vlgmr.msra.gmra.mrb[28].mxu0 %vm160_vm5, %v2845_v36 }
0x3e35   :  { %4839 = vmatpush3.bf16.msra.mxu0 %v5769_v29  ;;  %4587 = vmatprep.mubr.msk.f32.mxu0 %vm5256_vm0, %v5255_v1 }
0x3e36   :  { %4840 = vmatprep.subr.bf16.mxu0 %v5254_v0 }
0x3e39   :  { %4842 = vmatpush3.bf16.msra.mxu0 %v5773_v50 }
0x3e3a   :  { %4849 = vmatprep.subr.bf16.mxu0 %v5254_v0 }
0x3e99   :  { %v3001_v6 = vpop.f32.mrb[26].mxu1 }
0x3e9a   :  { %v4578_v19 = vpop.f32.mrb[27].mxu1 }
0x3f07   :  { %v4567_v7 = vpop.f32.mrb[28].mxu0 }
0x3f08   :  { %v5800_v10 = vadd.f32 %v4567_v7, %v4082_v43  ;;  %v2916_v11 = vpop.f32.mrb[29].mxu0 }
0x3f09   :  { %v5802_v13 = vadd.f32 %v4082_v43, %v2916_v11 }
0x3f0b   :  { %v3005_v15 = vadd.f32 %v3001_v6, %v5802_v13 }
0x3f0d   :  { %v4086_v58 = vmul.f32 -1.442695, %v3005_v15 }
0x3f0f   :  { %5093 = vpow2.f32 %v4086_v58 }
0x3f10   :  { %5095 = vtanh.f32 %v3005_v15 }
0x3f19   :  { %v5094_v17 = vpop.eup %5093 }
0x3f1a   :  { %v3010_v16 = vadd.f32 1.0, %v5094_v17  ;;  %v5096_v44 = vpop.eup %5095 }
0x3f1c   :  { %5097 = vrcp.f32 %v3010_v16 }
0x3f26   :  { %v5098_v8 = vpop.eup %5097 }
0x3f27   :  { %v3013_v52 = vsel %vm5354_vm4, %v5096_v44, %v5098_v8 }
0x3f28   :  { %3019 = vrot.lane.b32.xlu1 %v3013_v52, %s5257_s21  ;;  %v3017_v24 = vmul.f32 %v3015_v23, %v3013_v52 }
0x3f9a   :  { %v3020_v45 = vpop.permute.xlu1 %3019 }
0x3f9b   :  { %v3022_v18 = vmul.f32 %v3020_v45, %v3013_v52 }
0x3f9d   :  { %3024 = vrot.lane.b32.xlu0 %v3022_v18, %s5258_s22 }
0x400f   :  { %v3025_v25 = vpop.permute.xlu0 %3024 }
0x4010   :  { %v3027_v26 = vadd.f32 %v3025_v25, %v3017_v24 }
0x4012   :  { %5099 = vtanh.f32 %v3027_v26  ;;  %v3122_v41 = vrot.slane %v3027_v26, 6 }
0x401c   :  { %v5100_v22 = vpop.eup %5099 }
0x401d   :  { %3030 = vrot.lane.b32.xlu1 %v5100_v22, %s5257_s21 }
0x408f   :  { %v3031_v27 = vpop.permute.xlu1 %3030 }
0x4090   :  { %v5811_v28 = vmul.f32 %v3031_v27, %v3013_v52 }
0x4092   :  { %3035 = vrot.lane.b32.xlu0 %v5811_v28, %s5258_s22 }
0x4104   :  { %v3036_v14 = vpop.permute.xlu0 %3035 }
0x4105   :  { %4588 = vmatmul.mubr.msk.f32.vlgmr.msra.gmra.mrb[30].mxu0 %vm160_vm5, %v3036_v14 }
0x4106   :  { %4851 = vmatpush3.bf16.msra.mxu0 %v5769_v29  ;;  %4609 = vmatprep.mubr.msk.f32.mxu0 %vm5256_vm0, %v5255_v1 }
0x4107   :  { %4852 = vmatprep.subr.bf16.mxu0 %v5254_v0 }
0x410a   :  { %4854 = vmatpush3.bf16.msra.mxu0 %v5773_v50 }
0x410b   :  { %4861 = vmatprep.subr.bf16.mxu0 %v5254_v0 }
0x41d8   :  { %v3105_v9 = vpop.f32.mrb[30].mxu0 }
0x41d9   :  { %v3110_v56 = vrot.slane %v3105_v9, 6  ;;  %v4589_v31 = vpop.f32.mrb[31].mxu0 }
0x41db   :  { %v3112_v32 = vadd.f32 %v3110_v56, %v5802_v13 }
0x41dd   :  { %v4088_v34 = vmul.f32 -1.442695, %v3112_v32 }
0x41df   :  { %5101 = vpow2.f32 %v4088_v34 }
0x41e0   :  { %5103 = vtanh.f32 %v3112_v32 }
0x41e9   :  { %v5102_v63 = vpop.eup %5101 }
0x41ea   :  { %v3117_v38 = vadd.f32 1.0, %v5102_v63  ;;  %v5104_v35 = vpop.eup %5103 }
0x41ec   :  { %5105 = vrcp.f32 %v3117_v38 }
0x41f6   :  { %v5106_v37 = vpop.eup %5105 }
0x41f7   :  { %v3120_v5 = vsel %vm5354_vm4, %v5104_v35, %v5106_v37 }
0x41f8   :  { %3126 = vrot.lane.b32.xlu1 %v3120_v5, %s5257_s21  ;;  %v3124_v47 = vmul.f32 %v3122_v41, %v3120_v5 }
0x426a   :  { %v3127_v39 = vpop.permute.xlu1 %3126 }
0x426b   :  { %v3129_v40 = vmul.f32 %v3127_v39, %v3120_v5 }
0x426d   :  { %3131 = vrot.lane.b32.xlu0 %v3129_v40, %s5258_s22 }
0x42df   :  { %v3132_v42 = vpop.permute.xlu0 %3131 }
0x42e0   :  { %v3134_v46 = vadd.f32 %v3132_v42, %v3124_v47 }
0x42e2   :  { %5107 = vtanh.f32 %v3134_v46  ;;  %v3230_v4 = vrot.slane %v3134_v46, 6 }
0x42ec   :  { %v5108_v48 = vpop.eup %5107 }
0x42ed   :  { %3137 = vrot.lane.b32.xlu1 %v5108_v48, %s5257_s21 }
0x435f   :  { %v3138_v49 = vpop.permute.xlu1 %3137 }
0x4360   :  { %v3140_v33 = vmul.f32 %v3138_v49, %v3120_v5 }
0x4362   :  { %v3142_v21 = vrot.slane %v3140_v33, 2  ;;  %v3785_v15 = vsel %vm1011_vm6, %v5811_v28, %v3140_v33 }
0x4364   :  { %3143 = vrot.lane.b32.xlu0 %v3142_v21, %s5258_s22 }
0x43d6   :  { %v3144_v20 = vpop.permute.xlu0 %3143 }
0x43d7   :  { %4599 = vmatmul.mubr.msk.f32.vlgmr.msra.gmra.mrb[28].mxu1 %vm160_vm5, %v3144_v20 }
0x43d8   :  { %4857 = vmatpush3.bf16.msra.mxu1 %v5769_v29  ;;  %4620 = vmatprep.mubr.msk.f32.mxu1 %vm5256_vm0, %v5255_v1 }
0x43d9   :  { %4858 = vmatprep.subr.bf16.mxu1 %v5254_v0 }
0x43dc   :  { %4860 = vmatpush3.bf16.msra.mxu1 %v5773_v50 }
0x43dd   :  { %4867 = vmatprep.subr.bf16.mxu1 %v5254_v0 }
0x44aa   :  { %v3213_v51 = vpop.f32.mrb[28].mxu1 }
0x44ab   :  { %v3218_v53 = vrot.slane %v3213_v51, 4  ;;  %v4600_v54 = vpop.f32.mrb[29].mxu1 }
0x44ad   :  { %v3220_v55 = vadd.f32 %v3218_v53, %v5802_v13 }
0x44af   :  { %v4090_v57 = vmul.f32 -1.442695, %v3220_v55 }
0x44b1   :  { %5109 = vpow2.f32 %v4090_v57 }
0x44b2   :  { %5111 = vtanh.f32 %v3220_v55 }
0x44bb   :  { %v5110_v59 = vpop.eup %5109 }
0x44bc   :  { %v3225_v60 = vadd.f32 1.0, %v5110_v59  ;;  %v5112_v12 = vpop.eup %5111 }
0x44be   :  { %5113 = vrcp.f32 %v3225_v60 }
0x44c8   :  { %v5114_v61 = vpop.eup %5113 }
0x44c9   :  { %v3228_v62 = vsel %vm5354_vm4, %v5112_v12, %v5114_v61 }
0x44ca   :  { %3234 = vrot.lane.b32.xlu1 %v3228_v62, %s5257_s21  ;;  %v3232_v36 = vmul.f32 %v3230_v4, %v3228_v62 }
0x453c   :  { %v3235_v2 = vpop.permute.xlu1 %3234 }
0x453d   :  { %v3237_v3 = vmul.f32 %v3235_v2, %v3228_v62 }
0x453f   :  { %3239 = vrot.lane.b32.xlu0 %v3237_v3, %s5258_s22 }
0x45b1   :  { %v3240_v6 = vpop.permute.xlu0 %3239 }
0x45b2   :  { %v3242_v19 = vadd.f32 %v3240_v6, %v3232_v36 }
0x45b4   :  { %5115 = vtanh.f32 %v3242_v19  ;;  %v3338_v14 = vrot.slane %v3242_v19, 6 }
0x45be   :  { %v5116_v43 = vpop.eup %5115 }
0x45bf   :  { %3245 = vrot.lane.b32.xlu1 %v5116_v43, %s5257_s21 }
0x4631   :  { %v3246_v7 = vpop.permute.xlu1 %3245 }
0x4632   :  { %v3248_v11 = vmul.f32 %v3246_v7, %v3228_v62 }
0x4634   :  { %v3250_v58 = vrot.slane %v3248_v11, 4  ;;  %v3786_v17 = vsel %vm1013_vm7, %v3785_v15, %v3248_v11 }
0x4636   :  { %3251 = vrot.lane.b32.xlu0 %v3250_v58, %s5258_s22 }
0x46a8   :  { %v3252_v16 = vpop.permute.xlu0 %3251 }
0x46a9   :  { %4610 = vmatmul.mubr.msk.f32.vlgmr.msra.gmra.mrb[32].mxu0 %vm160_vm5, %v3252_v16 }
0x46aa   :  { %4863 = vmatpush3.bf16.msra.mxu0 %v5769_v29  ;;  %4631 = vmatprep.mubr.msk.f32.mxu0 %vm5256_vm0, %v5255_v1 }
0x46ab   :  { %4864 = vmatprep.subr.bf16.mxu0 %v5254_v0 }
0x46ae   :  { %4866 = vmatpush3.bf16.msra.mxu0 %v5773_v50 }
0x46af   :  { %4873 = vmatprep.subr.bf16.mxu0 %v5254_v0 }
0x477c   :  { %v3321_v44 = vpop.f32.mrb[32].mxu0 }
0x477d   :  { %v3326_v8 = vrot.slane %v3321_v44, 2  ;;  %v4611_v52 = vpop.f32.mrb[33].mxu0 }
0x477f   :  { %v3328_v45 = vadd.f32 %v3326_v8, %v5802_v13 }
0x4781   :  { %v4092_v18 = vmul.f32 -1.442695, %v3328_v45 }
0x4783   :  { %5117 = vpow2.f32 %v4092_v18 }
0x4784   :  { %5119 = vtanh.f32 %v3328_v45 }
0x478d   :  { %v5118_v23 = vpop.eup %5117 }
0x478e   :  { %v3333_v24 = vadd.f32 1.0, %v5118_v23  ;;  %v5120_v25 = vpop.eup %5119 }
0x4790   :  { %5121 = vrcp.f32 %v3333_v24 }
0x479a   :  { %v5122_v26 = vpop.eup %5121 }
0x479b   :  { %v3336_v22 = vsel %vm5354_vm4, %v5120_v25, %v5122_v26 }
0x479c   :  { %3342 = vrot.lane.b32.xlu1 %v3336_v22, %s5257_s21  ;;  %v3340_v9 = vmul.f32 %v3338_v14, %v3336_v22 }
0x480e   :  { %v3343_v27 = vpop.permute.xlu1 %3342 }
0x480f   :  { %v3345_v28 = vmul.f32 %v3343_v27, %v3336_v22 }
0x4811   :  { %3347 = vrot.lane.b32.xlu0 %v3345_v28, %s5258_s22 }
0x4883   :  { %v3348_v13 = vpop.permute.xlu0 %3347 }
0x4884   :  { %v3350_v56 = vadd.f32 %v3348_v13, %v3340_v9 }
0x4886   :  { %5123 = vtanh.f32 %v3350_v56  ;;  %v3443_v21 = vrot.slane %v3350_v56, 6 }
0x4890   :  { %v5124_v31 = vpop.eup %5123 }
0x4891   :  { %3353 = vrot.lane.b32.xlu1 %v5124_v31, %s5257_s21 }
0x4903   :  { %v3354_v32 = vpop.permute.xlu1 %3353 }
0x4904   :  { %v3356_v34 = vmul.f32 %v3354_v32, %v3336_v22 }
0x4906   :  { %v3358_v63 = vrot.slane %v3356_v34, 6  ;;  %v5860_v38 = vsel %vm1015_vm8, %v3786_v17, %v3356_v34 }
0x4908   :  { %3359 = vrot.lane.b32.xlu0 %v3358_v63, %s5258_s22 }
0x497a   :  { %v3360_v35 = vpop.permute.xlu0 %3359 }
0x497b   :  { %4621 = vmatmul.mubr.msk.f32.vlgmr.msra.gmra.mrb[30].mxu1 %vm160_vm5, %v3360_v35 }
0x497c   :  { %4869 = vmatpush3.bf16.msra.mxu1 %v5769_v29  ;;  %4642 = vmatprep.mubr.msk.f32.mxu1 %vm5256_vm0, %v5255_v1 }
0x497d   :  { %4870 = vmatprep.subr.bf16.mxu1 %v5254_v0 }
0x4980   :  { %4872 = vmatpush3.bf16.msra.mxu1 %v5773_v50 }
0x4a4e   :  { %v3429_v37 = vpop.f32.mrb[30].mxu1 }
0x4a4f   :  { %v3433_v5 = vadd.f32 %v3429_v37, %v5800_v10  ;;  %v4622_v39 = vpop.f32.mrb[31].mxu1 }
0x4a51   :  { %v4094_v40 = vmul.f32 -1.442695, %v3433_v5 }
0x4a53   :  { %5125 = vpow2.f32 %v4094_v40 }
0x4a54   :  { %5127 = vtanh.f32 %v3433_v5 }
0x4a5d   :  { %v5126_v41 = vpop.eup %5125 }
0x4a5e   :  { %v3438_v47 = vadd.f32 1.0, %v5126_v41  ;;  %v5128_v42 = vpop.eup %5127 }
0x4a60   :  { %5129 = vrcp.f32 %v3438_v47 }
0x4a6a   :  { %v5130_v46 = vpop.eup %5129 }
0x4a6b   :  { %v3441_v48 = vsel %vm5354_vm4, %v5128_v42, %v5130_v46 }
0x4a6c   :  { %3447 = vrot.lane.b32.xlu1 %v3441_v48, %s5257_s21  ;;  %v3445_v20 = vmul.f32 %v3443_v21, %v3441_v48 }
0x4ade   :  { %v3448_v49 = vpop.permute.xlu1 %3447 }
0x4adf   :  { %v3450_v33 = vmul.f32 %v3448_v49, %v3441_v48 }
0x4ae1   :  { %3452 = vrot.lane.b32.xlu0 %v3450_v33, %s5258_s22 }
0x4b53   :  { %v3453_v51 = vpop.permute.xlu0 %3452 }
0x4b54   :  { %v3455_v53 = vadd.f32 %v3453_v51, %v3445_v20 }
0x4b56   :  { %5131 = vtanh.f32 %v3455_v53  ;;  %v3550_v6 = vrot.slane %v3455_v53, 6 }
0x4b60   :  { %v5132_v54 = vpop.eup %5131 }
0x4b61   :  { %3458 = vrot.lane.b32.xlu1 %v5132_v54, %s5257_s21 }
0x4bd3   :  { %v3459_v55 = vpop.permute.xlu1 %3458 }
0x4bd4   :  { %v5875_v57 = vmul.f32 %v3459_v55, %v3441_v48 }
0x4bd6   :  { %3463 = vrot.lane.b32.xlu0 %v5875_v57, %s5258_s22 }
0x4c48   :  { %v3464_v59 = vpop.permute.xlu0 %3463 }
0x4c49   :  { %4632 = vmatmul.mubr.msk.f32.vlgmr.msra.gmra.mrb[34].mxu0 %vm160_vm5, %v3464_v59  ;;  %v3791_v59 = vld [vmem:[#allocation5 + $0xc0] sm:$0xff] }
0x4c4a   :  { %4875 = vmatpush3.bf16.msra.mxu0 %v5769_v29  ;;  %4653 = vmatprep.mubr.msk.f32.mxu0 %vm5256_vm0, %v5255_v1 }
0x4c4b   :  { %4876 = vmatprep.subr.bf16.mxu0 %v5254_v0 }
0x4c4e   :  { %4878 = vmatpush3.bf16.msra.mxu0 %v5773_v50 }
0x4d1c   :  { %v3533_v60 = vpop.f32.mrb[34].mxu0 }
0x4d1d   :  { %v3538_v12 = vrot.slane %v3533_v60, 6  ;;  %v4633_v61 = vpop.f32.mrb[35].mxu0  ;;  %v3792_v60 = vld [vmem:[#allocation5 + $0xc8] sm:$0xff] }
0x4d1e   :  { %v4879_v30 = vpack.c.bf16 %v3792_v60, %v3791_v59  ;;  %v3794_v61 = vld [vmem:[#allocation5 + $0xd8] sm:$0xff] }
0x4d1f   :  { %v3540_v62 = vadd.f32 %v3538_v12, %v5800_v10  ;;  %v3793_v12 = vld [vmem:[#allocation5 + $0xd0] sm:$0xff] }
0x4d20   :  { %4880 = vmatprep.subr.bf16.mxu1 %v4879_v30 }
0x4d21   :  { %v4096_v2 = vmul.f32 -1.442695, %v3540_v62 }
0x4d23   :  { %5133 = vpow2.f32 %v4096_v2 }
0x4d24   :  { %5135 = vtanh.f32 %v3540_v62  ;;  %v4883_v62 = vpack.c.bf16 %v3794_v61, %v3793_v12 }
0x4d2d   :  { %v5134_v3 = vpop.eup %5133 }
0x4d2e   :  { %v3545_v4 = vadd.f32 1.0, %v5134_v3  ;;  %v5136_v36 = vpop.eup %5135 }
0x4d30   :  { %5137 = vrcp.f32 %v3545_v4 }
0x4d3a   :  { %v5138_v29 = vpop.eup %5137 }
0x4d3b   :  { %v3548_v1 = vsel %vm5354_vm4, %v5136_v36, %v5138_v29  ;;  %v4101_v29 = vld [vmem:[#allocation5 + $0xe2] ss:$0 sm:$0xff] }
0x4d3c   :  { %3554 = vrot.lane.b32.xlu1 %v3548_v1, %s5257_s21  ;;  %v3552_v19 = vmul.f32 %v3550_v6, %v3548_v1 }
0x4dae   :  { %v3555_v0 = vpop.permute.xlu1 %3554 }
0x4daf   :  { %v3557_v50 = vmul.f32 %v3555_v0, %v3548_v1  ;;  %v3887_v0 = vld [vmem:[%s5940_s1] sm:$0x3]  ;;  %s5259_s1 = smov [#allocation7]  }
0x4db0   :  { %vm3913_vm9 = vcmp.eq.s32.totalorder %v3887_v0, 0  ;;  %vm3926_vm10 = vcmp.eq.s32.totalorder %v3887_v0, 1  ;;  %vm3938_vm11 = vcmp.eq.s32.totalorder %v3887_v0, 2  ;;  %vm3950_vm12 = vcmp.eq.s32.totalorder %v3887_v0, 3 }
0x4db1   :  { %3559 = vrot.lane.b32.xlu0 %v3557_v50, %s5258_s22  ;;  %vm3957_vm13 = vcmp.eq.s32.totalorder %v3887_v0, 4  ;;  %vm3967_vm14 = vcmp.eq.s32.totalorder %v3887_v0, 5  ;;  %vm3977_vm15 = vcmp.eq.s32.totalorder %v3887_v0, 6  ;;  %vm3987_vm0 = vcmp.eq.s32.totalorder %v3887_v0, 7 }
0x4e23   :  { %v3560_v43 = vpop.permute.xlu0 %3559 }
0x4e24   :  { %v3562_v7 = vadd.f32 %v3560_v43, %v3552_v19 }
0x4e26   :  { %5139 = vtanh.f32 %v3562_v7  ;;  %v3658_v14 = vrot.slane %v3562_v7, 6 }
0x4e30   :  { %v5140_v11 = vpop.eup %5139 }
0x4e31   :  { %3565 = vrot.lane.b32.xlu1 %v5140_v11, %s5257_s21 }
0x4ea3   :  { %v3566_v15 = vpop.permute.xlu1 %3565 }
0x4ea4   :  { %v3568_v58 = vmul.f32 %v3566_v15, %v3548_v1 }
0x4ea6   :  { %v3570_v17 = vrot.slane %v3568_v58, 2  ;;  %v3788_v63 = vsel %vm1011_vm6, %v5875_v57, %v3568_v58 }
0x4ea8   :  { %3571 = vrot.lane.b32.xlu0 %v3570_v17, %s5258_s22 }
0x4f1a   :  { %v3572_v16 = vpop.permute.xlu0 %3571 }
0x4f1b   :  { %4643 = vmatmul.mubr.msk.f32.vlgmr.msra.gmra.mrb[32].mxu1 %vm160_vm5, %v3572_v16 }
0x4f1c   :  { %4882 = vmatpush3.bf16.msra.mxu1 %v4879_v30 }
0x4f1d   :  { %4884 = vmatprep.subr.bf16.mxu1 %v4883_v62 }
0x4f20   :  { %4886 = vmatpush3.bf16.msra.mxu1 %v4883_v62 }
0x4fee   :  { %v3641_v44 = vpop.f32.mrb[32].mxu1 }
0x4fef   :  { %v3646_v8 = vrot.slane %v3641_v44, 4  ;;  %v4644_v52 = vpop.f32.mrb[33].mxu1 }
0x4ff1   :  { %v3648_v45 = vadd.f32 %v3646_v8, %v5800_v10 }
0x4ff3   :  { %v4098_v18 = vmul.f32 -1.442695, %v3648_v45 }
0x4ff5   :  { %5141 = vpow2.f32 %v4098_v18 }
0x4ff6   :  { %5143 = vtanh.f32 %v3648_v45 }
0x4fff   :  { %v5142_v23 = vpop.eup %5141 }
0x5000   :  { %v3653_v24 = vadd.f32 1.0, %v5142_v23  ;;  %v5144_v25 = vpop.eup %5143 }
0x5002   :  { %5145 = vrcp.f32 %v3653_v24 }
0x500c   :  { %v5146_v26 = vpop.eup %5145 }
0x500d   :  { %v3656_v22 = vsel %vm5354_vm4, %v5144_v25, %v5146_v26 }
0x500e   :  { %3662 = vrot.lane.b32.xlu1 %v3656_v22, %s5257_s21  ;;  %v3660_v9 = vmul.f32 %v3658_v14, %v3656_v22 }
0x5080   :  { %v3663_v27 = vpop.permute.xlu1 %3662 }
0x5081   :  { %v3665_v28 = vmul.f32 %v3663_v27, %v3656_v22 }
0x5083   :  { %3667 = vrot.lane.b32.xlu0 %v3665_v28, %s5258_s22 }
0x50f5   :  { %v3668_v13 = vpop.permute.xlu0 %3667 }
0x50f6   :  { %v3670_v56 = vadd.f32 %v3668_v13, %v3660_v9 }
0x50f8   :  { %5147 = vtanh.f32 %v3670_v56 }
0x5102   :  { %v5148_v31 = vpop.eup %5147 }
0x5103   :  { %3673 = vrot.lane.b32.xlu1 %v5148_v31, %s5257_s21 }
0x5175   :  { %v3674_v32 = vpop.permute.xlu1 %3673 }
0x5176   :  { %v3676_v34 = vmul.f32 %v3674_v32, %v3656_v22 }
0x5178   :  { %v3678_v35 = vrot.slane %v3676_v34, 4  ;;  %v3789_v37 = vsel %vm1013_vm7, %v3788_v63, %v3676_v34 }
0x517a   :  { %3679 = vrot.lane.b32.xlu0 %v3678_v35, %s5258_s22 }
0x51ec   :  { %v3680_v5 = vpop.permute.xlu0 %3679 }
0x51ed   :  { %4654 = vmatmul.mubr.msk.f32.vlgmr.msra.gmra.mrb[36].mxu0 %vm160_vm5, %v3680_v5 }
0x52c0   :  { %v3749_v39 = vpop.f32.mrb[36].mxu0 }
0x52c1   :  { %v3754_v40 = vrot.slane %v3749_v39, 2  ;;  %v4655_v41 = vpop.f32.mrb[37].mxu0 }
0x52c3   :  { %v3756_v47 = vadd.f32 %v3754_v40, %v5800_v10  ;;  %v3766_v10 = vrot.slane %v3670_v56, 6 }
0x52c5   :  { %v4100_v42 = vmul.f32 -1.442695, %v3756_v47 }
0x52c7   :  { %5149 = vpow2.f32 %v4100_v42 }
0x52c8   :  { %5151 = vtanh.f32 %v3756_v47 }
0x52d1   :  { %v5150_v46 = vpop.eup %5149 }
0x52d2   :  { %v3761_v48 = vadd.f32 1.0, %v5150_v46  ;;  %v5152_v49 = vpop.eup %5151 }
0x52d4   :  { %5153 = vrcp.f32 %v3761_v48 }
0x52de   :  { %v5154_v33 = vpop.eup %5153 }
0x52df   :  { %v3764_v21 = vsel %vm5354_vm4, %v5152_v49, %v5154_v33 }
0x52e0   :  { %3770 = vrot.lane.b32.xlu1 %v3764_v21, %s5257_s21  ;;  %v3768_v53 = vmul.f32 %v3766_v10, %v3764_v21 }
0x5352   :  { %v3771_v20 = vpop.permute.xlu1 %3770 }
0x5353   :  { %v3773_v51 = vmul.f32 %v3771_v20, %v3764_v21 }
0x5355   :  { %3775 = vrot.lane.b32.xlu0 %v3773_v51, %s5258_s22 }
0x5359   :  { %3802 = vrot.lane.b32.xlu0 %v5860_v38, %s5258_s22 }
0x53c7   :  { %v3776_v54 = vpop.permute.xlu0 %3775 }
0x53c8   :  { %v3778_v55 = vadd.f32 %v3776_v54, %v3768_v53 }
0x53ca   :  { %5155 = vtanh.f32 %v3778_v55 }
0x53cb   :  { %v3803_v57 = vpop.permute.xlu0 %3802 }
0x53cc   :  { %4664 = vmatprep.mubr.msk.f32.mxu1 %vm160_vm5, %v3803_v57 }
0x53d4   :  { %v5156_v2 = vpop.eup %5155 }
0x53d5   :  { %3781 = vrot.lane.b32.xlu1 %v5156_v2, %s5257_s21 }
0x5447   :  { %v3782_v38 = vpop.permute.xlu1 %3781 }
0x5448   :  { %v3784_v3 = vmul.f32 %v3782_v38, %v3764_v21 }
0x544a   :  { %v3790_v4 = vsel %vm1015_vm8, %v3789_v37, %v3784_v3 }
0x544b   :  { %3804 = vrot.lane.b32.xlu1 %v3790_v4, %s5258_s22 }
0x54bd   :  { %v3805_v36 = vpop.permute.xlu1 %3804 }
0x54be   :  { %4665 = vmatmul.mubr.msk.f32.vlgmr.msra.gmra.mrb[34].mxu1 %vm160_vm5, %v3805_v36 }
0x5591   :  { %v4666_v1 = vpop.f32.mrb[34].mxu1 }
0x5592   :  { %v3882_v50 = vadd.f32 %v4666_v1, %v4101_v29  ;;  %v3876_v6 = vpop.f32.mrb[35].mxu1 }
0x5593   :  { %v3877_v19 = vadd.f32 %v4101_v29, %v3876_v6 }
0x5594   :  { %3886 = vst.msk [vmem:[%s5943_s4 + $0x8] sm:$0xff] %vm72_vm1, %v3882_v50  ;;  %v3900_v18 = vrot.slane %v3882_v50, 2  ;;  %v3903_v26 = vrot.slane %v3882_v50, 4  ;;  %v3958_v22 = vsel %vm3957_vm13, %v3882_v50, 0.0  ;;  %v3906_v14 = vrot.slane %v3882_v50, 6 }
0x5595   :  { %3885 = vst.msk [vmem:[%s5943_s4] sm:$0xff] %vm72_vm1, %v3877_v19  ;;  %v3889_v43 = vrot.slane %v3877_v19, 2  ;;  %v3892_v7 = vrot.slane %v3877_v19, 4  ;;  %v3895_v15 = vrot.slane %v3877_v19, 6  ;;  %v3914_v58 = vsel %vm3913_vm9, %v3877_v19, 0.0  ;;  %s4019_s4 = sshll.u32 %s5259_s1, 4  ;;  %s4020_s4 = int_to_ptr.vmem [resolvable:$true] %s4019_s4 }
0x5596   :  { %v3968_v9 = vsel %vm3967_vm14, %v3900_v18, 0.0  ;;  %v3978_v31 = vsel %vm3977_vm15, %v3903_v26, 0.0  ;;  %v3988_v63 = vsel %vm3987_vm0, %v3906_v14, 0.0  ;;  %vm3994_vm1 = vcmask 123904   ;;  %s5220_s7 = scalar_lea.vmem %s4020_s4, 16  ;;  %s5224_s8 = scalar_lea.vmem %s4020_s4, 32 }
0x5597   :  { %v3891_v11 = vmax.f32 %v3877_v19, %v3889_v43  ;;  %v3927_v17 = vsel %vm3926_vm10, %v3889_v43, 0.0  ;;  %v3939_v8 = vsel %vm3938_vm11, %v3892_v7, 0.0  ;;  %v3951_v23 = vsel %vm3950_vm12, %v3895_v15, 0.0  ;;  %p5221_p2 = scmp.ne.s32.totalorder %s4020_s4, %s5220_s7  ;;  %p5225_p3 = scmp.lt.s32.totalorder %s4020_s4, %s4020_s4 }
0x5598   :  { %v3928_v16 = vadd.f32 %v3927_v17, %v3914_v58  ;;  %p5226_p4 = scmp.lt.s32.totalorder %s5224_s8, %s5220_s7 }
0x5599   :  { %v3894_v44 = vmax.f32 %v3891_v11, %v3892_v7 }
0x559a   :  { %v3940_v52 = vadd.f32 %v3939_v8, %v3928_v16  ;;  %p5227_p5 = por %p5226_p4, %p5225_p3 }
0x559b   :  { %v3897_v45 = vmax.f32 %v3894_v44, %v3895_v15 }
0x559c   :  { %v3952_v24 = vadd.f32 %v3951_v23, %v3940_v52  ;;  %p5228_p6 = pnand %p5227_p5, %p5221_p2 }
0x559d   :  { %v3898_v25 = vmax.f32 %v3897_v45, %v3882_v50 }
0x559e   :  { %v3959_v27 = vadd.f32 %v3958_v22, %v3952_v24 }
0x559f   :  { %v3902_v28 = vmax.f32 %v3898_v25, %v3900_v18 }
0x55a0   :  { %v3969_v13 = vadd.f32 %v3968_v9, %v3959_v27 }
0x55a1   :  { %v3905_v56 = vmax.f32 %v3902_v28, %v3903_v26 }
0x55a2   :  { %v3979_v32 = vadd.f32 %v3978_v31, %v3969_v13 }
0x55a3   :  { %v3908_v34 = vmax.f32 %v3905_v56, %v3906_v14 }
0x55a4   :  { %v3989_v35 = vadd.f32 %v3988_v63, %v3979_v32 }
0x55a5   :  { %v3909_v37 = vsub.f32 %v3877_v19, %v3908_v34  ;;  %v3917_v5 = vrot.slane %v3908_v34, 6  ;;  %v3929_v39 = vrot.slane %v3908_v34, 4  ;;  %v3941_v40 = vrot.slane %v3908_v34, 2 }
0x55a6   :  { %v3953_v41 = vsub.f32 %v3882_v50, %v3908_v34 }
0x55a7   :  { %v3910_v47 = vmul.f32 1.442695, %v3909_v37  ;;  %v3919_v42 = vsub.f32 %v3877_v19, %v3917_v5  ;;  %v3931_v46 = vsub.f32 %v3877_v19, %v3929_v39  ;;  %v3943_v48 = vsub.f32 %v3877_v19, %v3941_v40 }
0x55a8   :  { %v3960_v49 = vsub.f32 %v3882_v50, %v3917_v5  ;;  %v3970_v33 = vsub.f32 %v3882_v50, %v3929_v39  ;;  %v3980_v21 = vsub.f32 %v3882_v50, %v3941_v40  ;;  %v3954_v54 = vmul.f32 1.442695, %v3953_v41 }
0x55a9   :  { %v3920_v20 = vmul.f32 1.442695, %v3919_v42  ;;  %v3932_v51 = vmul.f32 1.442695, %v3931_v46  ;;  %v3944_v10 = vmul.f32 1.442695, %v3943_v48  ;;  %5157 = vpow2.f32 %v3910_v47 }
0x55aa   :  { %v3961_v53 = vmul.f32 1.442695, %v3960_v49  ;;  %v3971_v55 = vmul.f32 1.442695, %v3970_v33  ;;  %v3981_v57 = vmul.f32 1.442695, %v3980_v21 }
0x55ab   :  { %5159 = vpow2.f32 %v3920_v20 }
0x55ac   :  { %5161 = vpow2.f32 %v3932_v51 }
0x55ad   :  { %5163 = vpow2.f32 %v3944_v10 }
0x55ae   :  { %5165 = vpow2.f32 %v3961_v53 }
0x55af   :  { %5167 = vpow2.f32 %v3954_v54 }
0x55b0   :  { %5169 = vpow2.f32 %v3971_v55 }
0x55b1   :  { %5171 = vpow2.f32 %v3981_v57 }
0x55b3   :  { %v5158_v59 = vpop.eup %5157 }
0x55b5   :  { %v5160_v60 = vpop.eup %5159 }
0x55b6   :  { %v5162_v12 = vpop.eup %5161  ;;  %v3923_v30 = vrot.slane %v5160_v60, 2 }
0x55b7   :  { %v5164_v61 = vpop.eup %5163  ;;  %v3935_v2 = vrot.slane %v5162_v12, 4 }
0x55b8   :  { %v3925_v62 = vadd.f32 %v5158_v59, %v3923_v30  ;;  %v3947_v3 = vrot.slane %v5164_v61, 6  ;;  %v5166_v4 = vpop.eup %5165 }
0x55b9   :  { %v5168_v36 = vpop.eup %5167  ;;  %v3964_v50 = vrot.slane %v5166_v4, 2 }
0x55ba   :  { %v3937_v38 = vadd.f32 %v3935_v2, %v3925_v62  ;;  %v5170_v1 = vpop.eup %5169 }
0x55bb   :  { %v5172_v6 = vpop.eup %5171  ;;  %v3974_v43 = vrot.slane %v5170_v1, 4 }
0x55bc   :  { %v3949_v29 = vadd.f32 %v3947_v3, %v3937_v38  ;;  %v3984_v11 = vrot.slane %v5172_v6, 6 }
0x55be   :  { %v3956_v0 = vadd.f32 %v5168_v36, %v3949_v29 }
0x55c0   :  { %v3966_v19 = vadd.f32 %v3964_v50, %v3956_v0 }
0x55c2   :  { %v3976_v7 = vadd.f32 %v3974_v43, %v3966_v19 }
0x55c4   :  { %v3986_v15 = vadd.f32 %v3984_v11, %v3976_v7 }
0x55c6   :  { %5173 = vlog2.f32 %v3986_v15 }
0x55d0   :  { %v5174_v58 = vpop.eup %5173 }
0x55d1   :  { %v3991_v17 = vmul.f32 0.6931472, %v5174_v58 }
0x55d3   :  { %v3992_v16 = vadd.f32 %v3991_v17, %v3908_v34 }
0x55d5   :  { %v3993_v44 = vsub.f32 %v3992_v16, %v3989_v35 }
0x55d7   :  { %v3995_v8 = vsel %vm3994_vm1, %v3993_v44, 0.0 }
0x55d8   :  { %3996 = vadd.xlane.f32.xlu0 %v3995_v8 }
0x5665   :  { %v3997_v52 = vpop.xlane.xlu0 %3996 }
0x5666   :  { %v3998_v45 = vrot.slane %v3997_v52, 4 }
0x5668   :  { %v3999_v18 = vadd.f32 %v3998_v45, %v3997_v52 }
0x566a   :  { %v4000_v23 = vrot.slane %v3999_v18, 2 }
0x566c   :  { %v4001_v24 = vadd.f32 %v4000_v23, %v3999_v18 }
0x566e   :  { %v4002_v25 = vrot.slane %v4001_v24, 1 }
0x5670   :  { %v4003_v26 = vadd.f32 %v4002_v25, %v4001_v24 }
0x5672   :  { %4887 = vpush %v4003_v26 }
0x56a3   :  { %s4888_s30 = spop %4887 }
0x56a4   :  { %s4007_s6 = smul.f32 0.03125, %s4888_s30 }
0x56a6   :  { %v4008_v22 = vstv %s4007_s6 }
0x56a7   :  { %4010 = vst.msk [vmem:[#allocation7] sm:$0x1] %vm4009_vm2, %v4008_v22 }
0x56a8   :  { %5231 = shalt.err (!%p5228_p6)
}
0x56a9   :  { %s5232_s11 = scalar_lea.hbm %s5944_s5, 16 }
0x56aa   :  { %p5233_p7 = scmp.ne.s32.totalorder %s5944_s5, %s5232_s11  ;;  %p5236_p8 = scmp.lt.u32.totalorder %s5232_s11, %s5944_s5 }
0x56ac   :  { %p5238_p9 = pnand %p5236_p8, %p5233_p7 }
0x56ae   :  { %5241 = shalt.err (!%p5238_p9)
}
0x56af   :  { %4022 = dma.vmem_to_hbm [thread:$0]  %s4020_s4, 16, %s5944_s5, [#allocation4]  }
0x56b0   :  { %5246 = dma.done.wait [#allocation4], 16  }
0x56b1   :  { %5247 = vsyncadd [#allocation4], 4294967280 }
0x56b2   :  { %4028 = vsyncpa [#allocation3], 1 }
0x56b3   :  { %4029 = vsyncpa [#allocation6], 1 }
0x56b4   :  { %4030 = vsyncpa [#allocation4], 1 }

</bundles_post_ra>
